<compile_context>
chip_gen: v7x
topology: tpu7x:2x2x1
jax: 0.10.0
libtpu: 0.0.40
codegen_flags: <defaults>
</compile_context>

<pallas_src>
import numpy as np
import jax
import jax.numpy as jnp
from jax import lax
from jax.experimental import pallas as pl
from jax.experimental.pallas import tpu as pltpu

EPS = 1e-5
LANE = 128
LPAD = 8                                  # 8-aligned left pad inside the conv2 halo buffer
VMEM_LIMIT_BYTES = 48 * 1024 * 1024       # < 64 MiB (v7x physical), far below v5e/v6e


def _round_up(x, m):
    return ((x + m - 1) // m) * m


def _pad_to(a, shape):
    pads = [(0, s - d) for d, s in zip(a.shape, shape)]
    return jnp.pad(a, pads)


def _pick_rows(H, W, row_bytes, budget=4 << 20, cap_rows=4096, prefer_split=False):
    """Largest row-count divisor of H whose (rows*W)-row tile fits the byte budget.

    With prefer_split, prefer at least 2 strips per image (pipelining depth /
    megacore) as long as each strip still feeds the MXU >= 128 rows.
    """
    max_d = max(1, min(cap_rows // max(W, 1), budget // max(W * row_bytes, 1)))
    cands = [d for d in range(1, H + 1) if H % d == 0 and d <= max_d]
    if not cands:
        cands = [1]
    if prefer_split:
        sub = [d for d in cands if d < H and d * W >= 128]
        if sub:
            return max(sub)
    return max(cands)


# --------------------------------------------------------------------------
# forward
# --------------------------------------------------------------------------

def bottleneck_forward(x_nchw, params, *, compute_dtype=jnp.bfloat16):
    """Bottleneck(inplanes=4*planes, planes, stride=1, downsample=None) forward."""
    f32 = jnp.float32
    cdt = compute_dtype

    N, Cin, H, W = x_nchw.shape
    P = params["w1"].shape[1]
    Pe = params["w3"].shape[1]
    assert Cin == Pe, "downsample=None requires inplanes == planes * expansion"

    M = N * H * W
    Ci = _round_up(Cin, LANE)          # padded input / residual channels
    Cm = _round_up(P, LANE)            # padded mid channels
    Co = _round_up(Pe, LANE)           # padded output channels (== Ci here)

    TR = _pick_rows(H, W, max(Ci, Cm, Co) * 4)                 # 1x1 convs / elementwise
    TH = _pick_rows(H, W, 16 * Cm, prefer_split=True)          # conv2 H-strips
    nH = H // TR
    nS = H // TH

    # ---- pack params: channel-padded, matmul/lane-friendly layouts --------
    w1 = _pad_to(params["w1"], (Ci, Cm)).astype(cdt)                       # (Ci, Cm)
    w2 = params["w2"].reshape(3, 3, P, P)                                  # (dy, dx, in, out)
    w2 = _pad_to(w2, (3, 3, Cm, Cm)).reshape(3, 3 * Cm, Cm).astype(cdt)    # K = dx-major, cin
    w3 = _pad_to(params["w3"], (Cm, Co)).astype(cdt)                       # (Cm, Co)
    g1 = _pad_to(params["g1"].astype(f32), (Cm,)); b1 = _pad_to(params["b1"].astype(f32), (Cm,))
    g2 = _pad_to(params["g2"].astype(f32), (Cm,)); b2 = _pad_to(params["b2"].astype(f32), (Cm,))
    g3 = _pad_to(params["g3"].astype(f32), (Co,)); b3 = _pad_to(params["b3"].astype(f32), (Co,))

    # ---- input: NCHW -> channel-padded (N, H, W, Ci), kept in f32 so the
    # residual add matches PyTorch's f32 identity even on the bf16 path.
    x = jnp.transpose(x_nchw, (0, 2, 3, 1)).astype(f32)
    x = _pad_to(x, (N, H, W, Ci))

    cp = pltpu.CompilerParams(dimension_semantics=("parallel", "parallel"),
                              vmem_limit_bytes=VMEM_LIMIT_BYTES)

    def _bn_scale_bias(st, gamma, beta):
        """Reduce per-tile lane-dense [sum | sum_sq] partials -> scale/bias."""
        c = st.shape[-1] // 2
        s = jnp.sum(st.reshape(-1, 2 * c), axis=0)
        mean = s[:c] / M
        var = jnp.maximum(s[c:] / M - mean * mean, 0.0)       # biased (training-mode BN)
        scale = gamma * lax.rsqrt(var + EPS)
        bias = beta - mean * scale
        return scale.reshape(1, c), bias.reshape(1, c)

    # ---------------- kernel A: conv1 (1x1) + BN1 partial stats -------------
    def conv1_kernel(x_ref, w_ref, y_ref, st_ref):
        xb = x_ref[...].reshape(TR * W, Ci).astype(cdt)
        y = jnp.dot(xb, w_ref[...], preferred_element_type=f32)          # (TR*W, Cm) f32
        y_ref[...] = y.reshape(1, TR, W, Cm).astype(y_ref.dtype)
        sm = jnp.sum(y, axis=0, keepdims=True)
        sq = jnp.sum(y * y, axis=0, keepdims=True)
        st_ref[...] = jnp.concatenate([sm, sq], axis=-1).reshape(1, 1, 1, 2 * Cm)

    y1, st1 = pl.pallas_call(
        conv1_kernel,
        grid=(N, nH),
        in_specs=[
            pl.BlockSpec((1, TR, W, Ci), lambda n, t: (n, t, 0, 0)),
            pl.BlockSpec((Ci, Cm), lambda n, t: (0, 0)),
        ],
        out_specs=[
            pl.BlockSpec((1, TR, W, Cm), lambda n, t: (n, t, 0, 0)),
            pl.BlockSpec((1, 1, 1, 2 * Cm), lambda n, t: (n, t, 0, 0)),
        ],
        out_shape=[
            jax.ShapeDtypeStruct((N, H, W, Cm), cdt),
            jax.ShapeDtypeStruct((N, nH, 1, 2 * Cm), f32),
        ],
        compiler_params=cp,
    )(x, w1)
    scale1, bias1 = _bn_scale_bias(st1, g1, b1)

    # ---------------- kernel B: BN1+ReLU prologue, conv2 (3x3), BN2 stats ---
    Wb = LPAD + W + 1          # [unused .. col 7 = left zero][image cols][right zero]

    def conv2_kernel(y1_ref, w2_ref, s1_ref, b1_ref, y2_ref, st_ref, xpad_ref):
        s = pl.program_id(1)
        r0 = s * TH
        sc = s1_ref[...]
        bi = b1_ref[...]

        def bn_relu1(v):
            return jnp.maximum(v.astype(f32) * sc + bi, 0.0)

        # Only the two halo columns are ever read outside the freshly written
        # image data -> rewrite just those (cheap), never the whole buffer.
        zcol = jnp.zeros((TH + 2, 1, Cm), cdt)
        xpad_ref[:, pl.ds(LPAD - 1, 1), :] = zcol
        xpad_ref[:, pl.ds(LPAD + W, 1), :] = zcol

        # Top / bottom halo rows (zero at the image boundary, neighbour rows
        # of the resident y1 image block otherwise), BN1+ReLU applied.
        top = bn_relu1(y1_ref[0, pl.ds(jnp.maximum(r0 - 1, 0), 1), :, :])
        bot = bn_relu1(y1_ref[0, pl.ds(jnp.minimum(r0 + TH, H - 1), 1), :, :])
        top = jnp.where(s == 0, 0.0, top)
        bot = jnp.where(s == nS - 1, 0.0, bot)
        xpad_ref[pl.ds(0, 1), pl.ds(LPAD, W), :] = top.astype(cdt)
        xpad_ref[pl.ds(TH + 1, 1), pl.ds(LPAD, W), :] = bot.astype(cdt)

        # Interior rows: fused BN1 affine + ReLU, stored at an 8-aligned
        # sublane offset (unmasked stores).
        inner = bn_relu1(y1_ref[0, pl.ds(r0, TH), :, :])
        xpad_ref[pl.ds(1, TH), pl.ds(LPAD, W), :] = inner.astype(cdt)

        # dx-concatenated operand built ONCE per strip: (TH+2, W, 3*Cm).
        xcat = jnp.concatenate(
            [xpad_ref[:, pl.ds(LPAD - 1 + dx, W), :] for dx in range(3)], axis=-1)

        # 3 "fat" dy matmuls (K = 3*Cm each), accumulated as a value
        # (no acc_ref read-modify-write); y2 written exactly once.
        acc = jnp.dot(xcat[0:TH].reshape(TH * W, 3 * Cm), w2_ref[0],
                      preferred_element_type=f32)
        acc = acc + jnp.dot(xcat[1:TH + 1].reshape(TH * W, 3 * Cm), w2_ref[1],
                            preferred_element_type=f32)
        acc = acc + jnp.dot(xcat[2:TH + 2].reshape(TH * W, 3 * Cm), w2_ref[2],
                            preferred_element_type=f32)

        y2_ref[...] = acc.reshape(1, TH, W, Cm).astype(y2_ref.dtype)
        sm = jnp.sum(acc, axis=0, keepdims=True)
        sq = jnp.sum(acc * acc, axis=0, keepdims=True)
        st_ref[...] = jnp.concatenate([sm, sq], axis=-1).reshape(1, 1, 1, 2 * Cm)

    y2, st2 = pl.pallas_call(
        conv2_kernel,
        grid=(N, nS),
        in_specs=[
            pl.BlockSpec((1, H, W, Cm), lambda n, s: (n, 0, 0, 0)),   # resident image
            pl.BlockSpec((3, 3 * Cm, Cm), lambda n, s: (0, 0, 0)),
            pl.BlockSpec((1, Cm), lambda n, s: (0, 0)),
            pl.BlockSpec((1, Cm), lambda n, s: (0, 0)),
        ],
        out_specs=[
            pl.BlockSpec((1, TH, W, Cm), lambda n, s: (n, s, 0, 0)),
            pl.BlockSpec((1, 1, 1, 2 * Cm), lambda n, s: (n, s, 0, 0)),
        ],
        out_shape=[
            jax.ShapeDtypeStruct((N, H, W, Cm), cdt),
            jax.ShapeDtypeStruct((N, nS, 1, 2 * Cm), f32),
        ],
        scratch_shapes=[pltpu.VMEM((TH + 2, Wb, Cm), cdt)],
        compiler_params=cp,
    )(y1, w2, scale1, bias1)
    scale2, bias2 = _bn_scale_bias(st2, g2, b2)

    # ---------------- kernel C: BN2+ReLU prologue, conv3 (1x1), BN3 stats ---
    def conv3_kernel(y2_ref, w_ref, s2_ref, b2_ref, y3_ref, st_ref):
        a = jnp.maximum(y2_ref[...].astype(f32) * s2_ref[...] + b2_ref[...], 0.0)
        y = jnp.dot(a.reshape(TR * W, Cm).astype(cdt), w_ref[...],
                    preferred_element_type=f32)                           # (TR*W, Co)
        y3_ref[...] = y.reshape(1, TR, W, Co).astype(y3_ref.dtype)
        sm = jnp.sum(y, axis=0, keepdims=True)
        sq = jnp.sum(y * y, axis=0, keepdims=True)
        st_ref[...] = jnp.concatenate([sm, sq], axis=-1).reshape(1, 1, 1, 2 * Co)

    y3, st3 = pl.pallas_call(
        conv3_kernel,
        grid=(N, nH),
        in_specs=[
            pl.BlockSpec((1, TR, W, Cm), lambda n, t: (n, t, 0, 0)),
            pl.BlockSpec((Cm, Co), lambda n, t: (0, 0)),
            pl.BlockSpec((1, Cm), lambda n, t: (0, 0)),
            pl.BlockSpec((1, Cm), lambda n, t: (0, 0)),
        ],
        out_specs=[
            pl.BlockSpec((1, TR, W, Co), lambda n, t: (n, t, 0, 0)),
            pl.BlockSpec((1, 1, 1, 2 * Co), lambda n, t: (n, t, 0, 0)),
        ],
        out_shape=[
            jax.ShapeDtypeStruct((N, H, W, Co), cdt),
            jax.ShapeDtypeStruct((N, nH, 1, 2 * Co), f32),
        ],
        compiler_params=cp,
    )(y2, w3, scale2, bias2)
    scale3, bias3 = _bn_scale_bias(st3, g3, b3)

    # ---------------- kernel D: BN3 affine + f32 residual add + ReLU --------
    def bn3_add_relu_kernel(y3_ref, res_ref, s3_ref, b3_ref, o_ref):
        y = y3_ref[...].astype(f32)
        r = res_ref[...]                                        # f32 identity
        out = jnp.maximum(y * s3_ref[...] + b3_ref[...] + r, 0.0)
        o_ref[...] = out.astype(o_ref.dtype)

    out = pl.pallas_call(
        bn3_add_relu_kernel,
        grid=(N, nH),
        in_specs=[
            pl.BlockSpec((1, TR, W, Co), lambda n, t: (n, t, 0, 0)),
            pl.BlockSpec((1, TR, W, Ci), lambda n, t: (n, t, 0, 0)),   # Ci == Co (asserted)
            pl.BlockSpec((1, Co), lambda n, t: (0, 0)),
            pl.BlockSpec((1, Co), lambda n, t: (0, 0)),
        ],
        out_specs=pl.BlockSpec((1, TR, W, Co), lambda n, t: (n, t, 0, 0)),
        out_shape=jax.ShapeDtypeStruct((N, H, W, Co), f32),
        compiler_params=cp,
    )(y3, x, scale3, bias3)

    out = out[:, :, :, :Pe]                                     # no-op when Pe % 128 == 0
    return jnp.transpose(out, (0, 3, 1, 2))                     # -> NCHW f32


# --------------------------------------------------------------------------
# pure-JAX f32 reference (faithful to the PyTorch module in training mode)
# --------------------------------------------------------------------------

def reference_forward(x_nchw, params):
    def bn_relu(y, g, b, residual=None):
        mean = y.mean(axis=(0, 1, 2), keepdims=True)
        var = ((y - mean) ** 2).mean(axis=(0, 1, 2), keepdims=True)
        out = g.reshape(1, 1, 1, -1) * (y - mean) / jnp.sqrt(var + EPS) + b.reshape(1, 1, 1, -1)
        if residual is not None:
            out = out + residual
        return jnp.maximum(out, 0.0)

    x = jnp.transpose(x_nchw, (0, 2, 3, 1)).astype(jnp.float32)
    h = bn_relu(jnp.einsum("nhwc,co->nhwo", x, params["w1"]), params["g1"], params["b1"])
    P = params["w1"].shape[1]
    w2_hwio = params["w2"].reshape(3, 3, P, P)
    h = lax.conv_general_dilated(h, w2_hwio, (1, 1), "SAME",
                                 dimension_numbers=("NHWC", "HWIO", "NHWC"))
    h = bn_relu(h, params["g2"], params["b2"])
    h = bn_relu(jnp.einsum("nhwc,co->nhwo", h, params["w3"]),
                params["g3"], params["b3"], residual=x)
    return jnp.transpose(h, (0, 3, 1, 2))


# --------------------------------------------------------------------------
# parameter init (logical PyTorch-like layouts; packing/padding happens in
# bottleneck_forward — at scale you would pre-pack once, outside the step)
# --------------------------------------------------------------------------

def init_params(key, inplanes, planes):
    expansion = 4
    ks = jax.random.split(key, 9)
    return {
        "w1": jax.random.normal(ks[0], (inplanes, planes), jnp.float32) * 0.1,
        "w2": jax.random.normal(ks[1], (9, planes, planes), jnp.float32) * 0.1,   # (dy*3+dx, in, out)
        "w3": jax.random.normal(ks[2], (planes, planes * expansion), jnp.float32) * 0.1,
        "g1": 1.0 + 0.1 * jax.random.normal(ks[3], (planes,), jnp.float32),
        "b1": 0.1 * jax.random.normal(ks[4], (planes,), jnp.float32),
        "g2": 1.0 + 0.1 * jax.random.normal(ks[5], (planes,), jnp.float32),
        "b2": 0.1 * jax.random.normal(ks[6], (planes,), jnp.float32),
        "g3": 1.0 + 0.1 * jax.random.normal(ks[7], (planes * expansion,), jnp.float32),
        "b3": 0.1 * jax.random.normal(ks[8], (planes * expansion,), jnp.float32),
    }


if __name__ == "__main__":
    key = jax.random.PRNGKey(0)
    k_x, k_p = jax.random.split(key)

    planes = 4
    inplanes = planes * 4          # downsample=None => residual shapes must match
    N, H, W = 2, 16, 16

    x = jax.random.normal(k_x, (N, inplanes, H, W), jnp.float32)   # NCHW, like PyTorch
    params = init_params(k_p, inplanes, planes)

    ref = np.asarray(jax.block_until_ready(reference_forward(x, params)), dtype=np.float64)

    # exact-semantics path (f32 MXU operands) — strict tolerance
    fwd_f32 = jax.jit(lambda xx, pp: bottleneck_forward(xx, pp, compute_dtype=jnp.float32))
    out_f32 = jax.block_until_ready(fwd_f32(x, params))
    assert out_f32.shape == (N, planes * 4, H, W)
    np.testing.assert_allclose(np.asarray(out_f32), ref, rtol=1e-3, atol=1e-3)

    # default perf path: bf16 MXU operands + bf16 intermediate storage,
    # f32 accumulation / BN / residual — loose check.
    fwd_bf16 = jax.jit(lambda xx, pp: bottleneck_forward(xx, pp, compute_dtype=jnp.bfloat16))
    out_bf16 = np.asarray(jax.block_until_ready(fwd_bf16(x, params)), dtype=np.float64)
    rel_l2 = np.linalg.norm(out_bf16 - ref) / np.linalg.norm(ref)
    assert rel_l2 < 3e-2, f"bf16 path relative L2 error too high: {rel_l2}"

    print("KERNEL_OK")
</pallas_src>

<mosaic_0001>
module attributes {stable_mosaic.version = 11 : i64} {
  func.func @conv1_kernel(%arg0: i32, %arg1: i32, %arg2: memref<1x16x16x128xf32, #tpu.memory_space<vmem>>, %arg3: memref<128x128xf32, #tpu.memory_space<vmem>>, %arg4: memref<1x16x16x128xf32, #tpu.memory_space<vmem>>, %arg5: memref<1x1x1x256xf32, #tpu.memory_space<vmem>>) attributes {dimension_semantics = [#tpu.dimension_semantics<parallel>, #tpu.dimension_semantics<parallel>], iteration_bounds = array<i64: 2, 1>, scalar_prefetch = 0 : i64, scratch_operands = 0 : i64, tpu.core_type = #tpu.core_type<tc>, window_params = [{transform_indices = @transform_0, window_bounds = array<i64: 1, 16, 16, 128>}, {pipeline_mode = #tpu.pipeline_mode<synchronous>, transform_indices = @transform_1, window_bounds = array<i64: 128, 128>}, {transform_indices = @transform_2, window_bounds = array<i64: 1, 16, 16, 128>}, {transform_indices = @transform_3, window_bounds = array<i64: 1, 1, 1, 256>}]} {
    %c0 = arith.constant 0 : index
    %c0_0 = arith.constant 0 : index
    %c0_1 = arith.constant 0 : index
    %c0_2 = arith.constant 0 : index
    %0 = vector.load %arg2[%c0, %c0_0, %c0_1, %c0_2] : memref<1x16x16x128xf32, #tpu.memory_space<vmem>>, vector<1x16x16x128xf32>
    %1 = vector.shape_cast %0 : vector<1x16x16x128xf32> to vector<256x128xf32>
    %c0_3 = arith.constant 0 : index
    %c0_4 = arith.constant 0 : index
    %2 = vector.load %arg3[%c0_3, %c0_4] : memref<128x128xf32, #tpu.memory_space<vmem>>, vector<128x128xf32>
    %cst = arith.constant dense<0.000000e+00> : vector<256x128xf32>
    %3 = tpu.matmul %1, %2, %cst {dimension_numbers = #tpu.dot_dimension_numbers<[1], [0], [0], [1], [0, 0, 1, 1], [], []>} : vector<256x128xf32>, vector<128x128xf32>, vector<256x128xf32> -> vector<256x128xf32>
    %4 = vector.shape_cast %3 : vector<256x128xf32> to vector<1x16x16x128xf32>
    %c0_5 = arith.constant 0 : index
    %c0_6 = arith.constant 0 : index
    %c0_7 = arith.constant 0 : index
    %c0_8 = arith.constant 0 : index
    %5 = vector.load %arg4[%c0_5, %c0_6, %c0_7, %c0_8] : memref<1x16x16x128xf32, #tpu.memory_space<vmem>>, vector<1x16x16x128xf32>
    tpu.vector_store %arg4[%c0_5, %c0_6, %c0_7, %c0_8], %4 {strides = array<i32>} : memref<1x16x16x128xf32, #tpu.memory_space<vmem>>, vector<1x16x16x128xf32>,
    %cst_9 = arith.constant dense<0.000000e+00> : vector<128xf32>
    %6 = vector.multi_reduction <add>, %3, %cst_9 [0] : vector<256x128xf32> to vector<128xf32>
    %7 = vector.shape_cast %6 : vector<128xf32> to vector<1x128xf32>
    %8 = arith.mulf %3, %3 : vector<256x128xf32>
    %cst_10 = arith.constant dense<0.000000e+00> : vector<128xf32>
    %9 = vector.multi_reduction <add>, %8, %cst_10 [0] : vector<256x128xf32> to vector<128xf32>
    %10 = vector.shape_cast %9 : vector<128xf32> to vector<1x128xf32>
    %11 = tpu.concatenate %7, %10 in 1 : vector<1x128xf32>, vector<1x128xf32> -> vector<1x256xf32>
    %12 = vector.shape_cast %11 : vector<1x256xf32> to vector<1x1x1x256xf32>
    %c0_11 = arith.constant 0 : index
    %c0_12 = arith.constant 0 : index
    %c0_13 = arith.constant 0 : index
    %c0_14 = arith.constant 0 : index
    %13 = vector.load %arg5[%c0_11, %c0_12, %c0_13, %c0_14] : memref<1x1x1x256xf32, #tpu.memory_space<vmem>>, vector<1x1x1x256xf32>
    tpu.vector_store %arg5[%c0_11, %c0_12, %c0_13, %c0_14], %12 {strides = array<i32>} : memref<1x1x1x256xf32, #tpu.memory_space<vmem>>, vector<1x1x1x256xf32>,
    return
  }
  func.func @transform_0(%arg0: i32, %arg1: i32) -> (i32, i32, i32, i32) {
    %c0_i32 = arith.constant 0 : i32
    %c0_i32_0 = arith.constant 0 : i32
    %c0_i32_1 = arith.constant 0 : i32
    return %arg0, %arg1, %c0_i32, %c0_i32_0 : i32, i32, i32, i32
  }
  func.func @transform_1(%arg0: i32, %arg1: i32) -> (i32, i32) {
    %c0_i32 = arith.constant 0 : i32
    %c0_i32_0 = arith.constant 0 : i32
    %c0_i32_1 = arith.constant 0 : i32
    return %c0_i32, %c0_i32_0 : i32, i32
  }
  func.func @transform_2(%arg0: i32, %arg1: i32) -> (i32, i32, i32, i32) {
    %c0_i32 = arith.constant 0 : i32
    %c0_i32_0 = arith.constant 0 : i32
    %c0_i32_1 = arith.constant 0 : i32
    return %arg0, %arg1, %c0_i32, %c0_i32_0 : i32, i32, i32, i32
  }
  func.func @transform_3(%arg0: i32, %arg1: i32) -> (i32, i32, i32, i32) {
    %c0_i32 = arith.constant 0 : i32
    %c0_i32_0 = arith.constant 0 : i32
    %c0_i32_1 = arith.constant 0 : i32
    return %arg0, %arg1, %c0_i32, %c0_i32_0 : i32, i32, i32, i32
  }
}

module attributes {stable_mosaic.version = 11 : i64} {
  func.func @conv2_kernel(%arg0: i32, %arg1: i32, %arg2: memref<1x16x16x128xf32, #tpu.memory_space<vmem>>, %arg3: memref<3x384x128xf32, #tpu.memory_space<vmem>>, %arg4: memref<1x128xf32, #tpu.memory_space<vmem>>, %arg5: memref<1x128xf32, #tpu.memory_space<vmem>>, %arg6: memref<1x8x16x128xf32, #tpu.memory_space<vmem>>, %arg7: memref<1x1x1x256xf32, #tpu.memory_space<vmem>>, %arg8: memref<10x25x128xf32, #tpu.memory_space<vmem>>) attributes {dimension_semantics = [#tpu.dimension_semantics<parallel>, #tpu.dimension_semantics<parallel>], iteration_bounds = array<i64: 2, 2>, scalar_prefetch = 0 : i64, scratch_operands = 1 : i64, tpu.core_type = #tpu.core_type<tc>, window_params = [{transform_indices = @transform_0, window_bounds = array<i64: 1, 16, 16, 128>}, {pipeline_mode = #tpu.pipeline_mode<synchronous>, transform_indices = @transform_1, window_bounds = array<i64: 3, 384, 128>}, {pipeline_mode = #tpu.pipeline_mode<synchronous>, transform_indices = @transform_2, window_bounds = array<i64: 1, 128>}, {pipeline_mode = #tpu.pipeline_mode<synchronous>, transform_indices = @transform_3, window_bounds = array<i64: 1, 128>}, {transform_indices = @transform_4, window_bounds = array<i64: 1, 8, 16, 128>}, {transform_indices = @transform_5, window_bounds = array<i64: 1, 1, 1, 256>}]} {
    %c8_i32 = arith.constant 8 : i32
    %0 = arith.muli %arg1, %c8_i32 : i32
    %c0 = arith.constant 0 : index
    %c0_0 = arith.constant 0 : index
    %1 = vector.load %arg4[%c0, %c0_0] : memref<1x128xf32, #tpu.memory_space<vmem>>, vector<1x128xf32>
    %c0_1 = arith.constant 0 : index
    %c0_2 = arith.constant 0 : index
    %2 = vector.load %arg5[%c0_1, %c0_2] : memref<1x128xf32, #tpu.memory_space<vmem>>, vector<1x128xf32>
    %cst = arith.constant 0.000000e+00 : f32
    %3 = vector.broadcast %cst : f32 to vector<10x1x128xf32>
    %c0_3 = arith.constant 0 : index
    %c7 = arith.constant 7 : index
    %c0_4 = arith.constant 0 : index
    %4 = vector.load %arg8[%c0_3, %c7, %c0_4] : memref<10x25x128xf32, #tpu.memory_space<vmem>>, vector<10x1x128xf32>
    tpu.vector_store %arg8[%c0_3, %c7, %c0_4], %3 {strides = array<i32>} : memref<10x25x128xf32, #tpu.memory_space<vmem>>, vector<10x1x128xf32>,
    %c0_5 = arith.constant 0 : index
    %c24 = arith.constant 24 : index
    %c0_6 = arith.constant 0 : index
    %5 = vector.load %arg8[%c0_5, %c24, %c0_6] : memref<10x25x128xf32, #tpu.memory_space<vmem>>, vector<10x1x128xf32>
    tpu.vector_store %arg8[%c0_5, %c24, %c0_6], %3 {strides = array<i32>} : memref<10x25x128xf32, #tpu.memory_space<vmem>>, vector<10x1x128xf32>,
    %c1_i32 = arith.constant 1 : i32
    %6 = arith.subi %0, %c1_i32 : i32
    %c0_i32 = arith.constant 0 : i32
    %7 = arith.maxsi %6, %c0_i32 : i32
    %c0_7 = arith.constant 0 : index
    %8 = arith.index_cast %7 : i32 to index
    %c0_8 = arith.constant 0 : index
    %c0_9 = arith.constant 0 : index
    %9 = vector.load %arg2[%c0_7, %8, %c0_8, %c0_9] : memref<1x16x16x128xf32, #tpu.memory_space<vmem>>, vector<1x1x16x128xf32>
    %10 = vector.shape_cast %9 : vector<1x1x16x128xf32> to vector<1x16x128xf32>
    %11 = vector.shape_cast %1 : vector<1x128xf32> to vector<1x1x128xf32>
    %12 = vector.broadcast %11 : vector<1x1x128xf32> to vector<1x16x128xf32>
    %13 = arith.mulf %10, %12 : vector<1x16x128xf32>
    %14 = vector.shape_cast %2 : vector<1x128xf32> to vector<1x1x128xf32>
    %15 = vector.broadcast %14 : vector<1x1x128xf32> to vector<1x16x128xf32>
    %16 = arith.addf %13, %15 : vector<1x16x128xf32>
    %cst_10 = arith.constant 0.000000e+00 : f32
    %17 = vector.broadcast %cst_10 : f32 to vector<1x16x128xf32>
    %18 = arith.maximumf %16, %17 : vector<1x16x128xf32>
    %c8_i32_11 = arith.constant 8 : i32
    %19 = arith.addi %0, %c8_i32_11 : i32
    %c15_i32 = arith.constant 15 : i32
    %20 = arith.minsi %19, %c15_i32 : i32
    %c0_12 = arith.constant 0 : index
    %21 = arith.index_cast %20 : i32 to index
    %c0_13 = arith.constant 0 : index
    %c0_14 = arith.constant 0 : index
    %22 = vector.load %arg2[%c0_12, %21, %c0_13, %c0_14] : memref<1x16x16x128xf32, #tpu.memory_space<vmem>>, vector<1x1x16x128xf32>
    %23 = vector.shape_cast %22 : vector<1x1x16x128xf32> to vector<1x16x128xf32>
    %24 = vector.shape_cast %1 : vector<1x128xf32> to vector<1x1x128xf32>
    %25 = vector.broadcast %24 : vector<1x1x128xf32> to vector<1x16x128xf32>
    %26 = arith.mulf %23, %25 : vector<1x16x128xf32>
    %27 = vector.shape_cast %2 : vector<1x128xf32> to vector<1x1x128xf32>
    %28 = vector.broadcast %27 : vector<1x1x128xf32> to vector<1x16x128xf32>
    %29 = arith.addf %26, %28 : vector<1x16x128xf32>
    %cst_15 = arith.constant 0.000000e+00 : f32
    %30 = vector.broadcast %cst_15 : f32 to vector<1x16x128xf32>
    %31 = arith.maximumf %29, %30 : vector<1x16x128xf32>
    %c0_i32_16 = arith.constant 0 : i32
    %32 = arith.cmpi eq, %arg1, %c0_i32_16 : i32
    %cst_17 = arith.constant 0.000000e+00 : f32
    %33 = vector.broadcast %cst_17 : f32 to vector<1x16x128xf32>
    %34 = arith.select %32, %33, %18 : vector<1x16x128xf32>
    %c1_i32_18 = arith.constant 1 : i32
    %35 = arith.cmpi eq, %arg1, %c1_i32_18 : i32
    %cst_19 = arith.constant 0.000000e+00 : f32
    %36 = vector.broadcast %cst_19 : f32 to vector<1x16x128xf32>
    %37 = arith.select %35, %36, %31 : vector<1x16x128xf32>
    %c0_20 = arith.constant 0 : index
    %c8 = arith.constant 8 : index
    %c0_21 = arith.constant 0 : index
    %38 = vector.load %arg8[%c0_20, %c8, %c0_21] : memref<10x25x128xf32, #tpu.memory_space<vmem>>, vector<1x16x128xf32>
    tpu.vector_store %arg8[%c0_20, %c8, %c0_21], %34 {strides = array<i32>} : memref<10x25x128xf32, #tpu.memory_space<vmem>>, vector<1x16x128xf32>,
    %c9 = arith.constant 9 : index
    %c8_22 = arith.constant 8 : index
    %c0_23 = arith.constant 0 : index
    %39 = vector.load %arg8[%c9, %c8_22, %c0_23] : memref<10x25x128xf32, #tpu.memory_space<vmem>>, vector<1x16x128xf32>
    tpu.vector_store %arg8[%c9, %c8_22, %c0_23], %37 {strides = array<i32>} : memref<10x25x128xf32, #tpu.memory_space<vmem>>, vector<1x16x128xf32>,
    %c0_24 = arith.constant 0 : index
    %40 = arith.index_cast %0 : i32 to index
    %c0_25 = arith.constant 0 : index
    %c0_26 = arith.constant 0 : index
    %41 = vector.load %arg2[%c0_24, %40, %c0_25, %c0_26] : memref<1x16x16x128xf32, #tpu.memory_space<vmem>>, vector<1x8x16x128xf32>
    %42 = vector.shape_cast %41 : vector<1x8x16x128xf32> to vector<8x16x128xf32>
    %43 = vector.shape_cast %1 : vector<1x128xf32> to vector<1x1x128xf32>
    %44 = vector.broadcast %43 : vector<1x1x128xf32> to vector<8x16x128xf32>
    %45 = arith.mulf %42, %44 : vector<8x16x128xf32>
    %46 = vector.shape_cast %2 : vector<1x128xf32> to vector<1x1x128xf32>
    %47 = vector.broadcast %46 : vector<1x1x128xf32> to vector<8x16x128xf32>
    %48 = arith.addf %45, %47 : vector<8x16x128xf32>
    %cst_27 = arith.constant 0.000000e+00 : f32
    %49 = vector.broadcast %cst_27 : f32 to vector<8x16x128xf32>
    %50 = arith.maximumf %48, %49 : vector<8x16x128xf32>
    %c1 = arith.constant 1 : index
    %c8_28 = arith.constant 8 : index
    %c0_29 = arith.constant 0 : index
    %51 = vector.load %arg8[%c1, %c8_28, %c0_29] : memref<10x25x128xf32, #tpu.memory_space<vmem>>, vector<8x16x128xf32>
    tpu.vector_store %arg8[%c1, %c8_28, %c0_29], %50 {strides = array<i32>} : memref<10x25x128xf32, #tpu.memory_space<vmem>>, vector<8x16x128xf32>,
    %c0_30 = arith.constant 0 : index
    %c7_31 = arith.constant 7 : index
    %c0_32 = arith.constant 0 : index
    %52 = vector.load %arg8[%c0_30, %c7_31, %c0_32] : memref<10x25x128xf32, #tpu.memory_space<vmem>>, vector<10x16x128xf32>
    %c0_33 = arith.constant 0 : index
    %c8_34 = arith.constant 8 : index
    %c0_35 = arith.constant 0 : index
    %53 = vector.load %arg8[%c0_33, %c8_34, %c0_35] : memref<10x25x128xf32, #tpu.memory_space<vmem>>, vector<10x16x128xf32>
    %c0_36 = arith.constant 0 : index
    %c9_37 = arith.constant 9 : index
    %c0_38 = arith.constant 0 : index
    %54 = vector.load %arg8[%c0_36, %c9_37, %c0_38] : memref<10x25x128xf32, #tpu.memory_space<vmem>>, vector<10x16x128xf32>
    %55 = tpu.concatenate %52, %53, %54 in 2 : vector<10x16x128xf32>, vector<10x16x128xf32>, vector<10x16x128xf32> -> vector<10x16x384xf32>
    %56 = vector.extract_strided_slice %55 {offsets = [0, 0, 0], sizes = [8, 16, 384], strides = [1, 1, 1]} : vector<10x16x384xf32> to vector<8x16x384xf32>
    %57 = vector.shape_cast %56 : vector<8x16x384xf32> to vector<128x384xf32>
    %c0_39 = arith.constant 0 : index
    %c0_40 = arith.constant 0 : index
    %c0_41 = arith.constant 0 : index
    %58 = vector.load %arg3[%c0_39, %c0_40, %c0_41] : memref<3x384x128xf32, #tpu.memory_space<vmem>>, vector<1x384x128xf32>
    %59 = vector.shape_cast %58 : vector<1x384x128xf32> to vector<384x128xf32>
    %cst_42 = arith.constant dense<0.000000e+00> : vector<128x128xf32>
    %60 = tpu.matmul %57, %59, %cst_42 {dimension_numbers = #tpu.dot_dimension_numbers<[1], [0], [0], [1], [0, 0, 1, 1], [], []>} : vector<128x384xf32>, vector<384x128xf32>, vector<128x128xf32> -> vector<128x128xf32>
    %61 = vector.extract_strided_slice %55 {offsets = [1, 0, 0], sizes = [8, 16, 384], strides = [1, 1, 1]} : vector<10x16x384xf32> to vector<8x16x384xf32>
    %62 = vector.shape_cast %61 : vector<8x16x384xf32> to vector<128x384xf32>
    %c1_43 = arith.constant 1 : index
    %c0_44 = arith.constant 0 : index
    %c0_45 = arith.constant 0 : index
    %63 = vector.load %arg3[%c1_43, %c0_44, %c0_45] : memref<3x384x128xf32, #tpu.memory_space<vmem>>, vector<1x384x128xf32>
    %64 = vector.shape_cast %63 : vector<1x384x128xf32> to vector<384x128xf32>
    %cst_46 = arith.constant dense<0.000000e+00> : vector<128x128xf32>
    %65 = tpu.matmul %62, %64, %cst_46 {dimension_numbers = #tpu.dot_dimension_numbers<[1], [0], [0], [1], [0, 0, 1, 1], [], []>} : vector<128x384xf32>, vector<384x128xf32>, vector<128x128xf32> -> vector<128x128xf32>
    %66 = arith.addf %60, %65 : vector<128x128xf32>
    %67 = vector.extract_strided_slice %55 {offsets = [2, 0, 0], sizes = [8, 16, 384], strides = [1, 1, 1]} : vector<10x16x384xf32> to vector<8x16x384xf32>
    %68 = vector.shape_cast %67 : vector<8x16x384xf32> to vector<128x384xf32>
    %c2 = arith.constant 2 : index
    %c0_47 = arith.constant 0 : index
    %c0_48 = arith.constant 0 : index
    %69 = vector.load %arg3[%c2, %c0_47, %c0_48] : memref<3x384x128xf32, #tpu.memory_space<vmem>>, vector<1x384x128xf32>
    %70 = vector.shape_cast %69 : vector<1x384x128xf32> to vector<384x128xf32>
    %cst_49 = arith.constant dense<0.000000e+00> : vector<128x128xf32>
    %71 = tpu.matmul %68, %70, %cst_49 {dimension_numbers = #tpu.dot_dimension_numbers<[1], [0], [0], [1], [0, 0, 1, 1], [], []>} : vector<128x384xf32>, vector<384x128xf32>, vector<128x128xf32> -> vector<128x128xf32>
    %72 = arith.addf %66, %71 : vector<128x128xf32>
    %73 = vector.shape_cast %72 : vector<128x128xf32> to vector<1x8x16x128xf32>
    %c0_50 = arith.constant 0 : index
    %c0_51 = arith.constant 0 : index
    %c0_52 = arith.constant 0 : index
    %c0_53 = arith.constant 0 : index
    %74 = vector.load %arg6[%c0_50, %c0_51, %c0_52, %c0_53] : memref<1x8x16x128xf32, #tpu.memory_space<vmem>>, vector<1x8x16x128xf32>
    tpu.vector_store %arg6[%c0_50, %c0_51, %c0_52, %c0_53], %73 {strides = array<i32>} : memref<1x8x16x128xf32, #tpu.memory_space<vmem>>, vector<1x8x16x128xf32>,
    %cst_54 = arith.constant dense<0.000000e+00> : vector<128xf32>
    %75 = vector.multi_reduction <add>, %72, %cst_54 [0] : vector<128x128xf32> to vector<128xf32>
    %76 = vector.shape_cast %75 : vector<128xf32> to vector<1x128xf32>
    %77 = arith.mulf %72, %72 : vector<128x128xf32>
    %cst_55 = arith.constant dense<0.000000e+00> : vector<128xf32>
    %78 = vector.multi_reduction <add>, %77, %cst_55 [0] : vector<128x128xf32> to vector<128xf32>
    %79 = vector.shape_cast %78 : vector<128xf32> to vector<1x128xf32>
    %80 = tpu.concatenate %76, %79 in 1 : vector<1x128xf32>, vector<1x128xf32> -> vector<1x256xf32>
    %81 = vector.shape_cast %80 : vector<1x256xf32> to vector<1x1x1x256xf32>
    %c0_56 = arith.constant 0 : index
    %c0_57 = arith.constant 0 : index
    %c0_58 = arith.constant 0 : index
    %c0_59 = arith.constant 0 : index
    %82 = vector.load %arg7[%c0_56, %c0_57, %c0_58, %c0_59] : memref<1x1x1x256xf32, #tpu.memory_space<vmem>>, vector<1x1x1x256xf32>
    tpu.vector_store %arg7[%c0_56, %c0_57, %c0_58, %c0_59], %81 {strides = array<i32>} : memref<1x1x1x256xf32, #tpu.memory_space<vmem>>, vector<1x1x1x256xf32>,
    return
  }
  func.func @transform_0(%arg0: i32, %arg1: i32) -> (i32, i32, i32, i32) {
    %c0_i32 = arith.constant 0 : i32
    %c0_i32_0 = arith.constant 0 : i32
    %c0_i32_1 = arith.constant 0 : i32
    %c0_i32_2 = arith.constant 0 : i32
    return %arg0, %c0_i32, %c0_i32_0, %c0_i32_1 : i32, i32, i32, i32
  }
  func.func @transform_1(%arg0: i32, %arg1: i32) -> (i32, i32, i32) {
    %c0_i32 = arith.constant 0 : i32
    %c0_i32_0 = arith.constant 0 : i32
    %c0_i32_1 = arith.constant 0 : i32
    %c0_i32_2 = arith.constant 0 : i32
    return %c0_i32, %c0_i32_0, %c0_i32_1 : i32, i32, i32
  }
  func.func @transform_2(%arg0: i32, %arg1: i32) -> (i32, i32) {
    %c0_i32 = arith.constant 0 : i32
    %c0_i32_0 = arith.constant 0 : i32
    %c0_i32_1 = arith.constant 0 : i32
    return %c0_i32, %c0_i32_0 : i32, i32
  }
  func.func @transform_3(%arg0: i32, %arg1: i32) -> (i32, i32) {
    %c0_i32 = arith.constant 0 : i32
    %c0_i32_0 = arith.constant 0 : i32
    %c0_i32_1 = arith.constant 0 : i32
    return %c0_i32, %c0_i32_0 : i32, i32
  }
  func.func @transform_4(%arg0: i32, %arg1: i32) -> (i32, i32, i32, i32) {
    %c0_i32 = arith.constant 0 : i32
    %c0_i32_0 = arith.constant 0 : i32
    %c0_i32_1 = arith.constant 0 : i32
    return %arg0, %arg1, %c0_i32, %c0_i32_0 : i32, i32, i32, i32
  }
  func.func @transform_5(%arg0: i32, %arg1: i32) -> (i32, i32, i32, i32) {
    %c0_i32 = arith.constant 0 : i32
    %c0_i32_0 = arith.constant 0 : i32
    %c0_i32_1 = arith.constant 0 : i32
    return %arg0, %arg1, %c0_i32, %c0_i32_0 : i32, i32, i32, i32
  }
}

module attributes {stable_mosaic.version = 11 : i64} {
  func.func @conv3_kernel(%arg0: i32, %arg1: i32, %arg2: memref<1x16x16x128xf32, #tpu.memory_space<vmem>>, %arg3: memref<128x128xf32, #tpu.memory_space<vmem>>, %arg4: memref<1x128xf32, #tpu.memory_space<vmem>>, %arg5: memref<1x128xf32, #tpu.memory_space<vmem>>, %arg6: memref<1x16x16x128xf32, #tpu.memory_space<vmem>>, %arg7: memref<1x1x1x256xf32, #tpu.memory_space<vmem>>) attributes {dimension_semantics = [#tpu.dimension_semantics<parallel>, #tpu.dimension_semantics<parallel>], iteration_bounds = array<i64: 2, 1>, scalar_prefetch = 0 : i64, scratch_operands = 0 : i64, tpu.core_type = #tpu.core_type<tc>, window_params = [{transform_indices = @transform_0, window_bounds = array<i64: 1, 16, 16, 128>}, {pipeline_mode = #tpu.pipeline_mode<synchronous>, transform_indices = @transform_1, window_bounds = array<i64: 128, 128>}, {pipeline_mode = #tpu.pipeline_mode<synchronous>, transform_indices = @transform_2, window_bounds = array<i64: 1, 128>}, {pipeline_mode = #tpu.pipeline_mode<synchronous>, transform_indices = @transform_3, window_bounds = array<i64: 1, 128>}, {transform_indices = @transform_4, window_bounds = array<i64: 1, 16, 16, 128>}, {transform_indices = @transform_5, window_bounds = array<i64: 1, 1, 1, 256>}]} {
    %c0 = arith.constant 0 : index
    %c0_0 = arith.constant 0 : index
    %c0_1 = arith.constant 0 : index
    %c0_2 = arith.constant 0 : index
    %0 = vector.load %arg2[%c0, %c0_0, %c0_1, %c0_2] : memref<1x16x16x128xf32, #tpu.memory_space<vmem>>, vector<1x16x16x128xf32>
    %c0_3 = arith.constant 0 : index
    %c0_4 = arith.constant 0 : index
    %1 = vector.load %arg4[%c0_3, %c0_4] : memref<1x128xf32, #tpu.memory_space<vmem>>, vector<1x128xf32>
    %2 = vector.shape_cast %1 : vector<1x128xf32> to vector<1x1x1x128xf32>
    %3 = vector.broadcast %2 : vector<1x1x1x128xf32> to vector<1x16x16x128xf32>
    %4 = arith.mulf %0, %3 : vector<1x16x16x128xf32>
    %c0_5 = arith.constant 0 : index
    %c0_6 = arith.constant 0 : index
    %5 = vector.load %arg5[%c0_5, %c0_6] : memref<1x128xf32, #tpu.memory_space<vmem>>, vector<1x128xf32>
    %6 = vector.shape_cast %5 : vector<1x128xf32> to vector<1x1x1x128xf32>
    %7 = vector.broadcast %6 : vector<1x1x1x128xf32> to vector<1x16x16x128xf32>
    %8 = arith.addf %4, %7 : vector<1x16x16x128xf32>
    %cst = arith.constant 0.000000e+00 : f32
    %9 = vector.broadcast %cst : f32 to vector<1x16x16x128xf32>
    %10 = arith.maximumf %8, %9 : vector<1x16x16x128xf32>
    %11 = vector.shape_cast %10 : vector<1x16x16x128xf32> to vector<256x128xf32>
    %c0_7 = arith.constant 0 : index
    %c0_8 = arith.constant 0 : index
    %12 = vector.load %arg3[%c0_7, %c0_8] : memref<128x128xf32, #tpu.memory_space<vmem>>, vector<128x128xf32>
    %cst_9 = arith.constant dense<0.000000e+00> : vector<256x128xf32>
    %13 = tpu.matmul %11, %12, %cst_9 {dimension_numbers = #tpu.dot_dimension_numbers<[1], [0], [0], [1], [0, 0, 1, 1], [], []>} : vector<256x128xf32>, vector<128x128xf32>, vector<256x128xf32> -> vector<256x128xf32>
    %14 = vector.shape_cast %13 : vector<256x128xf32> to vector<1x16x16x128xf32>
    %c0_10 = arith.constant 0 : index
    %c0_11 = arith.constant 0 : index
    %c0_12 = arith.constant 0 : index
    %c0_13 = arith.constant 0 : index
    %15 = vector.load %arg6[%c0_10, %c0_11, %c0_12, %c0_13] : memref<1x16x16x128xf32, #tpu.memory_space<vmem>>, vector<1x16x16x128xf32>
    tpu.vector_store %arg6[%c0_10, %c0_11, %c0_12, %c0_13], %14 {strides = array<i32>} : memref<1x16x16x128xf32, #tpu.memory_space<vmem>>, vector<1x16x16x128xf32>,
    %cst_14 = arith.constant dense<0.000000e+00> : vector<128xf32>
    %16 = vector.multi_reduction <add>, %13, %cst_14 [0] : vector<256x128xf32> to vector<128xf32>
    %17 = vector.shape_cast %16 : vector<128xf32> to vector<1x128xf32>
    %18 = arith.mulf %13, %13 : vector<256x128xf32>
    %cst_15 = arith.constant dense<0.000000e+00> : vector<128xf32>
    %19 = vector.multi_reduction <add>, %18, %cst_15 [0] : vector<256x128xf32> to vector<128xf32>
    %20 = vector.shape_cast %19 : vector<128xf32> to vector<1x128xf32>
    %21 = tpu.concatenate %17, %20 in 1 : vector<1x128xf32>, vector<1x128xf32> -> vector<1x256xf32>
    %22 = vector.shape_cast %21 : vector<1x256xf32> to vector<1x1x1x256xf32>
    %c0_16 = arith.constant 0 : index
    %c0_17 = arith.constant 0 : index
    %c0_18 = arith.constant 0 : index
    %c0_19 = arith.constant 0 : index
    %23 = vector.load %arg7[%c0_16, %c0_17, %c0_18, %c0_19] : memref<1x1x1x256xf32, #tpu.memory_space<vmem>>, vector<1x1x1x256xf32>
    tpu.vector_store %arg7[%c0_16, %c0_17, %c0_18, %c0_19], %22 {strides = array<i32>} : memref<1x1x1x256xf32, #tpu.memory_space<vmem>>, vector<1x1x1x256xf32>,
    return
  }
  func.func @transform_0(%arg0: i32, %arg1: i32) -> (i32, i32, i32, i32) {
    %c0_i32 = arith.constant 0 : i32
    %c0_i32_0 = arith.constant 0 : i32
    %c0_i32_1 = arith.constant 0 : i32
    return %arg0, %arg1, %c0_i32, %c0_i32_0 : i32, i32, i32, i32
  }
  func.func @transform_1(%arg0: i32, %arg1: i32) -> (i32, i32) {
    %c0_i32 = arith.constant 0 : i32
    %c0_i32_0 = arith.constant 0 : i32
    %c0_i32_1 = arith.constant 0 : i32
    return %c0_i32, %c0_i32_0 : i32, i32
  }
  func.func @transform_2(%arg0: i32, %arg1: i32) -> (i32, i32) {
    %c0_i32 = arith.constant 0 : i32
    %c0_i32_0 = arith.constant 0 : i32
    %c0_i32_1 = arith.constant 0 : i32
    return %c0_i32, %c0_i32_0 : i32, i32
  }
  func.func @transform_3(%arg0: i32, %arg1: i32) -> (i32, i32) {
    %c0_i32 = arith.constant 0 : i32
    %c0_i32_0 = arith.constant 0 : i32
    %c0_i32_1 = arith.constant 0 : i32
    return %c0_i32, %c0_i32_0 : i32, i32
  }
  func.func @transform_4(%arg0: i32, %arg1: i32) -> (i32, i32, i32, i32) {
    %c0_i32 = arith.constant 0 : i32
    %c0_i32_0 = arith.constant 0 : i32
    %c0_i32_1 = arith.constant 0 : i32
    return %arg0, %arg1, %c0_i32, %c0_i32_0 : i32, i32, i32, i32
  }
  func.func @transform_5(%arg0: i32, %arg1: i32) -> (i32, i32, i32, i32) {
    %c0_i32 = arith.constant 0 : i32
    %c0_i32_0 = arith.constant 0 : i32
    %c0_i32_1 = arith.constant 0 : i32
    return %arg0, %arg1, %c0_i32, %c0_i32_0 : i32, i32, i32, i32
  }
}

module attributes {stable_mosaic.version = 11 : i64} {
  func.func @bn3_add_relu_kernel(%arg0: i32, %arg1: i32, %arg2: memref<1x16x16x128xf32, #tpu.memory_space<vmem>>, %arg3: memref<1x16x16x128xf32, #tpu.memory_space<vmem>>, %arg4: memref<1x128xf32, #tpu.memory_space<vmem>>, %arg5: memref<1x128xf32, #tpu.memory_space<vmem>>, %arg6: memref<1x16x16x128xf32, #tpu.memory_space<vmem>>) attributes {dimension_semantics = [#tpu.dimension_semantics<parallel>, #tpu.dimension_semantics<parallel>], iteration_bounds = array<i64: 2, 1>, scalar_prefetch = 0 : i64, scratch_operands = 0 : i64, tpu.core_type = #tpu.core_type<tc>, window_params = [{transform_indices = @transform_0, window_bounds = array<i64: 1, 16, 16, 128>}, {transform_indices = @transform_1, window_bounds = array<i64: 1, 16, 16, 128>}, {pipeline_mode = #tpu.pipeline_mode<synchronous>, transform_indices = @transform_2, window_bounds = array<i64: 1, 128>}, {pipeline_mode = #tpu.pipeline_mode<synchronous>, transform_indices = @transform_3, window_bounds = array<i64: 1, 128>}, {transform_indices = @transform_4, window_bounds = array<i64: 1, 16, 16, 128>}]} {
    %c0 = arith.constant 0 : index
    %c0_0 = arith.constant 0 : index
    %c0_1 = arith.constant 0 : index
    %c0_2 = arith.constant 0 : index
    %0 = vector.load %arg2[%c0, %c0_0, %c0_1, %c0_2] : memref<1x16x16x128xf32, #tpu.memory_space<vmem>>, vector<1x16x16x128xf32>
    %c0_3 = arith.constant 0 : index
    %c0_4 = arith.constant 0 : index
    %c0_5 = arith.constant 0 : index
    %c0_6 = arith.constant 0 : index
    %1 = vector.load %arg3[%c0_3, %c0_4, %c0_5, %c0_6] : memref<1x16x16x128xf32, #tpu.memory_space<vmem>>, vector<1x16x16x128xf32>
    %c0_7 = arith.constant 0 : index
    %c0_8 = arith.constant 0 : index
    %2 = vector.load %arg4[%c0_7, %c0_8] : memref<1x128xf32, #tpu.memory_space<vmem>>, vector<1x128xf32>
    %3 = vector.shape_cast %2 : vector<1x128xf32> to vector<1x1x1x128xf32>
    %4 = vector.broadcast %3 : vector<1x1x1x128xf32> to vector<1x16x16x128xf32>
    %5 = arith.mulf %0, %4 : vector<1x16x16x128xf32>
    %c0_9 = arith.constant 0 : index
    %c0_10 = arith.constant 0 : index
    %6 = vector.load %arg5[%c0_9, %c0_10] : memref<1x128xf32, #tpu.memory_space<vmem>>, vector<1x128xf32>
    %7 = vector.shape_cast %6 : vector<1x128xf32> to vector<1x1x1x128xf32>
    %8 = vector.broadcast %7 : vector<1x1x1x128xf32> to vector<1x16x16x128xf32>
    %9 = arith.addf %5, %8 : vector<1x16x16x128xf32>
    %10 = arith.addf %9, %1 : vector<1x16x16x128xf32>
    %cst = arith.constant 0.000000e+00 : f32
    %11 = vector.broadcast %cst : f32 to vector<1x16x16x128xf32>
    %12 = arith.maximumf %10, %11 : vector<1x16x16x128xf32>
    %c0_11 = arith.constant 0 : index
    %c0_12 = arith.constant 0 : index
    %c0_13 = arith.constant 0 : index
    %c0_14 = arith.constant 0 : index
    %13 = vector.load %arg6[%c0_11, %c0_12, %c0_13, %c0_14] : memref<1x16x16x128xf32, #tpu.memory_space<vmem>>, vector<1x16x16x128xf32>
    tpu.vector_store %arg6[%c0_11, %c0_12, %c0_13, %c0_14], %12 {strides = array<i32>} : memref<1x16x16x128xf32, #tpu.memory_space<vmem>>, vector<1x16x16x128xf32>,
    return
  }
  func.func @transform_0(%arg0: i32, %arg1: i32) -> (i32, i32, i32, i32) {
    %c0_i32 = arith.constant 0 : i32
    %c0_i32_0 = arith.constant 0 : i32
    %c0_i32_1 = arith.constant 0 : i32
    return %arg0, %arg1, %c0_i32, %c0_i32_0 : i32, i32, i32, i32
  }
  func.func @transform_1(%arg0: i32, %arg1: i32) -> (i32, i32, i32, i32) {
    %c0_i32 = arith.constant 0 : i32
    %c0_i32_0 = arith.constant 0 : i32
    %c0_i32_1 = arith.constant 0 : i32
    return %arg0, %arg1, %c0_i32, %c0_i32_0 : i32, i32, i32, i32
  }
  func.func @transform_2(%arg0: i32, %arg1: i32) -> (i32, i32) {
    %c0_i32 = arith.constant 0 : i32
    %c0_i32_0 = arith.constant 0 : i32
    %c0_i32_1 = arith.constant 0 : i32
    return %c0_i32, %c0_i32_0 : i32, i32
  }
  func.func @transform_3(%arg0: i32, %arg1: i32) -> (i32, i32) {
    %c0_i32 = arith.constant 0 : i32
    %c0_i32_0 = arith.constant 0 : i32
    %c0_i32_1 = arith.constant 0 : i32
    return %c0_i32, %c0_i32_0 : i32, i32
  }
  func.func @transform_4(%arg0: i32, %arg1: i32) -> (i32, i32, i32, i32) {
    %c0_i32 = arith.constant 0 : i32
    %c0_i32_0 = arith.constant 0 : i32
    %c0_i32_1 = arith.constant 0 : i32
    return %arg0, %arg1, %c0_i32, %c0_i32_0 : i32, i32, i32, i32
  }
}

</mosaic_0001>

<bundles_post_ra>
// kernel: _lambda_.4
= control target key start
LH: loop header
LB: loop body
LE: loop exit
PB: predicated region body
PF: predicated region fallthrough
CT: control target
= control target key end

     0   :  { %s1073_s12 = smov 0   ;;  %s1075_s13 = smov 0   ;;  %s1311_s0 = inlined_call_operand.vmem [shape: f32[2,16,16,128], index: 0, kind: input, shape index: {}]   ;;  %s1312_s1 = inlined_call_operand.vmem [shape: f32[128,128], index: 1, kind: input, shape index: {}]   ;;  %s1313_s2 = inlined_call_operand.vmem [shape: f32[2,16,16,128], index: 2, kind: output, shape index: {0}]   ;;  %s1314_s3 = inlined_call_operand.vmem [shape: f32[2,1,1,256], index: 3, kind: output, shape index: {1}]  }
   0x1   :  { %s1077_s14 = smov 0  }
   0x2 LB: > { %s26_s15 = sadd.s32 1, %s1046_s13  ;;  %p817_p0 = scmp.ge.s32.totalorder %s1050_s14, 1  ;;  %s1050_s14 = sphi %s1077_s14, %s14_s14   ;;  %s1046_s13 = sphi %s1075_s13, %s1316_s13   ;;  %s1042_s12 = sphi %s1073_s12, %s1315_s12  }
   0x3   : > { %p28_p1 = scmp.ge.s32.totalorder %s26_s15, 2  ;;  %p164_p2 = scmp.lt.s32.totalorder %s1050_s14, 3 }
   0x5   : > { %s1318_s15 = smov (%p28_p1, %s26_s15), 0  ;;  %p165_p3 = pnand %p817_p0, %p164_p2 }
   0x6   : > { %v268_v0 = vld [vmem:[%s1312_s1] sm:$0xff] (!%p165_p3)  ;;  %v269_v1 = vld [vmem:[%s1312_s1 + $0x8] sm:$0xff] (!%p165_p3)  ;;  %v270_v2 = vld [vmem:[%s1312_s1 + $0x10] sm:$0xff] (!%p165_p3)  ;;  %p207_p4 = scmp.lt.s32.totalorder (!%p165_p3), %s1042_s12, 1 }
   0x7   : > { %168 = sbr.rel (%p165_p3) target bundleno = 339 (0x153), region = 28  ;;  %v955_v3 = vpack.c.bf16 (!%p165_p3), %v269_v1, %v268_v0  ;;  %v271_v4 = vld [vmem:[%s1312_s1 + $0x18] sm:$0xff] (!%p165_p3)  ;;  %v272_v6 = vld [vmem:[%s1312_s1 + $0x20] sm:$0xff] (!%p165_p3)  ;;  %v273_v7 = vld [vmem:[%s1312_s1 + $0x28] sm:$0xff] (!%p165_p3) }
   0x8   : > { %v959_v5 = vpack.c.bf16 (!%p165_p3), %v271_v4, %v270_v2  ;;  %v963_v8 = vpack.c.bf16 (!%p165_p3), %v273_v7, %v272_v6  ;;  %v274_v9 = vld [vmem:[%s1312_s1 + $0x30] sm:$0xff] (!%p165_p3)  ;;  %v275_v10 = vld [vmem:[%s1312_s1 + $0x38] sm:$0xff] (!%p165_p3)  ;;  %v276_v13 = vld [vmem:[%s1312_s1 + $0x40] sm:$0xff] (!%p165_p3) }
   0x9   : > { %956 = vmatprep.subr.bf16.mxu0 (!%p165_p3), %v955_v3  ;;  %987 = vmatprep.subr.bf16.mxu1 (!%p165_p3), %v955_v3  ;;  %v967_v12 = vpack.c.bf16 (!%p165_p3), %v275_v10, %v274_v9  ;;  %v277_v14 = vld [vmem:[%s1312_s1 + $0x48] sm:$0xff] (!%p165_p3)  ;;  %v278_v17 = vld [vmem:[%s1312_s1 + $0x50] sm:$0xff] (!%p165_p3)  ;;  %v279_v18 = vld [vmem:[%s1312_s1 + $0x58] sm:$0xff] (!%p165_p3) }
   0xa   : > { %958 = vmatpush3.bf16.msra.mxu0 (!%p165_p3), %v955_v3  ;;  %995 = vmatpush3.bf16.msra.mxu1 (!%p165_p3), %v955_v3  ;;  %v971_v16 = vpack.c.bf16 (!%p165_p3), %v277_v14, %v276_v13  ;;  %v975_v19 = vpack.c.bf16 (!%p165_p3), %v279_v18, %v278_v17  ;;  %v280_v20 = vld [vmem:[%s1312_s1 + $0x60] sm:$0xff] (!%p165_p3)  ;;  %v281_v21 = vld [vmem:[%s1312_s1 + $0x68] sm:$0xff] (!%p165_p3)  ;;  %v282_v23 = vld [vmem:[%s1312_s1 + $0x70] sm:$0xff] (!%p165_p3) }
   0xb   : > { %960 = vmatprep.subr.bf16.mxu0 (!%p165_p3), %v959_v5  ;;  %988 = vmatprep.subr.bf16.mxu1 (!%p165_p3), %v959_v5  ;;  %v979_v22 = vpack.c.bf16 (!%p165_p3), %v281_v21, %v280_v20  ;;  %v283_v24 = vld [vmem:[%s1312_s1 + $0x78] sm:$0xff] (!%p165_p3) }
   0xc   : > { %v983_v25 = vpack.c.bf16 (!%p165_p3), %v283_v24, %v282_v23 }
   0xe   : > { %s1320_s12 = smov (!%p207_p4, %s1042_s12), 1  ;;  %962 = vmatpush3.bf16.msra.mxu0 %v959_v5  ;;  %996 = vmatpush3.bf16.msra.mxu1 %v959_v5 }
   0xf   : > { %s825_s28 = sshll.u32 %s1320_s12, 8  ;;  %964 = vmatprep.subr.bf16.mxu0 %v963_v8  ;;  %989 = vmatprep.subr.bf16.mxu1 %v963_v8 }
  0x10   : > { %s1117_s4 = scalar_lea.vmem %s1311_s0, %s825_s28  ;;  %s1186_s6 = scalar_lea.vmem %s1313_s2, %s825_s28 }
  0x11   : > { %v236_v11 = vld [vmem:[%s1117_s4] sm:$0xff]  ;;  %v237_v26 = vld [vmem:[%s1117_s4 + $0x8] sm:$0xff]  ;;  %v238_v28 = vld [vmem:[%s1117_s4 + $0x10] sm:$0xff]  ;;  %s822_s28 = sshll.u32 %s1320_s12, 1 }
  0x12   : > { %907 = vmatprep.mubr.f32.mxu0 %v236_v11  ;;  %v252_v15 = vld [vmem:[%s1117_s4 + $0x80] sm:$0xff]  ;;  %966 = vmatpush3.bf16.msra.mxu0 %v963_v8  ;;  %v253_v27 = vld [vmem:[%s1117_s4 + $0x88] sm:$0xff]  ;;  %v254_v29 = vld [vmem:[%s1117_s4 + $0x90] sm:$0xff]  ;;  %s235_s8 = scalar_lea.vmem %s1314_s3, %s822_s28 }
  0x13   : > { %997 = vmatpush3.bf16.msra.mxu1 %v963_v8  ;;  %968 = vmatprep.subr.bf16.mxu0 %v967_v12  ;;  %v239_v30 = vld [vmem:[%s1117_s4 + $0x18] sm:$0xff]  ;;  %v240_v32 = vld [vmem:[%s1117_s4 + $0x20] sm:$0xff]  ;;  %v241_v34 = vld [vmem:[%s1117_s4 + $0x28] sm:$0xff] }
  0x14   : > { %990 = vmatprep.subr.bf16.mxu1 %v967_v12  ;;  %931 = vmatprep.mubr.f32.mxu1 %v252_v15  ;;  %v255_v31 = vld [vmem:[%s1117_s4 + $0x98] sm:$0xff]  ;;  %v256_v33 = vld [vmem:[%s1117_s4 + $0xa0] sm:$0xff]  ;;  %v257_v35 = vld [vmem:[%s1117_s4 + $0xa8] sm:$0xff] }
  0x15   : > { %v242_v36 = vld [vmem:[%s1117_s4 + $0x30] sm:$0xff]  ;;  %v243_v38 = vld [vmem:[%s1117_s4 + $0x38] sm:$0xff]  ;;  %v244_v40 = vld [vmem:[%s1117_s4 + $0x40] sm:$0xff] }
  0x16   : > { %970 = vmatpush3.bf16.msra.mxu0 %v967_v12  ;;  %v258_v37 = vld [vmem:[%s1117_s4 + $0xb0] sm:$0xff]  ;;  %v259_v39 = vld [vmem:[%s1117_s4 + $0xb8] sm:$0xff]  ;;  %v260_v41 = vld [vmem:[%s1117_s4 + $0xc0] sm:$0xff] }
  0x17   : > { %998 = vmatpush3.bf16.msra.mxu1 %v967_v12  ;;  %972 = vmatprep.subr.bf16.mxu0 %v971_v16  ;;  %v245_v42 = vld [vmem:[%s1117_s4 + $0x48] sm:$0xff]  ;;  %v246_v44 = vld [vmem:[%s1117_s4 + $0x50] sm:$0xff]  ;;  %v247_v46 = vld [vmem:[%s1117_s4 + $0x58] sm:$0xff] }
  0x18   : > { %991 = vmatprep.subr.bf16.mxu1 %v971_v16  ;;  %v261_v43 = vld [vmem:[%s1117_s4 + $0xc8] sm:$0xff]  ;;  %v262_v45 = vld [vmem:[%s1117_s4 + $0xd0] sm:$0xff]  ;;  %v263_v47 = vld [vmem:[%s1117_s4 + $0xd8] sm:$0xff] }
  0x19   : > { %v248_v48 = vld [vmem:[%s1117_s4 + $0x60] sm:$0xff]  ;;  %v249_v50 = vld [vmem:[%s1117_s4 + $0x68] sm:$0xff]  ;;  %v250_v52 = vld [vmem:[%s1117_s4 + $0x70] sm:$0xff] }
  0x1a   : > { %974 = vmatpush3.bf16.msra.mxu0 %v971_v16  ;;  %v264_v49 = vld [vmem:[%s1117_s4 + $0xe0] sm:$0xff]  ;;  %v265_v51 = vld [vmem:[%s1117_s4 + $0xe8] sm:$0xff]  ;;  %v266_v53 = vld [vmem:[%s1117_s4 + $0xf0] sm:$0xff] }
  0x1b   : > { %999 = vmatpush3.bf16.msra.mxu1 %v971_v16  ;;  %976 = vmatprep.subr.bf16.mxu0 %v975_v19  ;;  %v251_v54 = vld [vmem:[%s1117_s4 + $0x78] sm:$0xff] }
  0x1c   : > { %992 = vmatprep.subr.bf16.mxu1 %v975_v19  ;;  %v267_v55 = vld [vmem:[%s1117_s4 + $0xf8] sm:$0xff] }
  0x1e   : > { %978 = vmatpush3.bf16.msra.mxu0 %v975_v19 }
  0x1f   : > { %1000 = vmatpush3.bf16.msra.mxu1 %v975_v19  ;;  %980 = vmatprep.subr.bf16.mxu0 %v979_v22 }
  0x20   : > { %993 = vmatprep.subr.bf16.mxu1 %v979_v22 }
  0x22   : > { %982 = vmatpush3.bf16.msra.mxu0 %v979_v22 }
  0x23   : > { %1001 = vmatpush3.bf16.msra.mxu1 %v979_v22  ;;  %984 = vmatprep.subr.bf16.mxu0 %v983_v25 }
  0x24   : > { %994 = vmatprep.subr.bf16.mxu1 %v983_v25 }
  0x26   : > { %986 = vmatpush3.bf16.msra.mxu0 %v983_v25 }
  0x27   : > { %1002 = vmatpush3.bf16.msra.mxu1 %v983_v25 }
  0x29   : > { %908 = vmatmul.mubr.f32.vlgmr.msra.gmra.mrb[0].mxu0 %v237_v26 }
  0x2a   : > { %932 = vmatmul.mubr.f32.vlgmr.msra.gmra.mrb[0].mxu1 %v253_v27  ;;  %910 = vmatprep.mubr.f32.mxu0 %v238_v28 }
  0x2b   : > { %934 = vmatprep.mubr.f32.mxu1 %v254_v29 }
  0x2d   : > { %911 = vmatmul.mubr.f32.gmra.mrb[2].mxu0 %v239_v30 }
  0x2e   : > { %935 = vmatmul.mubr.f32.gmra.mrb[2].mxu1 %v255_v31  ;;  %913 = vmatprep.mubr.f32.mxu0 %v240_v32 }
  0x2f   : > { %937 = vmatprep.mubr.f32.mxu1 %v256_v33 }
  0x31   : > { %914 = vmatmul.mubr.f32.gmra.mrb[4].mxu0 %v241_v34 }
  0x32   : > { %938 = vmatmul.mubr.f32.gmra.mrb[4].mxu1 %v257_v35  ;;  %916 = vmatprep.mubr.f32.mxu0 %v242_v36 }
  0x33   : > { %940 = vmatprep.mubr.f32.mxu1 %v258_v37 }
  0x35   : > { %917 = vmatmul.mubr.f32.gmra.mrb[6].mxu0 %v243_v38 }
  0x36   : > { %941 = vmatmul.mubr.f32.gmra.mrb[6].mxu1 %v259_v39  ;;  %919 = vmatprep.mubr.f32.mxu0 %v244_v40 }
  0x37   : > { %943 = vmatprep.mubr.f32.mxu1 %v260_v41 }
  0x39   : > { %920 = vmatmul.mubr.f32.gmra.mrb[8].mxu0 %v245_v42 }
  0x3a   : > { %944 = vmatmul.mubr.f32.gmra.mrb[8].mxu1 %v261_v43  ;;  %922 = vmatprep.mubr.f32.mxu0 %v246_v44 }
  0x3b   : > { %946 = vmatprep.mubr.f32.mxu1 %v262_v45 }
  0x3d   : > { %923 = vmatmul.mubr.f32.gmra.mrb[10].mxu0 %v247_v46 }
  0x3e   : > { %947 = vmatmul.mubr.f32.gmra.mrb[10].mxu1 %v263_v47  ;;  %925 = vmatprep.mubr.f32.mxu0 %v248_v48 }
  0x3f   : > { %949 = vmatprep.mubr.f32.mxu1 %v264_v49 }
  0x41   : > { %926 = vmatmul.mubr.f32.gmra.mrb[12].mxu0 %v249_v50 }
  0x42   : > { %950 = vmatmul.mubr.f32.gmra.mrb[12].mxu1 %v265_v51  ;;  %928 = vmatprep.mubr.f32.mxu0 %v250_v52 }
  0x43   : > { %952 = vmatprep.mubr.f32.mxu1 %v266_v53 }
  0x45   : > { %929 = vmatmul.mubr.f32.gmra.mrb[14].mxu0 %v251_v54 }
  0x46   : > { %953 = vmatmul.mubr.f32.gmra.mrb[14].mxu1 %v267_v55 }
  0xfc   : > { %v909_v56 = vpop.f32.mrb[0].mxu0 }
  0xfd   : > { %v1188_v57 = vpop.f32.mrb[0].mxu1  ;;  %510 = vst [vmem:[%s1186_s6 + $0x8] sm:$0xff] %v909_v56  ;;  %v579_v58 = vmul.f32 %v909_v56, %v909_v56  ;;  %v350_v59 = vpop.f32.mrb[1].mxu0 }
  0xfe   : > { %526 = vst [vmem:[%s1186_s6 + $0x88] sm:$0xff] %v1188_v57  ;;  %v1193_v60 = vpop.f32.mrb[1].mxu1  ;;  %509 = vst [vmem:[%s1186_s6] sm:$0xff] %v350_v59  ;;  %v541_v61 = vadd.f32 %v909_v56, %v350_v59  ;;  %v578_v62 = vmul.f32 %v350_v59, %v350_v59 }
  0xff   : > { %525 = vst [vmem:[%s1186_s6 + $0x80] sm:$0xff] %v1193_v60 }
 0x100   : > { %v610_v63 = vadd.f32 %v579_v58, %v578_v62  ;;  %v912_v0 = vpop.f32.mrb[2].mxu0 }
 0x101   : > { %v1198_v1 = vpop.f32.mrb[2].mxu1  ;;  %512 = vst [vmem:[%s1186_s6 + $0x18] sm:$0xff] %v912_v0  ;;  %v360_v2 = vpop.f32.mrb[3].mxu0  ;;  %v581_v6 = vmul.f32 %v912_v0, %v912_v0 }
 0x102   : > { %528 = vst [vmem:[%s1186_s6 + $0x98] sm:$0xff] %v1198_v1  ;;  %v1203_v3 = vpop.f32.mrb[3].mxu1  ;;  %511 = vst [vmem:[%s1186_s6 + $0x10] sm:$0xff] %v360_v2  ;;  %v542_v4 = vadd.f32 %v541_v61, %v360_v2  ;;  %v580_v5 = vmul.f32 %v360_v2, %v360_v2 }
 0x103   : > { %527 = vst [vmem:[%s1186_s6 + $0x90] sm:$0xff] %v1203_v3 }
 0x104   : > { %v611_v7 = vadd.f32 %v610_v63, %v580_v5  ;;  %v915_v8 = vpop.f32.mrb[4].mxu0  ;;  %v543_v9 = vadd.f32 %v912_v0, %v542_v4 }
 0x105   : > { %v1208_v10 = vpop.f32.mrb[4].mxu1  ;;  %514 = vst [vmem:[%s1186_s6 + $0x28] sm:$0xff] %v915_v8  ;;  %v370_v11 = vpop.f32.mrb[5].mxu0  ;;  %v583_v16 = vmul.f32 %v915_v8, %v915_v8 }
 0x106   : > { %530 = vst [vmem:[%s1186_s6 + $0xa8] sm:$0xff] %v1208_v10  ;;  %v1213_v12 = vpop.f32.mrb[5].mxu1  ;;  %513 = vst [vmem:[%s1186_s6 + $0x20] sm:$0xff] %v370_v11  ;;  %v544_v13 = vadd.f32 %v543_v9, %v370_v11  ;;  %v582_v14 = vmul.f32 %v370_v11, %v370_v11  ;;  %v612_v15 = vadd.f32 %v611_v7, %v581_v6 }
 0x107   : > { %529 = vst [vmem:[%s1186_s6 + $0xa0] sm:$0xff] %v1213_v12  ;;  %v594_v9 = vmul.f32 %v1193_v60, %v1193_v60 }
 0x108   : > { %v613_v17 = vadd.f32 %v612_v15, %v582_v14  ;;  %v918_v18 = vpop.f32.mrb[6].mxu0  ;;  %v545_v19 = vadd.f32 %v915_v8, %v544_v13  ;;  %v595_v14 = vmul.f32 %v1188_v57, %v1188_v57 }
 0x109   : > { %v1218_v20 = vpop.f32.mrb[6].mxu1  ;;  %516 = vst [vmem:[%s1186_s6 + $0x38] sm:$0xff] %v918_v18  ;;  %v380_v21 = vpop.f32.mrb[7].mxu0  ;;  %v585_v26 = vmul.f32 %v918_v18, %v918_v18 }
 0x10a   : > { %532 = vst [vmem:[%s1186_s6 + $0xb8] sm:$0xff] %v1218_v20  ;;  %v1223_v22 = vpop.f32.mrb[7].mxu1  ;;  %515 = vst [vmem:[%s1186_s6 + $0x30] sm:$0xff] %v380_v21  ;;  %v546_v23 = vadd.f32 %v545_v19, %v380_v21  ;;  %v584_v24 = vmul.f32 %v380_v21, %v380_v21  ;;  %v614_v25 = vadd.f32 %v613_v17, %v583_v16 }
 0x10b   : > { %531 = vst [vmem:[%s1186_s6 + $0xb0] sm:$0xff] %v1223_v22  ;;  %v596_v17 = vmul.f32 %v1203_v3, %v1203_v3  ;;  %v597_v21 = vmul.f32 %v1198_v1, %v1198_v1 }
 0x10c   : > { %v615_v27 = vadd.f32 %v614_v25, %v584_v24  ;;  %v921_v28 = vpop.f32.mrb[8].mxu0  ;;  %v547_v29 = vadd.f32 %v918_v18, %v546_v23 }
 0x10d   : > { %v1228_v30 = vpop.f32.mrb[8].mxu1  ;;  %518 = vst [vmem:[%s1186_s6 + $0x48] sm:$0xff] %v921_v28  ;;  %v390_v31 = vpop.f32.mrb[9].mxu0  ;;  %v587_v36 = vmul.f32 %v921_v28, %v921_v28 }
 0x10e   : > { %534 = vst [vmem:[%s1186_s6 + $0xc8] sm:$0xff] %v1228_v30  ;;  %v1233_v32 = vpop.f32.mrb[9].mxu1  ;;  %517 = vst [vmem:[%s1186_s6 + $0x40] sm:$0xff] %v390_v31  ;;  %v548_v33 = vadd.f32 %v547_v29, %v390_v31  ;;  %v586_v34 = vmul.f32 %v390_v31, %v390_v31  ;;  %v616_v35 = vadd.f32 %v615_v27, %v585_v26 }
 0x10f   : > { %533 = vst [vmem:[%s1186_s6 + $0xc0] sm:$0xff] %v1233_v32 }
 0x110   : > { %v617_v37 = vadd.f32 %v616_v35, %v586_v34  ;;  %v924_v38 = vpop.f32.mrb[10].mxu0  ;;  %v549_v39 = vadd.f32 %v921_v28, %v548_v33 }
 0x111   : > { %v1238_v40 = vpop.f32.mrb[10].mxu1  ;;  %520 = vst [vmem:[%s1186_s6 + $0x58] sm:$0xff] %v924_v38  ;;  %v400_v41 = vpop.f32.mrb[11].mxu0  ;;  %v589_v46 = vmul.f32 %v924_v38, %v924_v38 }
 0x112   : > { %536 = vst [vmem:[%s1186_s6 + $0xd8] sm:$0xff] %v1238_v40  ;;  %v1243_v42 = vpop.f32.mrb[11].mxu1  ;;  %519 = vst [vmem:[%s1186_s6 + $0x50] sm:$0xff] %v400_v41  ;;  %v550_v43 = vadd.f32 %v549_v39, %v400_v41  ;;  %v588_v44 = vmul.f32 %v400_v41, %v400_v41  ;;  %v618_v45 = vadd.f32 %v617_v37, %v587_v36 }
 0x113   : > { %535 = vst [vmem:[%s1186_s6 + $0xd0] sm:$0xff] %v1243_v42 }
 0x114   : > { %v619_v47 = vadd.f32 %v618_v45, %v588_v44  ;;  %v927_v48 = vpop.f32.mrb[12].mxu0  ;;  %v551_v49 = vadd.f32 %v924_v38, %v550_v43 }
 0x115   : > { %v1248_v50 = vpop.f32.mrb[12].mxu1  ;;  %522 = vst [vmem:[%s1186_s6 + $0x68] sm:$0xff] %v927_v48  ;;  %v410_v51 = vpop.f32.mrb[13].mxu0  ;;  %v591_v56 = vmul.f32 %v927_v48, %v927_v48 }
 0x116   : > { %538 = vst [vmem:[%s1186_s6 + $0xe8] sm:$0xff] %v1248_v50  ;;  %v490_v52 = vpop.f32.mrb[13].mxu1  ;;  %521 = vst [vmem:[%s1186_s6 + $0x60] sm:$0xff] %v410_v51  ;;  %v552_v53 = vadd.f32 %v551_v49, %v410_v51  ;;  %v590_v54 = vmul.f32 %v410_v51, %v410_v51  ;;  %v620_v55 = vadd.f32 %v619_v47, %v589_v46 }
 0x117   : > { %537 = vst [vmem:[%s1186_s6 + $0xe0] sm:$0xff] %v490_v52  ;;  %v607_v47 = vmul.f32 %v1248_v50, %v1248_v50 }
 0x118   : > { %v621_v58 = vadd.f32 %v620_v55, %v590_v54  ;;  %v930_v59 = vpop.f32.mrb[14].mxu0  ;;  %v553_v61 = vadd.f32 %v927_v48, %v552_v53 }
 0x119   : > { %v954_v62 = vpop.f32.mrb[14].mxu1  ;;  %524 = vst [vmem:[%s1186_s6 + $0x78] sm:$0xff] %v930_v59  ;;  %v420_v63 = vpop.f32.mrb[15].mxu0  ;;  %v593_v6 = vmul.f32 %v930_v59, %v930_v59 }
 0x11a   : > { %540 = vst [vmem:[%s1186_s6 + $0xf8] sm:$0xff] %v954_v62  ;;  %v500_v0 = vpop.f32.mrb[15].mxu1  ;;  %523 = vst [vmem:[%s1186_s6 + $0x70] sm:$0xff] %v420_v63  ;;  %v554_v2 = vadd.f32 %v553_v61, %v420_v63  ;;  %v592_v4 = vmul.f32 %v420_v63, %v420_v63  ;;  %v622_v5 = vadd.f32 %v621_v58, %v591_v56  ;;  %v1052_v63 = vmov 1966171168  }
 0x11b   : > { %539 = vst [vmem:[%s1186_s6 + $0xf0] sm:$0xff] %v500_v0  ;;  %v608_v49 = vmul.f32 %v500_v0, %v500_v0 }
 0x11c   : > { %v555_v7 = vadd.f32 %v930_v59, %v554_v2  ;;  %v623_v8 = vadd.f32 %v622_v5, %v592_v4  ;;  %v651_v2 = vunpack.c.l.s4 %v1052_v63  ;;  %v653_v4 = vlaneseq }
 0x11e   : > { %v624_v11 = vadd.f32 %v623_v8, %v593_v6  ;;  %v556_v13 = vadd.f32 %v555_v7, %v1193_v60  ;;  %v598_v60 = vmul.f32 %v1213_v12, %v1213_v12  ;;  %v652_v8 = vunpack.c.0.s8 %v651_v2 }
 0x11f   : > { %vm667_vm0 = vcmp.lt.s32.totalorder %v653_v4, 256 }
 0x120   : > { %v625_v15 = vadd.f32 %v624_v11, %v594_v9  ;;  %v557_v16 = vadd.f32 %v1188_v57, %v556_v13  ;;  %v599_v57 = vmul.f32 %v1208_v10, %v1208_v10 }
 0x122   : > { %v558_v18 = vadd.f32 %v557_v16, %v1203_v3  ;;  %v626_v19 = vadd.f32 %v625_v15, %v595_v14  ;;  %v600_v3 = vmul.f32 %v1223_v22, %v1223_v22 }
 0x124   : > { %v627_v23 = vadd.f32 %v626_v19, %v596_v17  ;;  %v559_v24 = vadd.f32 %v1198_v1, %v558_v18  ;;  %v601_v1 = vmul.f32 %v1218_v20, %v1218_v20 }
 0x126   : > { %v560_v25 = vadd.f32 %v559_v24, %v1213_v12  ;;  %v628_v26 = vadd.f32 %v627_v23, %v597_v21  ;;  %v602_v12 = vmul.f32 %v1233_v32, %v1233_v32 }
 0x128   : > { %v629_v27 = vadd.f32 %v628_v26, %v598_v60  ;;  %v561_v28 = vadd.f32 %v1208_v10, %v560_v25  ;;  %v603_v10 = vmul.f32 %v1228_v30, %v1228_v30 }
 0x12a   : > { %v562_v29 = vadd.f32 %v561_v28, %v1223_v22  ;;  %v630_v31 = vadd.f32 %v629_v27, %v599_v57  ;;  %v604_v22 = vmul.f32 %v1243_v42, %v1243_v42 }
 0x12c   : > { %v631_v33 = vadd.f32 %v630_v31, %v600_v3  ;;  %v563_v34 = vadd.f32 %v1218_v20, %v562_v29  ;;  %v605_v20 = vmul.f32 %v1238_v40, %v1238_v40 }
 0x12e   : > { %v564_v35 = vadd.f32 %v563_v34, %v1233_v32  ;;  %v632_v36 = vadd.f32 %v631_v33, %v601_v1  ;;  %v606_v32 = vmul.f32 %v490_v52, %v490_v52 }
 0x130   : > { %v633_v37 = vadd.f32 %v632_v36, %v602_v12  ;;  %v565_v38 = vadd.f32 %v1228_v30, %v564_v35 }
 0x132   : > { %v566_v39 = vadd.f32 %v565_v38, %v1243_v42  ;;  %v634_v41 = vadd.f32 %v633_v37, %v603_v10  ;;  %v609_v42 = vmul.f32 %v954_v62, %v954_v62 }
 0x134   : > { %v635_v43 = vadd.f32 %v634_v41, %v604_v22  ;;  %v567_v44 = vadd.f32 %v1238_v40, %v566_v39 }
 0x136   : > { %v568_v45 = vadd.f32 %v567_v44, %v490_v52  ;;  %v636_v46 = vadd.f32 %v635_v43, %v605_v20 }
 0x138   : > { %v637_v48 = vadd.f32 %v636_v46, %v606_v32  ;;  %v569_v30 = vadd.f32 %v1248_v50, %v568_v45 }
 0x13a   : > { %v570_v51 = vadd.f32 %v569_v30, %v500_v0  ;;  %v638_v53 = vadd.f32 %v637_v48, %v607_v47  ;;  %v654_v0 = vshrl.u32 %v653_v4, 7 }
 0x13c   : > { %v571_v54 = vadd.f32 %v954_v62, %v570_v51  ;;  %v639_v55 = vadd.f32 %v638_v53, %v608_v49  ;;  %v655_v13 = vsub.s32 %v652_v8, %v654_v0 }
 0x13e   : > { %v572_v56 = vrot.slane %v571_v54, 4  ;;  %v640_v58 = vadd.f32 %v639_v55, %v609_v42 }
 0x140   : > { %v573_v59 = vadd.f32 %v572_v56, %v571_v54  ;;  %v641_v61 = vrot.slane %v640_v58, 4 }
 0x142   : > { %v574_v40 = vrot.slane %v573_v59, 2  ;;  %v642_v52 = vadd.f32 %v641_v61, %v640_v58 }
 0x144   : > { %v575_v5 = vadd.f32 %v574_v40, %v573_v59  ;;  %v643_v6 = vrot.slane %v642_v52, 2 }
 0x146   : > { %v576_v7 = vrot.slane %v575_v5, 1  ;;  %v644_v50 = vadd.f32 %v643_v6, %v642_v52 }
 0x148   : > { %v645_v9 = vrot.slane %v644_v50, 1  ;;  %v577_v11 = vadd.f32 %v576_v7, %v575_v5 }
 0x14a   : > { %v646_v62 = vadd.f32 %v645_v9, %v644_v50 }
 0x14c   : > { %v649_v14 = vcombine.low %v577_v11, %v646_v62 }
 0x14e   : > { %v656_v15 = vrot.slane %v649_v14, %v655_v13 }
 0x150   : > { %v663_v16 = vrot.slane %v656_v15, %v655_v13 }
 0x152   : > { %669 = vst.msk [vmem:[%s235_s8] sm:$0x3] %vm667_vm0, %v663_v16 }
 0x153 PF: > { %s14_s14 = sadd.s32 1, %s1050_s14   ;;  %s1315_s12 = smov %s1046_s13 }
 0x154   : > { %p11_p5 = scmp.ge.s32.totalorder %s14_s14, 4   ;;  %s1316_s13 = smov %s1318_s15 }
 0x156   :  { %13 = sbr.rel (!%p11_p5) target bundleno = 2 (0x2), region = 70 }

// kernel: _lambda_.7
= control target key start
LH: loop header
LB: loop body
LE: loop exit
PB: predicated region body
PF: predicated region fallthrough
CT: control target
= control target key end

     0   :  { %s727_s15 = smov 0   ;;  %s729_s16 = smov 0   ;;  %s944_s0 = inlined_call_operand.vmem [shape: f32[2,16,16,128], index: 0, kind: input, shape index: {}]   ;;  %s945_s1 = inlined_call_operand.vmem [shape: f32[2,16,16,128], index: 1, kind: input, shape index: {}]   ;;  %s946_s2 = inlined_call_operand.vmem [shape: f32[1,128], index: 2, kind: input, shape index: {}]   ;;  %s947_s3 = inlined_call_operand.vmem [shape: f32[1,128], index: 3, kind: input, shape index: {}]   ;;  %s948_s4 = inlined_call_operand.vmem [shape: f32[2,16,16,128], index: 4, kind: output, shape index: {}]  }
   0x1   :  { %s731_s17 = smov 0  }
   0x2 LB: > { %s26_s18 = sadd.s32 1, %s696_s16  ;;  %p640_p0 = scmp.ge.s32.totalorder %s700_s17, 1  ;;  %s700_s17 = sphi %s731_s17, %s14_s17   ;;  %s696_s16 = sphi %s729_s16, %s950_s16   ;;  %s692_s15 = sphi %s727_s15, %s949_s15  }
   0x3   : > { %p28_p1 = scmp.ge.s32.totalorder %s26_s18, 2  ;;  %p202_p2 = scmp.lt.s32.totalorder %s700_s17, 3 }
   0x5   : > { %s952_s18 = smov (%p28_p1, %s26_s18), 0  ;;  %p203_p3 = pnand %p640_p0, %p202_p2 }
   0x6   : > { %p249_p4 = scmp.lt.s32.totalorder (!%p203_p3), %s692_s15, 1  ;;  %v750_v0 = vld [vmem:[%s946_s2] ss:$0 sm:$0xff] (!%p203_p3) }
   0x7   : > { %206 = sbr.rel (%p203_p3) target bundleno = 56 (0x38), region = 36  ;;  %v768_v2 = vld [vmem:[%s947_s3] ss:$0 sm:$0xff] (!%p203_p3) }
   0xe   : > { %s954_s15 = smov (!%p249_p4, %s692_s15), 1 }
   0xf   : > { %s745_s19 = sshll.u32 %s954_s15, 8 }
  0x10   : > { %s756_s24 = scalar_lea.vmem %s944_s0, %s745_s19  ;;  %s762_s27 = scalar_lea.vmem %s945_s1, %s745_s19 }
  0x11   : > { %v281_v1 = vld [vmem:[%s756_s24] sm:$0xff]  ;;  %v282_v3 = vld [vmem:[%s756_s24 + $0x8] sm:$0xff]  ;;  %v283_v7 = vld [vmem:[%s756_s24 + $0x10] sm:$0xff]  ;;  %s798_s6 = scalar_lea.vmem %s948_s4, %s745_s19 }
  0x12   : > { %v313_v4 = vld [vmem:[%s762_s27] sm:$0xff]  ;;  %v352_v5 = vmul.f32 %v750_v0, %v281_v1  ;;  %v353_v6 = vmul.f32 %v750_v0, %v282_v3  ;;  %v314_v8 = vld [vmem:[%s762_s27 + $0x8] sm:$0xff]  ;;  %v354_v9 = vmul.f32 %v750_v0, %v283_v7  ;;  %v284_v10 = vld [vmem:[%s756_s24 + $0x18] sm:$0xff] }
  0x13   : > { %v285_v11 = vld [vmem:[%s756_s24 + $0x20] sm:$0xff]  ;;  %v315_v14 = vld [vmem:[%s762_s27 + $0x10] sm:$0xff]  ;;  %v316_v15 = vld [vmem:[%s762_s27 + $0x18] sm:$0xff]  ;;  %v355_v16 = vmul.f32 %v750_v0, %v284_v10 }
  0x14   : > { %v391_v12 = vadd.f32 %v768_v2, %v352_v5  ;;  %v392_v13 = vadd.f32 %v768_v2, %v353_v6  ;;  %v356_v17 = vmul.f32 %v750_v0, %v285_v11  ;;  %v286_v18 = vld [vmem:[%s756_s24 + $0x28] sm:$0xff]  ;;  %v393_v19 = vadd.f32 %v768_v2, %v354_v9  ;;  %v317_v20 = vld [vmem:[%s762_s27 + $0x20] sm:$0xff]  ;;  %v287_v22 = vld [vmem:[%s756_s24 + $0x30] sm:$0xff] }
  0x15   : > { %v357_v21 = vmul.f32 %v750_v0, %v286_v18  ;;  %v288_v23 = vld [vmem:[%s756_s24 + $0x38] sm:$0xff]  ;;  %v394_v26 = vadd.f32 %v768_v2, %v355_v16  ;;  %v318_v28 = vld [vmem:[%s762_s27 + $0x28] sm:$0xff]  ;;  %v358_v31 = vmul.f32 %v750_v0, %v287_v22  ;;  %v289_v33 = vld [vmem:[%s756_s24 + $0x40] sm:$0xff] }
  0x16   : > { %v423_v24 = vadd.f32 %v391_v12, %v313_v4  ;;  %v424_v25 = vadd.f32 %v392_v13, %v314_v8  ;;  %v395_v27 = vadd.f32 %v768_v2, %v356_v17  ;;  %v425_v29 = vadd.f32 %v393_v19, %v315_v14  ;;  %v290_v34 = vld [vmem:[%s756_s24 + $0x48] sm:$0xff]  ;;  %v319_v39 = vld [vmem:[%s762_s27 + $0x30] sm:$0xff]  ;;  %v320_v40 = vld [vmem:[%s762_s27 + $0x38] sm:$0xff] }
  0x17   : > { %v396_v30 = vadd.f32 %v768_v2, %v357_v21  ;;  %v359_v32 = vmul.f32 %v750_v0, %v288_v23  ;;  %v426_v37 = vadd.f32 %v394_v26, %v316_v15  ;;  %v291_v41 = vld [vmem:[%s756_s24 + $0x50] sm:$0xff]  ;;  %v397_v44 = vadd.f32 %v768_v2, %v358_v31  ;;  %v292_v46 = vld [vmem:[%s756_s24 + $0x58] sm:$0xff]  ;;  %v293_v47 = vld [vmem:[%s756_s24 + $0x60] sm:$0xff] }
  0x18   : > { %v455_v35 = vmax.f32 %v423_v24, 0.0  ;;  %v456_v36 = vmax.f32 %v424_v25, 0.0  ;;  %v427_v38 = vadd.f32 %v395_v27, %v317_v20  ;;  %v457_v42 = vmax.f32 %v425_v29, 0.0  ;;  %v294_v52 = vld [vmem:[%s756_s24 + $0x68] sm:$0xff]  ;;  %v321_v56 = vld [vmem:[%s762_s27 + $0x40] sm:$0xff]  ;;  %v323_v61 = vld [vmem:[%s762_s27 + $0x50] sm:$0xff] }
  0x19   : > { %v428_v43 = vadd.f32 %v396_v30, %v318_v28  ;;  %v398_v45 = vadd.f32 %v768_v2, %v359_v32  ;;  %v458_v48 = vmax.f32 %v426_v37, 0.0  ;;  %v360_v50 = vmul.f32 %v750_v0, %v289_v33  ;;  %v322_v57 = vld [vmem:[%s762_s27 + $0x48] sm:$0xff]  ;;  %v295_v1 = vld [vmem:[%s756_s24 + $0x70] sm:$0xff]  ;;  %v296_v3 = vld [vmem:[%s756_s24 + $0x78] sm:$0xff] }
  0x1a   : > { %487 = vst [vmem:[%s798_s6] sm:$0xff] %v455_v35  ;;  %488 = vst [vmem:[%s798_s6 + $0x8] sm:$0xff] %v456_v36  ;;  %v459_v49 = vmax.f32 %v427_v38, 0.0  ;;  %v361_v51 = vmul.f32 %v750_v0, %v290_v34  ;;  %v429_v54 = vadd.f32 %v397_v44, %v319_v39  ;;  %v362_v58 = vmul.f32 %v750_v0, %v291_v41  ;;  %v324_v7 = vld [vmem:[%s762_s27 + $0x58] sm:$0xff]  ;;  %v325_v8 = vld [vmem:[%s762_s27 + $0x60] sm:$0xff] }
  0x1b   : > { %489 = vst [vmem:[%s798_s6 + $0x10] sm:$0xff] %v457_v42  ;;  %v460_v53 = vmax.f32 %v428_v43, 0.0  ;;  %v430_v55 = vadd.f32 %v398_v45, %v320_v40  ;;  %490 = vst [vmem:[%s798_s6 + $0x18] sm:$0xff] %v458_v48  ;;  %v399_v59 = vadd.f32 %v768_v2, %v360_v50  ;;  %v363_v62 = vmul.f32 %v750_v0, %v292_v46  ;;  %v326_v14 = vld [vmem:[%s762_s27 + $0x68] sm:$0xff]  ;;  %v297_v19 = vld [vmem:[%s756_s24 + $0x80] sm:$0xff] }
  0x1c   : > { %491 = vst [vmem:[%s798_s6 + $0x20] sm:$0xff] %v459_v49  ;;  %v400_v60 = vadd.f32 %v768_v2, %v361_v51  ;;  %v364_v63 = vmul.f32 %v750_v0, %v293_v47  ;;  %v461_v4 = vmax.f32 %v429_v54, 0.0  ;;  %v401_v6 = vadd.f32 %v768_v2, %v362_v58  ;;  %v298_v20 = vld [vmem:[%s756_s24 + $0x88] sm:$0xff]  ;;  %v327_v25 = vld [vmem:[%s762_s27 + $0x70] sm:$0xff]  ;;  %v328_v26 = vld [vmem:[%s762_s27 + $0x78] sm:$0xff] }
  0x1d   : > { %492 = vst [vmem:[%s798_s6 + $0x28] sm:$0xff] %v460_v53  ;;  %v462_v5 = vmax.f32 %v430_v55, 0.0  ;;  %v365_v9 = vmul.f32 %v750_v0, %v294_v52  ;;  %v431_v10 = vadd.f32 %v399_v59, %v321_v56  ;;  %v402_v12 = vadd.f32 %v768_v2, %v363_v62  ;;  %v299_v27 = vld [vmem:[%s756_s24 + $0x90] sm:$0xff]  ;;  %v300_v32 = vld [vmem:[%s756_s24 + $0x98] sm:$0xff]  ;;  %v301_v33 = vld [vmem:[%s756_s24 + $0xa0] sm:$0xff] }
  0x1e   : > { %v432_v11 = vadd.f32 %v400_v60, %v322_v57  ;;  %v403_v13 = vadd.f32 %v768_v2, %v364_v63  ;;  %493 = vst [vmem:[%s798_s6 + $0x30] sm:$0xff] %v461_v4  ;;  %v433_v15 = vadd.f32 %v401_v6, %v323_v61  ;;  %v366_v17 = vmul.f32 %v750_v0, %v295_v1  ;;  %v302_v38 = vld [vmem:[%s756_s24 + $0xa8] sm:$0xff]  ;;  %v329_v42 = vld [vmem:[%s762_s27 + $0x80] sm:$0xff]  ;;  %v331_v47 = vld [vmem:[%s762_s27 + $0x90] sm:$0xff] }
  0x1f   : > { %494 = vst [vmem:[%s798_s6 + $0x38] sm:$0xff] %v462_v5  ;;  %v404_v16 = vadd.f32 %v768_v2, %v365_v9  ;;  %v367_v18 = vmul.f32 %v750_v0, %v296_v3  ;;  %v463_v21 = vmax.f32 %v431_v10, 0.0  ;;  %v434_v23 = vadd.f32 %v402_v12, %v324_v7  ;;  %v330_v43 = vld [vmem:[%s762_s27 + $0x88] sm:$0xff]  ;;  %v303_v50 = vld [vmem:[%s756_s24 + $0xb0] sm:$0xff]  ;;  %v304_v51 = vld [vmem:[%s756_s24 + $0xb8] sm:$0xff] }
  0x20   : > { %v464_v22 = vmax.f32 %v432_v11, 0.0  ;;  %v435_v24 = vadd.f32 %v403_v13, %v325_v8  ;;  %v465_v28 = vmax.f32 %v433_v15, 0.0  ;;  %v405_v30 = vadd.f32 %v768_v2, %v366_v17  ;;  %v332_v55 = vld [vmem:[%s762_s27 + $0x98] sm:$0xff]  ;;  %v333_v56 = vld [vmem:[%s762_s27 + $0xa0] sm:$0xff]  ;;  %v334_v62 = vld [vmem:[%s762_s27 + $0xa8] sm:$0xff] }
  0x21   : > { %v436_v29 = vadd.f32 %v404_v16, %v326_v14  ;;  %v406_v31 = vadd.f32 %v768_v2, %v367_v18  ;;  %495 = vst [vmem:[%s798_s6 + $0x40] sm:$0xff] %v463_v21  ;;  %v466_v34 = vmax.f32 %v434_v23, 0.0  ;;  %v368_v36 = vmul.f32 %v750_v0, %v297_v19  ;;  %v305_v5 = vld [vmem:[%s756_s24 + $0xc0] sm:$0xff]  ;;  %v306_v6 = vld [vmem:[%s756_s24 + $0xc8] sm:$0xff]  ;;  %v335_v11 = vld [vmem:[%s762_s27 + $0xb0] sm:$0xff] }
  0x22   : > { %496 = vst [vmem:[%s798_s6 + $0x48] sm:$0xff] %v464_v22  ;;  %v467_v35 = vmax.f32 %v435_v24, 0.0  ;;  %v369_v37 = vmul.f32 %v750_v0, %v298_v20  ;;  %497 = vst [vmem:[%s798_s6 + $0x50] sm:$0xff] %v465_v28  ;;  %v437_v40 = vadd.f32 %v405_v30, %v327_v25  ;;  %v370_v44 = vmul.f32 %v750_v0, %v299_v27  ;;  %v336_v12 = vld [vmem:[%s762_s27 + $0xb8] sm:$0xff]  ;;  %v307_v13 = vld [vmem:[%s756_s24 + $0xd0] sm:$0xff] }
  0x23   : > { %v468_v39 = vmax.f32 %v436_v29, 0.0  ;;  %v438_v41 = vadd.f32 %v406_v31, %v328_v26  ;;  %498 = vst [vmem:[%s798_s6 + $0x58] sm:$0xff] %v466_v34  ;;  %v407_v45 = vadd.f32 %v768_v2, %v368_v36  ;;  %v371_v48 = vmul.f32 %v750_v0, %v300_v32  ;;  %v308_v18 = vld [vmem:[%s756_s24 + $0xd8] sm:$0xff]  ;;  %v309_v19 = vld [vmem:[%s756_s24 + $0xe0] sm:$0xff]  ;;  %v310_v24 = vld [vmem:[%s756_s24 + $0xe8] sm:$0xff] }
  0x24   : > { %499 = vst [vmem:[%s798_s6 + $0x60] sm:$0xff] %v467_v35  ;;  %v408_v46 = vadd.f32 %v768_v2, %v369_v37  ;;  %v372_v49 = vmul.f32 %v750_v0, %v301_v33  ;;  %v469_v52 = vmax.f32 %v437_v40, 0.0  ;;  %v409_v54 = vadd.f32 %v768_v2, %v370_v44  ;;  %v337_v28 = vld [vmem:[%s762_s27 + $0xc0] sm:$0xff]  ;;  %v338_v29 = vld [vmem:[%s762_s27 + $0xc8] sm:$0xff]  ;;  %v339_v33 = vld [vmem:[%s762_s27 + $0xd0] sm:$0xff] }
  0x25   : > { %500 = vst [vmem:[%s798_s6 + $0x68] sm:$0xff] %v468_v39  ;;  %v470_v53 = vmax.f32 %v438_v41, 0.0  ;;  %v373_v57 = vmul.f32 %v750_v0, %v302_v38  ;;  %v439_v58 = vadd.f32 %v407_v45, %v329_v42  ;;  %v410_v60 = vadd.f32 %v768_v2, %v371_v48  ;;  %v311_v36 = vld [vmem:[%s756_s24 + $0xf0] sm:$0xff]  ;;  %v312_v37 = vld [vmem:[%s756_s24 + $0xf8] sm:$0xff]  ;;  %v341_v42 = vld [vmem:[%s762_s27 + $0xe0] sm:$0xff] }
  0x26   : > { %v440_v59 = vadd.f32 %v408_v46, %v330_v43  ;;  %v411_v61 = vadd.f32 %v768_v2, %v372_v49  ;;  %501 = vst [vmem:[%s798_s6 + $0x70] sm:$0xff] %v469_v52  ;;  %v441_v63 = vadd.f32 %v409_v54, %v331_v47  ;;  %v374_v3 = vmul.f32 %v750_v0, %v303_v50  ;;  %v340_v41 = vld [vmem:[%s762_s27 + $0xd8] sm:$0xff]  ;;  %v342_v48 = vld [vmem:[%s762_s27 + $0xe8] sm:$0xff] }
  0x27   : > { %502 = vst [vmem:[%s798_s6 + $0x78] sm:$0xff] %v470_v53  ;;  %v412_v1 = vadd.f32 %v768_v2, %v373_v57  ;;  %v375_v4 = vmul.f32 %v750_v0, %v304_v51  ;;  %v471_v7 = vmax.f32 %v439_v58, 0.0  ;;  %v442_v9 = vadd.f32 %v410_v60, %v332_v55  ;;  %v343_v57 = vld [vmem:[%s762_s27 + $0xf0] sm:$0xff]  ;;  %v344_v58 = vld [vmem:[%s762_s27 + $0xf8] sm:$0xff] }
  0x28   : > { %v472_v8 = vmax.f32 %v440_v59, 0.0  ;;  %v443_v10 = vadd.f32 %v411_v61, %v333_v56  ;;  %v473_v14 = vmax.f32 %v441_v63, 0.0  ;;  %v413_v16 = vadd.f32 %v768_v2, %v374_v3 }
  0x29   : > { %v444_v15 = vadd.f32 %v412_v1, %v334_v62  ;;  %v414_v17 = vadd.f32 %v768_v2, %v375_v4  ;;  %503 = vst [vmem:[%s798_s6 + $0x80] sm:$0xff] %v471_v7  ;;  %v474_v20 = vmax.f32 %v442_v9, 0.0  ;;  %v376_v22 = vmul.f32 %v750_v0, %v305_v5 }
  0x2a   : > { %504 = vst [vmem:[%s798_s6 + $0x88] sm:$0xff] %v472_v8  ;;  %v475_v21 = vmax.f32 %v443_v10, 0.0  ;;  %v377_v23 = vmul.f32 %v750_v0, %v306_v6  ;;  %505 = vst [vmem:[%s798_s6 + $0x90] sm:$0xff] %v473_v14  ;;  %v445_v26 = vadd.f32 %v413_v16, %v335_v11  ;;  %v378_v30 = vmul.f32 %v750_v0, %v307_v13 }
  0x2b   : > { %v476_v25 = vmax.f32 %v444_v15, 0.0  ;;  %v446_v27 = vadd.f32 %v414_v17, %v336_v12  ;;  %506 = vst [vmem:[%s798_s6 + $0x98] sm:$0xff] %v474_v20  ;;  %v415_v31 = vadd.f32 %v768_v2, %v376_v22  ;;  %v379_v34 = vmul.f32 %v750_v0, %v308_v18 }
  0x2c   : > { %507 = vst [vmem:[%s798_s6 + $0xa0] sm:$0xff] %v475_v21  ;;  %v416_v32 = vadd.f32 %v768_v2, %v377_v23  ;;  %v380_v35 = vmul.f32 %v750_v0, %v309_v19  ;;  %v477_v38 = vmax.f32 %v445_v26, 0.0  ;;  %v417_v40 = vadd.f32 %v768_v2, %v378_v30 }
  0x2d   : > { %508 = vst [vmem:[%s798_s6 + $0xa8] sm:$0xff] %v476_v25  ;;  %v478_v39 = vmax.f32 %v446_v27, 0.0  ;;  %v381_v43 = vmul.f32 %v750_v0, %v310_v24  ;;  %v447_v44 = vadd.f32 %v415_v31, %v337_v28  ;;  %v418_v46 = vadd.f32 %v768_v2, %v379_v34 }
  0x2e   : > { %v448_v45 = vadd.f32 %v416_v32, %v338_v29  ;;  %v419_v47 = vadd.f32 %v768_v2, %v380_v35  ;;  %509 = vst [vmem:[%s798_s6 + $0xb0] sm:$0xff] %v477_v38  ;;  %v449_v49 = vadd.f32 %v417_v40, %v339_v33  ;;  %v382_v51 = vmul.f32 %v750_v0, %v311_v36 }
  0x2f   : > { %510 = vst [vmem:[%s798_s6 + $0xb8] sm:$0xff] %v478_v39  ;;  %v420_v50 = vadd.f32 %v768_v2, %v381_v43  ;;  %v383_v52 = vmul.f32 %v750_v0, %v312_v37  ;;  %v479_v53 = vmax.f32 %v447_v44, 0.0  ;;  %v450_v55 = vadd.f32 %v418_v46, %v340_v41 }
  0x30   : > { %v480_v54 = vmax.f32 %v448_v45, 0.0  ;;  %v451_v56 = vadd.f32 %v419_v47, %v341_v42  ;;  %v481_v59 = vmax.f32 %v449_v49, 0.0  ;;  %v421_v61 = vadd.f32 %v768_v2, %v382_v51 }
  0x31   : > { %v452_v60 = vadd.f32 %v420_v50, %v342_v48  ;;  %v422_v62 = vadd.f32 %v768_v2, %v383_v52  ;;  %511 = vst [vmem:[%s798_s6 + $0xc0] sm:$0xff] %v479_v53  ;;  %v482_v0 = vmax.f32 %v450_v55, 0.0 }
  0x32   : > { %512 = vst [vmem:[%s798_s6 + $0xc8] sm:$0xff] %v480_v54  ;;  %v483_v63 = vmax.f32 %v451_v56, 0.0  ;;  %513 = vst [vmem:[%s798_s6 + $0xd0] sm:$0xff] %v481_v59  ;;  %v453_v3 = vadd.f32 %v421_v61, %v343_v57 }
  0x33   : > { %v484_v1 = vmax.f32 %v452_v60, 0.0  ;;  %v454_v4 = vadd.f32 %v422_v62, %v344_v58  ;;  %514 = vst [vmem:[%s798_s6 + $0xd8] sm:$0xff] %v482_v0 }
  0x34   : > { %515 = vst [vmem:[%s798_s6 + $0xe0] sm:$0xff] %v483_v63  ;;  %v485_v5 = vmax.f32 %v453_v3, 0.0 }
  0x35   : > { %516 = vst [vmem:[%s798_s6 + $0xe8] sm:$0xff] %v484_v1  ;;  %v486_v6 = vmax.f32 %v454_v4, 0.0 }
  0x36   : > { %517 = vst [vmem:[%s798_s6 + $0xf0] sm:$0xff] %v485_v5 }
  0x37   : > { %518 = vst [vmem:[%s798_s6 + $0xf8] sm:$0xff] %v486_v6 }
  0x38 PF: > { %s14_s17 = sadd.s32 1, %s700_s17   ;;  %s949_s15 = smov %s696_s16 }
  0x39   : > { %p11_p5 = scmp.ge.s32.totalorder %s14_s17, 4   ;;  %s950_s16 = smov %s952_s18 }
  0x3b   :  { %13 = sbr.rel (!%p11_p5) target bundleno = 2 (0x2), region = 69 }

// kernel: _lambda_.6
= control target key start
LH: loop header
LB: loop body
LE: loop exit
PB: predicated region body
PF: predicated region fallthrough
CT: control target
= control target key end

     0   :  { %s1249_s18 = smov 0   ;;  %s1251_s19 = smov 0   ;;  %s1561_s0 = inlined_call_operand.vmem [shape: f32[2,16,16,128], index: 0, kind: input, shape index: {}]   ;;  %s1562_s1 = inlined_call_operand.vmem [shape: f32[128,128], index: 1, kind: input, shape index: {}]   ;;  %s1563_s2 = inlined_call_operand.vmem [shape: f32[1,128], index: 2, kind: input, shape index: {}]   ;;  %s1564_s3 = inlined_call_operand.vmem [shape: f32[1,128], index: 3, kind: input, shape index: {}]   ;;  %s1565_s4 = inlined_call_operand.vmem [shape: f32[2,16,16,128], index: 4, kind: output, shape index: {0}]   ;;  %s1566_s5 = inlined_call_operand.vmem [shape: f32[2,1,1,256], index: 5, kind: output, shape index: {1}]  }
   0x1   :  { %s1253_s20 = smov 0  }
   0x2 LB: > { %s28_s21 = sadd.s32 1, %s1212_s19  ;;  %p981_p0 = scmp.ge.s32.totalorder %s1216_s20, 1  ;;  %s1216_s20 = sphi %s1253_s20, %s16_s20   ;;  %s1212_s19 = sphi %s1251_s19, %s1568_s19   ;;  %s1208_s18 = sphi %s1249_s18, %s1567_s18  }
   0x3   : > { %p30_p1 = scmp.ge.s32.totalorder %s28_s21, 2  ;;  %p214_p2 = scmp.lt.s32.totalorder %s1216_s20, 3 }
   0x5   : > { %s1570_s21 = smov (%p30_p1, %s28_s21), 0  ;;  %p215_p3 = pnand %p981_p0, %p214_p2 }
   0x6   : > { %v432_v0 = vld [vmem:[%s1562_s1] sm:$0xff] (!%p215_p3)  ;;  %v433_v1 = vld [vmem:[%s1562_s1 + $0x8] sm:$0xff] (!%p215_p3)  ;;  %v434_v2 = vld [vmem:[%s1562_s1 + $0x10] sm:$0xff] (!%p215_p3)  ;;  %p261_p4 = scmp.lt.s32.totalorder (!%p215_p3), %s1208_s18, 1 }
   0x7   : > { %218 = sbr.rel (%p215_p3) target bundleno = 339 (0x153), region = 36  ;;  %v1121_v3 = vpack.c.bf16 (!%p215_p3), %v433_v1, %v432_v0  ;;  %v435_v4 = vld [vmem:[%s1562_s1 + $0x18] sm:$0xff] (!%p215_p3)  ;;  %v436_v6 = vld [vmem:[%s1562_s1 + $0x20] sm:$0xff] (!%p215_p3)  ;;  %v437_v7 = vld [vmem:[%s1562_s1 + $0x28] sm:$0xff] (!%p215_p3) }
   0x8   : > { %v1125_v5 = vpack.c.bf16 (!%p215_p3), %v435_v4, %v434_v2  ;;  %v1129_v8 = vpack.c.bf16 (!%p215_p3), %v437_v7, %v436_v6  ;;  %v438_v9 = vld [vmem:[%s1562_s1 + $0x30] sm:$0xff] (!%p215_p3)  ;;  %v1301_v10 = vld [vmem:[%s1563_s2] ss:$0 sm:$0xff] (!%p215_p3)  ;;  %v439_v11 = vld [vmem:[%s1562_s1 + $0x38] sm:$0xff] (!%p215_p3) }
   0x9   : > { %1122 = vmatprep.subr.bf16.mxu0 (!%p215_p3), %v1121_v3  ;;  %1153 = vmatprep.subr.bf16.mxu1 (!%p215_p3), %v1121_v3  ;;  %v1310_v13 = vld [vmem:[%s1564_s3] ss:$0 sm:$0xff] (!%p215_p3)  ;;  %v1133_v15 = vpack.c.bf16 (!%p215_p3), %v439_v11, %v438_v9  ;;  %v441_v18 = vld [vmem:[%s1562_s1 + $0x48] sm:$0xff] (!%p215_p3)  ;;  %v442_v21 = vld [vmem:[%s1562_s1 + $0x50] sm:$0xff] (!%p215_p3) }
   0xa   : > { %1124 = vmatpush3.bf16.msra.mxu0 (!%p215_p3), %v1121_v3  ;;  %1161 = vmatpush3.bf16.msra.mxu1 (!%p215_p3), %v1121_v3  ;;  %v440_v17 = vld [vmem:[%s1562_s1 + $0x40] sm:$0xff] (!%p215_p3)  ;;  %v443_v22 = vld [vmem:[%s1562_s1 + $0x58] sm:$0xff] (!%p215_p3)  ;;  %v445_v26 = vld [vmem:[%s1562_s1 + $0x68] sm:$0xff] (!%p215_p3) }
   0xb   : > { %1126 = vmatprep.subr.bf16.mxu0 (!%p215_p3), %v1125_v5  ;;  %1154 = vmatprep.subr.bf16.mxu1 (!%p215_p3), %v1125_v5  ;;  %v1137_v20 = vpack.c.bf16 (!%p215_p3), %v441_v18, %v440_v17  ;;  %v1141_v24 = vpack.c.bf16 (!%p215_p3), %v443_v22, %v442_v21  ;;  %v444_v25 = vld [vmem:[%s1562_s1 + $0x60] sm:$0xff] (!%p215_p3)  ;;  %v446_v34 = vld [vmem:[%s1562_s1 + $0x70] sm:$0xff] (!%p215_p3)  ;;  %v447_v35 = vld [vmem:[%s1562_s1 + $0x78] sm:$0xff] (!%p215_p3) }
   0xc   : > { %v1145_v30 = vpack.c.bf16 (!%p215_p3), %v445_v26, %v444_v25  ;;  %v1149_v44 = vpack.c.bf16 (!%p215_p3), %v447_v35, %v446_v34 }
   0xe   : > { %s1572_s18 = smov (!%p261_p4, %s1208_s18), 1  ;;  %1128 = vmatpush3.bf16.msra.mxu0 %v1125_v5  ;;  %1162 = vmatpush3.bf16.msra.mxu1 %v1125_v5 }
   0xf   : > { %s991_s9 = sshll.u32 %s1572_s18, 8  ;;  %1130 = vmatprep.subr.bf16.mxu0 %v1129_v8  ;;  %1155 = vmatprep.subr.bf16.mxu1 %v1129_v8 }
  0x10   : > { %s1296_s14 = scalar_lea.vmem %s1561_s0, %s991_s9  ;;  %s1436_s23 = scalar_lea.vmem %s1565_s4, %s991_s9 }
  0x11   : > { %v290_v12 = vld [vmem:[%s1296_s14] sm:$0xff]  ;;  %v291_v28 = vld [vmem:[%s1296_s14 + $0x8] sm:$0xff]  ;;  %v292_v31 = vld [vmem:[%s1296_s14 + $0x10] sm:$0xff]  ;;  %s986_s9 = sshll.u32 %s1572_s18, 1 }
  0x12   : > { %v329_v14 = vmul.f32 %v1301_v10, %v290_v12  ;;  %1132 = vmatpush3.bf16.msra.mxu0 %v1129_v8  ;;  %1163 = vmatpush3.bf16.msra.mxu1 %v1129_v8  ;;  %v306_v23 = vld [vmem:[%s1296_s14 + $0x80] sm:$0xff]  ;;  %v307_v29 = vld [vmem:[%s1296_s14 + $0x88] sm:$0xff]  ;;  %v308_v33 = vld [vmem:[%s1296_s14 + $0x90] sm:$0xff]  ;;  %v330_v36 = vmul.f32 %v1301_v10, %v291_v28  ;;  %v331_v41 = vmul.f32 %v1301_v10, %v292_v31  ;;  %s289_s26 = scalar_lea.vmem %s1566_s5, %s986_s9 }
  0x13   : > { %1134 = vmatprep.subr.bf16.mxu0 %v1133_v15  ;;  %1156 = vmatprep.subr.bf16.mxu1 %v1133_v15  ;;  %v345_v27 = vmul.f32 %v1301_v10, %v306_v23  ;;  %v293_v37 = vld [vmem:[%s1296_s14 + $0x18] sm:$0xff]  ;;  %v294_v38 = vld [vmem:[%s1296_s14 + $0x20] sm:$0xff]  ;;  %v346_v40 = vmul.f32 %v1301_v10, %v307_v29  ;;  %v347_v42 = vmul.f32 %v1301_v10, %v308_v33  ;;  %v295_v49 = vld [vmem:[%s1296_s14 + $0x28] sm:$0xff] }
  0x14   : > { %v368_v16 = vadd.f32 %v1310_v13, %v329_v14  ;;  %v309_v43 = vld [vmem:[%s1296_s14 + $0x98] sm:$0xff]  ;;  %v310_v45 = vld [vmem:[%s1296_s14 + $0xa0] sm:$0xff]  ;;  %v332_v46 = vmul.f32 %v1301_v10, %v293_v37  ;;  %v333_v47 = vmul.f32 %v1301_v10, %v294_v38  ;;  %v369_v48 = vadd.f32 %v1310_v13, %v330_v36  ;;  %v296_v50 = vld [vmem:[%s1296_s14 + $0x30] sm:$0xff] }
  0x15   : > { %v384_v32 = vadd.f32 %v1310_v13, %v345_v27  ;;  %v385_v51 = vadd.f32 %v1310_v13, %v346_v40  ;;  %v348_v52 = vmul.f32 %v1301_v10, %v309_v43  ;;  %v370_v53 = vadd.f32 %v1310_v13, %v331_v41  ;;  %v311_v56 = vld [vmem:[%s1296_s14 + $0xa8] sm:$0xff]  ;;  %v312_v57 = vld [vmem:[%s1296_s14 + $0xb0] sm:$0xff]  ;;  %v297_v63 = vld [vmem:[%s1296_s14 + $0x38] sm:$0xff] }
  0x16   : > { %v400_v19 = vmax.f32 %v368_v16, 0.0  ;;  %1136 = vmatpush3.bf16.msra.mxu0 %v1133_v15  ;;  %1164 = vmatpush3.bf16.msra.mxu1 %v1133_v15  ;;  %v386_v54 = vadd.f32 %v1310_v13, %v347_v42  ;;  %v349_v55 = vmul.f32 %v1301_v10, %v310_v45  ;;  %v371_v58 = vadd.f32 %v1310_v13, %v332_v46  ;;  %v313_v7 = vld [vmem:[%s1296_s14 + $0xb8] sm:$0xff]  ;;  %v298_v8 = vld [vmem:[%s1296_s14 + $0x40] sm:$0xff]  ;;  %v299_v17 = vld [vmem:[%s1296_s14 + $0x48] sm:$0xff] }
  0x17   : > { %1138 = vmatprep.subr.bf16.mxu0 %v1137_v20  ;;  %1157 = vmatprep.subr.bf16.mxu1 %v1137_v20  ;;  %v416_v39 = vmax.f32 %v384_v32, 0.0  ;;  %v372_v59 = vadd.f32 %v1310_v13, %v333_v47  ;;  %v334_v60 = vmul.f32 %v1301_v10, %v295_v49  ;;  %v335_v61 = vmul.f32 %v1301_v10, %v296_v50  ;;  %v314_v9 = vld [vmem:[%s1296_s14 + $0xc0] sm:$0xff]  ;;  %v300_v22 = vld [vmem:[%s1296_s14 + $0x50] sm:$0xff]  ;;  %v315_v26 = vld [vmem:[%s1296_s14 + $0xc8] sm:$0xff] }
  0x18   : > { %1073 = vmatprep.mubr.f32.mxu0 %v400_v19  ;;  %v401_v62 = vmax.f32 %v369_v48, 0.0  ;;  %v417_v0 = vmax.f32 %v385_v51, 0.0  ;;  %v387_v1 = vadd.f32 %v1310_v13, %v348_v52  ;;  %v350_v2 = vmul.f32 %v1301_v10, %v311_v56  ;;  %v316_v27 = vld [vmem:[%s1296_s14 + $0xd0] sm:$0xff]  ;;  %v301_v33 = vld [vmem:[%s1296_s14 + $0x58] sm:$0xff]  ;;  %v302_v34 = vld [vmem:[%s1296_s14 + $0x60] sm:$0xff] }
  0x19   : > { %1097 = vmatprep.mubr.f32.mxu1 %v416_v39  ;;  %v402_v3 = vmax.f32 %v370_v53, 0.0  ;;  %v418_v4 = vmax.f32 %v386_v54, 0.0  ;;  %v388_v5 = vadd.f32 %v1310_v13, %v349_v55  ;;  %v351_v6 = vmul.f32 %v1301_v10, %v312_v57  ;;  %v317_v42 = vld [vmem:[%s1296_s14 + $0xd8] sm:$0xff]  ;;  %v318_v43 = vld [vmem:[%s1296_s14 + $0xe0] sm:$0xff]  ;;  %v303_v49 = vld [vmem:[%s1296_s14 + $0x68] sm:$0xff] }
  0x1a   : > { %1140 = vmatpush3.bf16.msra.mxu0 %v1137_v20  ;;  %1165 = vmatpush3.bf16.msra.mxu1 %v1137_v20  ;;  %v403_v11 = vmax.f32 %v371_v58, 0.0  ;;  %v373_v12 = vadd.f32 %v1310_v13, %v334_v60  ;;  %v374_v14 = vadd.f32 %v1310_v13, %v335_v61  ;;  %v336_v15 = vmul.f32 %v1301_v10, %v297_v63  ;;  %v304_v54 = vld [vmem:[%s1296_s14 + $0x70] sm:$0xff]  ;;  %v319_v58 = vld [vmem:[%s1296_s14 + $0xe8] sm:$0xff] }
  0x1b   : > { %1142 = vmatprep.subr.bf16.mxu0 %v1141_v24  ;;  %1158 = vmatprep.subr.bf16.mxu1 %v1141_v24  ;;  %v404_v16 = vmax.f32 %v372_v59, 0.0  ;;  %v419_v18 = vmax.f32 %v387_v1, 0.0  ;;  %v389_v19 = vadd.f32 %v1310_v13, %v350_v2  ;;  %v352_v20 = vmul.f32 %v1301_v10, %v313_v7  ;;  %v320_v59 = vld [vmem:[%s1296_s14 + $0xf0] sm:$0xff] }
  0x1c   : > { %v337_v21 = vmul.f32 %v1301_v10, %v298_v8  ;;  %v420_v23 = vmax.f32 %v388_v5, 0.0  ;;  %v353_v25 = vmul.f32 %v1301_v10, %v314_v9  ;;  %v405_v28 = vmax.f32 %v373_v12, 0.0  ;;  %v305_v5 = vld [vmem:[%s1296_s14 + $0x78] sm:$0xff] }
  0x1d   : > { %v406_v29 = vmax.f32 %v374_v14, 0.0  ;;  %v338_v31 = vmul.f32 %v1301_v10, %v299_v17  ;;  %v339_v32 = vmul.f32 %v1301_v10, %v300_v22  ;;  %v421_v35 = vmax.f32 %v389_v19, 0.0  ;;  %v321_v9 = vld [vmem:[%s1296_s14 + $0xf8] sm:$0xff] }
  0x1e   : > { %1144 = vmatpush3.bf16.msra.mxu0 %v1141_v24  ;;  %1166 = vmatpush3.bf16.msra.mxu1 %v1141_v24  ;;  %v390_v24 = vadd.f32 %v1310_v13, %v351_v6  ;;  %v391_v36 = vadd.f32 %v1310_v13, %v352_v20  ;;  %v354_v37 = vmul.f32 %v1301_v10, %v315_v26 }
  0x1f   : > { %1146 = vmatprep.subr.bf16.mxu0 %v1145_v30  ;;  %1159 = vmatprep.subr.bf16.mxu1 %v1145_v30  ;;  %v376_v38 = vadd.f32 %v1310_v13, %v337_v21  ;;  %v392_v40 = vadd.f32 %v1310_v13, %v353_v25  ;;  %v355_v41 = vmul.f32 %v1301_v10, %v316_v27 }
  0x20   : > { %v422_v39 = vmax.f32 %v390_v24, 0.0  ;;  %v377_v45 = vadd.f32 %v1310_v13, %v338_v31  ;;  %v340_v46 = vmul.f32 %v1301_v10, %v301_v33  ;;  %v341_v47 = vmul.f32 %v1301_v10, %v302_v34 }
  0x21   : > { %v378_v48 = vadd.f32 %v1310_v13, %v339_v32  ;;  %v423_v50 = vmax.f32 %v391_v36, 0.0  ;;  %v393_v51 = vadd.f32 %v1310_v13, %v354_v37  ;;  %v356_v52 = vmul.f32 %v1301_v10, %v317_v42 }
  0x22   : > { %1148 = vmatpush3.bf16.msra.mxu0 %v1145_v30  ;;  %1167 = vmatpush3.bf16.msra.mxu1 %v1145_v30  ;;  %v375_v30 = vadd.f32 %v1310_v13, %v336_v15  ;;  %v408_v53 = vmax.f32 %v376_v38, 0.0  ;;  %v424_v55 = vmax.f32 %v392_v40, 0.0  ;;  %v394_v56 = vadd.f32 %v1310_v13, %v355_v41 }
  0x23   : > { %1150 = vmatprep.subr.bf16.mxu0 %v1149_v44  ;;  %1160 = vmatprep.subr.bf16.mxu1 %v1149_v44  ;;  %v357_v57 = vmul.f32 %v1301_v10, %v318_v43  ;;  %v409_v60 = vmax.f32 %v377_v45, 0.0  ;;  %v379_v61 = vadd.f32 %v1310_v13, %v340_v46  ;;  %v342_v63 = vmul.f32 %v1301_v10, %v303_v49 }
  0x24   : > { %v425_v1 = vmax.f32 %v393_v51, 0.0  ;;  %v395_v2 = vadd.f32 %v1310_v13, %v356_v52  ;;  %v426_v6 = vmax.f32 %v394_v56, 0.0  ;;  %v359_v8 = vmul.f32 %v1301_v10, %v320_v59 }
  0x25   : > { %v396_v7 = vadd.f32 %v1310_v13, %v357_v57  ;;  %v381_v12 = vadd.f32 %v1310_v13, %v342_v63  ;;  %v344_v14 = vmul.f32 %v1301_v10, %v305_v5  ;;  %v360_v17 = vmul.f32 %v1301_v10, %v321_v9 }
  0x26   : > { %1152 = vmatpush3.bf16.msra.mxu0 %v1149_v44  ;;  %1168 = vmatpush3.bf16.msra.mxu1 %v1149_v44  ;;  %v407_v44 = vmax.f32 %v375_v30, 0.0  ;;  %v427_v15 = vmax.f32 %v395_v2, 0.0  ;;  %v398_v21 = vadd.f32 %v1310_v13, %v359_v8 }
  0x27   : > { %v428_v20 = vmax.f32 %v396_v7, 0.0  ;;  %v413_v22 = vmax.f32 %v381_v12, 0.0  ;;  %v399_v25 = vadd.f32 %v1310_v13, %v360_v17 }
  0x29   : > { %1074 = vmatmul.mubr.f32.vlgmr.msra.gmra.mrb[0].mxu0 %v401_v62  ;;  %1098 = vmatmul.mubr.f32.vlgmr.msra.gmra.mrb[0].mxu1 %v417_v0  ;;  %v380_v62 = vadd.f32 %v1310_v13, %v341_v47  ;;  %v343_v0 = vmul.f32 %v1301_v10, %v304_v54 }
  0x2a   : > { %1076 = vmatprep.mubr.f32.mxu0 %v402_v3  ;;  %1100 = vmatprep.mubr.f32.mxu1 %v418_v4  ;;  %v358_v3 = vmul.f32 %v1301_v10, %v319_v58  ;;  %v410_v4 = vmax.f32 %v378_v48, 0.0  ;;  %v430_v10 = vmax.f32 %v398_v21, 0.0 }
  0x2b   : > { %v382_v19 = vadd.f32 %v1310_v13, %v343_v0 }
  0x2d   : > { %1077 = vmatmul.mubr.f32.gmra.mrb[2].mxu0 %v403_v11  ;;  %1101 = vmatmul.mubr.f32.gmra.mrb[2].mxu1 %v419_v18  ;;  %v411_v11 = vmax.f32 %v379_v61, 0.0  ;;  %v412_v18 = vmax.f32 %v380_v62, 0.0  ;;  %v414_v26 = vmax.f32 %v382_v19, 0.0 }
  0x2e   : > { %1079 = vmatprep.mubr.f32.mxu0 %v404_v16  ;;  %1103 = vmatprep.mubr.f32.mxu1 %v420_v23  ;;  %v397_v16 = vadd.f32 %v1310_v13, %v358_v3  ;;  %v383_v23 = vadd.f32 %v1310_v13, %v344_v14 }
  0x30   : > { %v429_v24 = vmax.f32 %v397_v16, 0.0  ;;  %v415_v27 = vmax.f32 %v383_v23, 0.0 }
  0x31   : > { %1080 = vmatmul.mubr.f32.gmra.mrb[4].mxu0 %v405_v28  ;;  %1104 = vmatmul.mubr.f32.gmra.mrb[4].mxu1 %v421_v35  ;;  %v431_v28 = vmax.f32 %v399_v25, 0.0 }
  0x32   : > { %1082 = vmatprep.mubr.f32.mxu0 %v406_v29  ;;  %1106 = vmatprep.mubr.f32.mxu1 %v422_v39 }
  0x35   : > { %1083 = vmatmul.mubr.f32.gmra.mrb[6].mxu0 %v407_v44  ;;  %1107 = vmatmul.mubr.f32.gmra.mrb[6].mxu1 %v423_v50 }
  0x36   : > { %1085 = vmatprep.mubr.f32.mxu0 %v408_v53  ;;  %1109 = vmatprep.mubr.f32.mxu1 %v424_v55 }
  0x39   : > { %1086 = vmatmul.mubr.f32.gmra.mrb[8].mxu0 %v409_v60  ;;  %1110 = vmatmul.mubr.f32.gmra.mrb[8].mxu1 %v425_v1 }
  0x3a   : > { %1088 = vmatprep.mubr.f32.mxu0 %v410_v4  ;;  %1112 = vmatprep.mubr.f32.mxu1 %v426_v6 }
  0x3d   : > { %1089 = vmatmul.mubr.f32.gmra.mrb[10].mxu0 %v411_v11  ;;  %1113 = vmatmul.mubr.f32.gmra.mrb[10].mxu1 %v427_v15 }
  0x3e   : > { %1091 = vmatprep.mubr.f32.mxu0 %v412_v18  ;;  %1115 = vmatprep.mubr.f32.mxu1 %v428_v20 }
  0x41   : > { %1092 = vmatmul.mubr.f32.gmra.mrb[12].mxu0 %v413_v22  ;;  %1116 = vmatmul.mubr.f32.gmra.mrb[12].mxu1 %v429_v24 }
  0x42   : > { %1094 = vmatprep.mubr.f32.mxu0 %v414_v26  ;;  %1118 = vmatprep.mubr.f32.mxu1 %v430_v10 }
  0x45   : > { %1095 = vmatmul.mubr.f32.gmra.mrb[14].mxu0 %v415_v27  ;;  %1119 = vmatmul.mubr.f32.gmra.mrb[14].mxu1 %v431_v28 }
  0xfc   : > { %v1075_v13 = vpop.f32.mrb[0].mxu0  ;;  %v1438_v29 = vpop.f32.mrb[0].mxu1 }
  0xfd   : > { %674 = vst [vmem:[%s1436_s23 + $0x8] sm:$0xff] %v1075_v13  ;;  %v743_v30 = vmul.f32 %v1075_v13, %v1075_v13  ;;  %v514_v31 = vpop.f32.mrb[1].mxu0  ;;  %690 = vst [vmem:[%s1436_s23 + $0x88] sm:$0xff] %v1438_v29  ;;  %v1443_v32 = vpop.f32.mrb[1].mxu1 }
  0xfe   : > { %673 = vst [vmem:[%s1436_s23] sm:$0xff] %v514_v31  ;;  %v705_v33 = vadd.f32 %v1075_v13, %v514_v31  ;;  %v742_v34 = vmul.f32 %v514_v31, %v514_v31  ;;  %689 = vst [vmem:[%s1436_s23 + $0x80] sm:$0xff] %v1443_v32 }
 0x100   : > { %v774_v35 = vadd.f32 %v743_v30, %v742_v34  ;;  %v1078_v36 = vpop.f32.mrb[2].mxu0  ;;  %v1448_v37 = vpop.f32.mrb[2].mxu1 }
 0x101   : > { %676 = vst [vmem:[%s1436_s23 + $0x18] sm:$0xff] %v1078_v36  ;;  %v524_v38 = vpop.f32.mrb[3].mxu0  ;;  %692 = vst [vmem:[%s1436_s23 + $0x98] sm:$0xff] %v1448_v37  ;;  %v1453_v39 = vpop.f32.mrb[3].mxu1  ;;  %v745_v42 = vmul.f32 %v1078_v36, %v1078_v36 }
 0x102   : > { %675 = vst [vmem:[%s1436_s23 + $0x10] sm:$0xff] %v524_v38  ;;  %v706_v40 = vadd.f32 %v705_v33, %v524_v38  ;;  %v744_v41 = vmul.f32 %v524_v38, %v524_v38  ;;  %691 = vst [vmem:[%s1436_s23 + $0x90] sm:$0xff] %v1453_v39 }
 0x104   : > { %v775_v43 = vadd.f32 %v774_v35, %v744_v41  ;;  %v1081_v44 = vpop.f32.mrb[4].mxu0  ;;  %v707_v45 = vadd.f32 %v1078_v36, %v706_v40  ;;  %v1458_v46 = vpop.f32.mrb[4].mxu1 }
 0x105   : > { %678 = vst [vmem:[%s1436_s23 + $0x28] sm:$0xff] %v1081_v44  ;;  %v534_v47 = vpop.f32.mrb[5].mxu0  ;;  %694 = vst [vmem:[%s1436_s23 + $0xa8] sm:$0xff] %v1458_v46  ;;  %v1463_v48 = vpop.f32.mrb[5].mxu1  ;;  %v747_v52 = vmul.f32 %v1081_v44, %v1081_v44 }
 0x106   : > { %677 = vst [vmem:[%s1436_s23 + $0x20] sm:$0xff] %v534_v47  ;;  %v708_v49 = vadd.f32 %v707_v45, %v534_v47  ;;  %v746_v50 = vmul.f32 %v534_v47, %v534_v47  ;;  %v776_v51 = vadd.f32 %v775_v43, %v745_v42  ;;  %693 = vst [vmem:[%s1436_s23 + $0xa0] sm:$0xff] %v1463_v48 }
 0x107   : > { %v758_v45 = vmul.f32 %v1443_v32, %v1443_v32 }
 0x108   : > { %v777_v53 = vadd.f32 %v776_v51, %v746_v50  ;;  %v1084_v54 = vpop.f32.mrb[6].mxu0  ;;  %v709_v55 = vadd.f32 %v1081_v44, %v708_v49  ;;  %v1468_v56 = vpop.f32.mrb[6].mxu1  ;;  %v759_v50 = vmul.f32 %v1438_v29, %v1438_v29 }
 0x109   : > { %680 = vst [vmem:[%s1436_s23 + $0x38] sm:$0xff] %v1084_v54  ;;  %v544_v57 = vpop.f32.mrb[7].mxu0  ;;  %696 = vst [vmem:[%s1436_s23 + $0xb8] sm:$0xff] %v1468_v56  ;;  %v1473_v58 = vpop.f32.mrb[7].mxu1  ;;  %v749_v62 = vmul.f32 %v1084_v54, %v1084_v54 }
 0x10a   : > { %679 = vst [vmem:[%s1436_s23 + $0x30] sm:$0xff] %v544_v57  ;;  %v710_v59 = vadd.f32 %v709_v55, %v544_v57  ;;  %v748_v60 = vmul.f32 %v544_v57, %v544_v57  ;;  %v778_v61 = vadd.f32 %v777_v53, %v747_v52  ;;  %695 = vst [vmem:[%s1436_s23 + $0xb0] sm:$0xff] %v1473_v58 }
 0x10b   : > { %v760_v53 = vmul.f32 %v1453_v39, %v1453_v39  ;;  %v761_v57 = vmul.f32 %v1448_v37, %v1448_v37 }
 0x10c   : > { %v779_v63 = vadd.f32 %v778_v61, %v748_v60  ;;  %v1087_v0 = vpop.f32.mrb[8].mxu0  ;;  %v711_v1 = vadd.f32 %v1084_v54, %v710_v59  ;;  %v1478_v2 = vpop.f32.mrb[8].mxu1 }
 0x10d   : > { %682 = vst [vmem:[%s1436_s23 + $0x48] sm:$0xff] %v1087_v0  ;;  %v554_v3 = vpop.f32.mrb[9].mxu0  ;;  %698 = vst [vmem:[%s1436_s23 + $0xc8] sm:$0xff] %v1478_v2  ;;  %v1483_v4 = vpop.f32.mrb[9].mxu1  ;;  %v751_v8 = vmul.f32 %v1087_v0, %v1087_v0 }
 0x10e   : > { %681 = vst [vmem:[%s1436_s23 + $0x40] sm:$0xff] %v554_v3  ;;  %v712_v5 = vadd.f32 %v711_v1, %v554_v3  ;;  %v750_v6 = vmul.f32 %v554_v3, %v554_v3  ;;  %v780_v7 = vadd.f32 %v779_v63, %v749_v62  ;;  %697 = vst [vmem:[%s1436_s23 + $0xc0] sm:$0xff] %v1483_v4 }
 0x110   : > { %v781_v9 = vadd.f32 %v780_v7, %v750_v6  ;;  %v1090_v11 = vpop.f32.mrb[10].mxu0  ;;  %v713_v12 = vadd.f32 %v1087_v0, %v712_v5  ;;  %v1488_v14 = vpop.f32.mrb[10].mxu1 }
 0x111   : > { %684 = vst [vmem:[%s1436_s23 + $0x58] sm:$0xff] %v1090_v11  ;;  %v564_v15 = vpop.f32.mrb[11].mxu0  ;;  %700 = vst [vmem:[%s1436_s23 + $0xd8] sm:$0xff] %v1488_v14  ;;  %v1493_v16 = vpop.f32.mrb[11].mxu1  ;;  %v753_v20 = vmul.f32 %v1090_v11, %v1090_v11 }
 0x112   : > { %683 = vst [vmem:[%s1436_s23 + $0x50] sm:$0xff] %v564_v15  ;;  %v714_v17 = vadd.f32 %v713_v12, %v564_v15  ;;  %v752_v18 = vmul.f32 %v564_v15, %v564_v15  ;;  %v782_v19 = vadd.f32 %v781_v9, %v751_v8  ;;  %699 = vst [vmem:[%s1436_s23 + $0xd0] sm:$0xff] %v1493_v16 }
 0x114   : > { %v783_v21 = vadd.f32 %v782_v19, %v752_v18  ;;  %v1093_v22 = vpop.f32.mrb[12].mxu0  ;;  %v715_v23 = vadd.f32 %v1090_v11, %v714_v17  ;;  %v1498_v24 = vpop.f32.mrb[12].mxu1 }
 0x115   : > { %686 = vst [vmem:[%s1436_s23 + $0x68] sm:$0xff] %v1093_v22  ;;  %v574_v25 = vpop.f32.mrb[13].mxu0  ;;  %702 = vst [vmem:[%s1436_s23 + $0xe8] sm:$0xff] %v1498_v24  ;;  %v654_v26 = vpop.f32.mrb[13].mxu1  ;;  %v755_v13 = vmul.f32 %v1093_v22, %v1093_v22 }
 0x116   : > { %685 = vst [vmem:[%s1436_s23 + $0x60] sm:$0xff] %v574_v25  ;;  %v716_v10 = vadd.f32 %v715_v23, %v574_v25  ;;  %v754_v27 = vmul.f32 %v574_v25, %v574_v25  ;;  %v784_v28 = vadd.f32 %v783_v21, %v753_v20  ;;  %701 = vst [vmem:[%s1436_s23 + $0xe0] sm:$0xff] %v654_v26 }
 0x117   : > { %v771_v21 = vmul.f32 %v1498_v24, %v1498_v24 }
 0x118   : > { %v785_v30 = vadd.f32 %v784_v28, %v754_v27  ;;  %v1096_v31 = vpop.f32.mrb[14].mxu0  ;;  %v717_v33 = vadd.f32 %v1093_v22, %v716_v10  ;;  %v1120_v34 = vpop.f32.mrb[14].mxu1 }
 0x119   : > { %688 = vst [vmem:[%s1436_s23 + $0x78] sm:$0xff] %v1096_v31  ;;  %v584_v35 = vpop.f32.mrb[15].mxu0  ;;  %704 = vst [vmem:[%s1436_s23 + $0xf8] sm:$0xff] %v1120_v34  ;;  %v664_v36 = vpop.f32.mrb[15].mxu1  ;;  %v757_v42 = vmul.f32 %v1096_v31, %v1096_v31 }
 0x11a   : > { %687 = vst [vmem:[%s1436_s23 + $0x70] sm:$0xff] %v584_v35  ;;  %v718_v38 = vadd.f32 %v717_v33, %v584_v35  ;;  %v756_v40 = vmul.f32 %v584_v35, %v584_v35  ;;  %v786_v41 = vadd.f32 %v785_v30, %v755_v13  ;;  %703 = vst [vmem:[%s1436_s23 + $0xf0] sm:$0xff] %v664_v36  ;;  %v1218_v35 = vmov 1966171168  }
 0x11b   : > { %v772_v23 = vmul.f32 %v664_v36, %v664_v36 }
 0x11c   : > { %v719_v43 = vadd.f32 %v1096_v31, %v718_v38  ;;  %v787_v44 = vadd.f32 %v786_v41, %v756_v40  ;;  %v815_v38 = vunpack.c.l.s4 %v1218_v35  ;;  %v817_v40 = vlaneseq }
 0x11e   : > { %v788_v47 = vadd.f32 %v787_v44, %v757_v42  ;;  %v720_v49 = vadd.f32 %v719_v43, %v1443_v32  ;;  %v762_v32 = vmul.f32 %v1463_v48, %v1463_v48  ;;  %v816_v44 = vunpack.c.0.s8 %v815_v38 }
 0x11f   : > { %vm831_vm0 = vcmp.lt.s32.totalorder %v817_v40, 256 }
 0x120   : > { %v789_v51 = vadd.f32 %v788_v47, %v758_v45  ;;  %v721_v52 = vadd.f32 %v1438_v29, %v720_v49  ;;  %v763_v29 = vmul.f32 %v1458_v46, %v1458_v46 }
 0x122   : > { %v722_v54 = vadd.f32 %v721_v52, %v1453_v39  ;;  %v790_v55 = vadd.f32 %v789_v51, %v759_v50  ;;  %v764_v39 = vmul.f32 %v1473_v58, %v1473_v58 }
 0x124   : > { %v791_v59 = vadd.f32 %v790_v55, %v760_v53  ;;  %v723_v60 = vadd.f32 %v1448_v37, %v722_v54  ;;  %v765_v37 = vmul.f32 %v1468_v56, %v1468_v56 }
 0x126   : > { %v724_v61 = vadd.f32 %v723_v60, %v1463_v48  ;;  %v792_v62 = vadd.f32 %v791_v59, %v761_v57  ;;  %v766_v48 = vmul.f32 %v1483_v4, %v1483_v4 }
 0x128   : > { %v793_v63 = vadd.f32 %v792_v62, %v762_v32  ;;  %v725_v0 = vadd.f32 %v1458_v46, %v724_v61  ;;  %v767_v46 = vmul.f32 %v1478_v2, %v1478_v2 }
 0x12a   : > { %v726_v1 = vadd.f32 %v725_v0, %v1473_v58  ;;  %v794_v3 = vadd.f32 %v793_v63, %v763_v29  ;;  %v768_v58 = vmul.f32 %v1493_v16, %v1493_v16 }
 0x12c   : > { %v795_v5 = vadd.f32 %v794_v3, %v764_v39  ;;  %v727_v6 = vadd.f32 %v1468_v56, %v726_v1  ;;  %v769_v56 = vmul.f32 %v1488_v14, %v1488_v14 }
 0x12e   : > { %v728_v7 = vadd.f32 %v727_v6, %v1483_v4  ;;  %v796_v8 = vadd.f32 %v795_v5, %v765_v37  ;;  %v770_v4 = vmul.f32 %v654_v26, %v654_v26 }
 0x130   : > { %v797_v9 = vadd.f32 %v796_v8, %v766_v48  ;;  %v729_v11 = vadd.f32 %v1478_v2, %v728_v7 }
 0x132   : > { %v730_v12 = vadd.f32 %v729_v11, %v1493_v16  ;;  %v798_v15 = vadd.f32 %v797_v9, %v767_v46  ;;  %v773_v16 = vmul.f32 %v1120_v34, %v1120_v34 }
 0x134   : > { %v799_v17 = vadd.f32 %v798_v15, %v768_v58  ;;  %v731_v18 = vadd.f32 %v1488_v14, %v730_v12 }
 0x136   : > { %v732_v19 = vadd.f32 %v731_v18, %v654_v26  ;;  %v800_v20 = vadd.f32 %v799_v17, %v769_v56 }
 0x138   : > { %v801_v22 = vadd.f32 %v800_v20, %v770_v4  ;;  %v733_v2 = vadd.f32 %v1498_v24, %v732_v19 }
 0x13a   : > { %v734_v25 = vadd.f32 %v733_v2, %v664_v36  ;;  %v802_v10 = vadd.f32 %v801_v22, %v771_v21  ;;  %v818_v36 = vshrl.u32 %v817_v40, 7 }
 0x13c   : > { %v735_v27 = vadd.f32 %v1120_v34, %v734_v25  ;;  %v803_v28 = vadd.f32 %v802_v10, %v772_v23  ;;  %v819_v49 = vsub.s32 %v816_v44, %v818_v36 }
 0x13e   : > { %v736_v13 = vrot.slane %v735_v27, 4  ;;  %v804_v30 = vadd.f32 %v803_v28, %v773_v16 }
 0x140   : > { %v737_v31 = vadd.f32 %v736_v13, %v735_v27  ;;  %v805_v33 = vrot.slane %v804_v30, 4 }
 0x142   : > { %v738_v14 = vrot.slane %v737_v31, 2  ;;  %v806_v26 = vadd.f32 %v805_v33, %v804_v30 }
 0x144   : > { %v739_v41 = vadd.f32 %v738_v14, %v737_v31  ;;  %v807_v42 = vrot.slane %v806_v26, 2 }
 0x146   : > { %v740_v43 = vrot.slane %v739_v41, 1  ;;  %v808_v24 = vadd.f32 %v807_v42, %v806_v26 }
 0x148   : > { %v809_v45 = vrot.slane %v808_v24, 1  ;;  %v741_v47 = vadd.f32 %v740_v43, %v739_v41 }
 0x14a   : > { %v810_v34 = vadd.f32 %v809_v45, %v808_v24 }
 0x14c   : > { %v813_v50 = vcombine.low %v741_v47, %v810_v34 }
 0x14e   : > { %v820_v51 = vrot.slane %v813_v50, %v819_v49 }
 0x150   : > { %v827_v52 = vrot.slane %v820_v51, %v819_v49 }
 0x152   : > { %833 = vst.msk [vmem:[%s289_s26] sm:$0x3] %vm831_vm0, %v827_v52 }
 0x153 PF: > { %s16_s20 = sadd.s32 1, %s1216_s20   ;;  %s1567_s18 = smov %s1212_s19 }
 0x154   : > { %p13_p5 = scmp.ge.s32.totalorder %s16_s20, 4   ;;  %s1568_s19 = smov %s1570_s21 }
 0x156   :  { %15 = sbr.rel (!%p13_p5) target bundleno = 2 (0x2), region = 78 }

// kernel: _lambda_.5
= control target key start
LH: loop header
LB: loop body
LE: loop exit
PB: predicated region body
PF: predicated region fallthrough
CT: control target
= control target key end

     0   :  { %s2798_s18 = smov 0   ;;  %s2800_s19 = smov 0   ;;  %s3864_s0 = inlined_call_operand.vmem [shape: f32[2,16,16,128], index: 0, kind: input, shape index: {}]   ;;  %s3865_s1 = inlined_call_operand.vmem [shape: f32[3,384,128], index: 1, kind: input, shape index: {}]   ;;  %s3866_s2 = inlined_call_operand.vmem [shape: f32[1,128], index: 2, kind: input, shape index: {}]   ;;  %s3867_s3 = inlined_call_operand.vmem [shape: f32[1,128], index: 3, kind: input, shape index: {}]   ;;  %s3868_s4 = inlined_call_operand.vmem [shape: f32[2,16,16,128], index: 4, kind: output, shape index: {0}]   ;;  %s3869_s5 = inlined_call_operand.vmem [shape: f32[2,2,1,256], index: 5, kind: output, shape index: {1}]  }
   0x1   :  { %s2802_s20 = smov 0   ;;  %s2804_s21 = smov 0  }
   0x2   :  { %s2806_s22 = smov 0  }
   0x3 LB: > { %s25_s23 = sadd.s32 1, %s2756_s20  ;;  %s28_s24 = sadd.s32 1, %s2760_s21  ;;  %s2764_s22 = sphi %s2806_s22, %s16_s22   ;;  %s2760_s21 = sphi %s2804_s21, %s3879_s21   ;;  %s2756_s20 = sphi %s2802_s20, %s3878_s20   ;;  %s2752_s19 = sphi %s2800_s19, %s3877_s19   ;;  %s2748_s18 = sphi %s2798_s18, %s3876_s18  }
   0x4   : > { %p26_p0 = scmp.ge.s32.totalorder %s25_s23, 2  ;;  %p1768_p1 = scmp.ge.s32.totalorder %s2764_s22, 1 }
   0x5   : > { %p206_p2 = scmp.lt.s32.totalorder %s2764_s22, 5 }
   0x6   : > { %s3881_s23 = smov (%p26_p0, %s25_s23), 0  ;;  %s3883_s24 = smov (!%p26_p0, %s28_s24), %s2760_s21 }
   0x7   : > { %p207_p3 = pnand %p1768_p1, %p206_p2  ;;  %p30_p4 = scmp.ge.s32.totalorder %s3883_s24, 2 }
   0x8   : > { %v1800_v0 = vld [vmem:[%s3865_s1 + $0x200] sm:$0xff] (!%p207_p3)  ;;  %v1801_v1 = vld [vmem:[%s3865_s1 + $0x208] sm:$0xff] (!%p207_p3)  ;;  %p247_p5 = scmp.lt.s32.totalorder (!%p207_p3), %s2752_s19, 1  ;;  %v2766_v7 = vmov (!%p207_p3), 0.0   ;;  %v1802_v10 = vld [vmem:[%s3865_s1 + $0x210] sm:$0xff] (!%p207_p3)  ;;  %s1883_s27 = sshll.u32 (!%p207_p3), %s2748_s18, 7 }
   0x9   : > { %s3885_s24 = smov (%p30_p4, %s3883_s24), 0  ;;  %210 = sbr.rel (%p207_p3) target bundleno = 441 (0x1b9), region = 36 }
   0xa   : > { %v1816_v2 = vld [vmem:[%s3865_s1 + $0x280] sm:$0xff] (!%p207_p3)  ;;  %v2388_v3 = vpack.c.bf16 (!%p207_p3), %v1801_v1, %v1800_v0  ;;  %v1817_v4 = vld [vmem:[%s3865_s1 + $0x288] sm:$0xff] (!%p207_p3)  ;;  %275 = vst [vmem:[#allocation2 + $0x27] sm:$0x1] (!%p207_p3), %v2766_v7  ;;  %274 = vst [vmem:[#allocation2 + $0x7] sm:$0x1] (!%p207_p3), %v2766_v7 }
   0xb   : > { %v1784_v5 = vld [vmem:[%s3865_s1 + $0x180] sm:$0xff] (!%p207_p3)  ;;  %v1785_v6 = vld [vmem:[%s3865_s1 + $0x188] sm:$0xff] (!%p207_p3)  ;;  %276 = vst [vmem:[#allocation2 + $0x47] sm:$0x1] (!%p207_p3), %v2766_v7  ;;  %277 = vst [vmem:[#allocation2 + $0x67] sm:$0x1] (!%p207_p3), %v2766_v7  ;;  %v2420_v8 = vpack.c.bf16 (!%p207_p3), %v1817_v4, %v1816_v2 }
   0xc   : > { %278 = vst [vmem:[#allocation2 + $0x87] sm:$0x1] (!%p207_p3), %v2766_v7  ;;  %279 = vst [vmem:[#allocation2 + $0xa7] sm:$0x1] (!%p207_p3), %v2766_v7  ;;  %v2390_v9 = vpack.c.bf16 (!%p207_p3), %v1785_v6, %v1784_v5  ;;  %v1803_v11 = vld [vmem:[%s3865_s1 + $0x218] sm:$0xff] (!%p207_p3)  ;;  %v1818_v12 = vld [vmem:[%s3865_s1 + $0x290] sm:$0xff] (!%p207_p3)  ;;  %2389 = vmatprep.subr.bf16.mxu0 (!%p207_p3), %v2388_v3 }
   0xd   : > { %280 = vst [vmem:[#allocation2 + $0xc7] sm:$0x1] (!%p207_p3), %v2766_v7  ;;  %281 = vst [vmem:[#allocation2 + $0xe7] sm:$0x1] (!%p207_p3), %v2766_v7  ;;  %v2392_v13 = vpack.c.bf16 (!%p207_p3), %v1803_v11, %v1802_v10  ;;  %v1819_v14 = vld [vmem:[%s3865_s1 + $0x298] sm:$0xff] (!%p207_p3)  ;;  %v1786_v15 = vld [vmem:[%s3865_s1 + $0x190] sm:$0xff] (!%p207_p3)  ;;  %2421 = vmatprep.subr.bf16.mxu1 (!%p207_p3), %v2420_v8 }
   0xe   : > { %282 = vst [vmem:[#allocation2 + $0x107] sm:$0x1] (!%p207_p3), %v2766_v7  ;;  %283 = vst [vmem:[#allocation2 + $0x127] sm:$0x1] (!%p207_p3), %v2766_v7  ;;  %v1787_v16 = vld [vmem:[%s3865_s1 + $0x198] sm:$0xff] (!%p207_p3)  ;;  %2391 = vmatpush3.bf16.msra.mxu0 (!%p207_p3), %v2390_v9  ;;  %v2424_v17 = vpack.c.bf16 (!%p207_p3), %v1819_v14, %v1818_v12  ;;  %v1804_v19 = vld [vmem:[%s3865_s1 + $0x220] sm:$0xff] (!%p207_p3)  ;;  %2423 = vmatpush3.bf16.msra.mxu1 (!%p207_p3), %v2420_v8 }
   0xf   : > { %284 = vst [vmem:[#allocation2 + $0x18] sm:$0x1] (!%p207_p3), %v2766_v7  ;;  %285 = vst [vmem:[#allocation2 + $0x38] sm:$0x1] (!%p207_p3), %v2766_v7  ;;  %v2394_v18 = vpack.c.bf16 (!%p207_p3), %v1787_v16, %v1786_v15  ;;  %v1805_v20 = vld [vmem:[%s3865_s1 + $0x228] sm:$0xff] (!%p207_p3)  ;;  %v1820_v21 = vld [vmem:[%s3865_s1 + $0x2a0] sm:$0xff] (!%p207_p3)  ;;  %2393 = vmatprep.subr.bf16.mxu0 (!%p207_p3), %v2392_v13 }
  0x10   : > { %286 = vst [vmem:[#allocation2 + $0x58] sm:$0x1] %v2766_v7  ;;  %287 = vst [vmem:[#allocation2 + $0x78] sm:$0x1] %v2766_v7  ;;  %s3887_s19 = smov (!%p247_p5, %s2752_s19), 1  ;;  %v2396_v22 = vpack.c.bf16 %v1805_v20, %v1804_v19  ;;  %v1821_v23 = vld [vmem:[%s3865_s1 + $0x2a8] sm:$0xff]  ;;  %2425 = vmatprep.subr.bf16.mxu1 %v2424_v17 }
  0x11   : > { %288 = vst [vmem:[#allocation2 + $0x98] sm:$0x1] %v2766_v7  ;;  %289 = vst [vmem:[#allocation2 + $0xb8] sm:$0x1] %v2766_v7  ;;  %v1788_v24 = vld [vmem:[%s3865_s1 + $0x1a0] sm:$0xff]  ;;  %v1789_v25 = vld [vmem:[%s3865_s1 + $0x1a8] sm:$0xff]  ;;  %v2428_v26 = vpack.c.bf16 %v1821_v23, %v1820_v21 }
  0x12   : > { %290 = vst [vmem:[#allocation2 + $0xd8] sm:$0x1] %v2766_v7  ;;  %291 = vst [vmem:[#allocation2 + $0xf8] sm:$0x1] %v2766_v7  ;;  %v1806_v27 = vld [vmem:[%s3865_s1 + $0x230] sm:$0xff]  ;;  %v1807_v28 = vld [vmem:[%s3865_s1 + $0x238] sm:$0xff]  ;;  %2395 = vmatpush3.bf16.msra.mxu0 %v2394_v18  ;;  %v2398_v31 = vpack.c.bf16 %v1789_v25, %v1788_v24  ;;  %2427 = vmatpush3.bf16.msra.mxu1 %v2424_v17 }
  0x13   : > { %292 = vst [vmem:[#allocation2 + $0x118] sm:$0x1] %v2766_v7  ;;  %293 = vst [vmem:[#allocation2 + $0x138] sm:$0x1] %v2766_v7  ;;  %v1822_v29 = vld [vmem:[%s3865_s1 + $0x2b0] sm:$0xff]  ;;  %v1823_v30 = vld [vmem:[%s3865_s1 + $0x2b8] sm:$0xff]  ;;  %2397 = vmatprep.subr.bf16.mxu0 %v2396_v22  ;;  %v2400_v32 = vpack.c.bf16 %v1807_v28, %v1806_v27  ;;  %2429 = vmatprep.subr.bf16.mxu1 %v2428_v26 }
  0x14   : > { %s1882_s8 = sshll.u32 %s3887_s19, 8  ;;  %v1790_v33 = vld [vmem:[%s3865_s1 + $0x1b0] sm:$0xff]  ;;  %v1791_v34 = vld [vmem:[%s3865_s1 + $0x1b8] sm:$0xff]  ;;  %v2432_v35 = vpack.c.bf16 %v1823_v30, %v1822_v29  ;;  %v1808_v36 = vld [vmem:[%s3865_s1 + $0x240] sm:$0xff]  ;;  %s3019_s16 = sshll.u32 %s2748_s18, 3 }
  0x15   : > { %v1809_v37 = vld [vmem:[%s3865_s1 + $0x248] sm:$0xff]  ;;  %s2920_s26 = scalar_lea.vmem %s3864_s0, %s1882_s8  ;;  %v1824_v38 = vld [vmem:[%s3865_s1 + $0x2c0] sm:$0xff]  ;;  %v2402_v40 = vpack.c.bf16 %v1791_v34, %v1790_v33  ;;  %v1810_v45 = vld [vmem:[%s3865_s1 + $0x250] sm:$0xff]  ;;  %s1778_s10 = sadd.s32 4294967295, %s3019_s16 }
  0x16   : > { %v1825_v39 = vld [vmem:[%s3865_s1 + $0x2c8] sm:$0xff]  ;;  %2399 = vmatpush3.bf16.msra.mxu0 %v2398_v31  ;;  %2431 = vmatpush3.bf16.msra.mxu1 %v2428_v26  ;;  %v2404_v41 = vpack.c.bf16 %v1809_v37, %v1808_v36  ;;  %v1792_v42 = vld [vmem:[%s3865_s1 + $0x1c0] sm:$0xff]  ;;  %s2936_s11 = scalar_lea.vmem %s2920_s26, %s1883_s27  ;;  %v1811_v46 = vld [vmem:[%s3865_s1 + $0x258] sm:$0xff]  ;;  %p3076_p6 = scmp.gt.s32.totalorder %s1778_s10, 0 }
  0x17   : > { %2401 = vmatprep.subr.bf16.mxu0 %v2400_v32  ;;  %v1793_v43 = vld [vmem:[%s3865_s1 + $0x1c8] sm:$0xff]  ;;  %2433 = vmatprep.subr.bf16.mxu1 %v2432_v35  ;;  %v2436_v44 = vpack.c.bf16 %v1825_v39, %v1824_v38  ;;  %v1826_v47 = vld [vmem:[%s3865_s1 + $0x2d0] sm:$0xff]  ;;  %v1827_v48 = vld [vmem:[%s3865_s1 + $0x2d8] sm:$0xff]  ;;  %v2408_v53 = vpack.c.bf16 %v1811_v46, %v1810_v45  ;;  %p332_p7 = scmp.eq.s32.totalorder %s2748_s18, 0  ;;  %s319_s13 = sadd.s32 8, %s3019_s16 }
  0x18   : > { %v2406_v49 = vpack.c.bf16 %v1793_v43, %v1792_v42  ;;  %v2953_v50 = vld [vmem:[%s3866_s2] ss:$0 sm:$0xff]  ;;  %v1794_v54 = vld [vmem:[%s3865_s1 + $0x1d0] sm:$0xff]  ;;  %v1795_v55 = vld [vmem:[%s3865_s1 + $0x1d8] sm:$0xff]  ;;  %v2440_v58 = vpack.c.bf16 %v1827_v48, %v1826_v47  ;;  %s3889_s10 = smov (!%p3076_p6, %s1778_s10), 0  ;;  %p3366_p8 = scmp.lt.s32.totalorder %s319_s13, 15 }
  0x19   : > { %v2958_v51 = vld [vmem:[%s3867_s3] ss:$0 sm:$0xff]  ;;  %v352_v57 = vld [vmem:[%s2936_s11 + $0x8] sm:$0xff]  ;;  %v2410_v1 = vpack.c.bf16 %v1795_v55, %v1794_v54  ;;  %v353_v4 = vld [vmem:[%s2936_s11 + $0x10] sm:$0xff]  ;;  %s1779_s9 = sshll.u32 %s3889_s10, 4  ;;  %p338_p9 = scmp.eq.s32.totalorder %s2748_s18, 1 }
  0x1a   : > { %2403 = vmatpush3.bf16.msra.mxu0 %v2402_v40  ;;  %v351_v52 = vld [vmem:[%s2936_s11] sm:$0xff]  ;;  %2435 = vmatpush3.bf16.msra.mxu1 %v2432_v35  ;;  %v1813_v60 = vld [vmem:[%s3865_s1 + $0x268] sm:$0xff]  ;;  %v368_v61 = vmul.f32 %v2953_v50, %v352_v57  ;;  %v354_v5 = vld [vmem:[%s2936_s11 + $0x18] sm:$0xff]  ;;  %v369_v11 = vmul.f32 %v2953_v50, %v353_v4  ;;  %s3229_s8 = scalar_lea.vmem %s2920_s26, %s1779_s9  ;;  %s3891_s13 = smov (!%p3366_p8, %s319_s13), 15 }
  0x1b   : > { %2405 = vmatprep.subr.bf16.mxu0 %v2404_v41  ;;  %v367_v56 = vmul.f32 %v2953_v50, %v351_v52  ;;  %2437 = vmatprep.subr.bf16.mxu1 %v2436_v44  ;;  %v1812_v59 = vld [vmem:[%s3865_s1 + $0x260] sm:$0xff]  ;;  %v1829_v63 = vld [vmem:[%s3865_s1 + $0x2e8] sm:$0xff]  ;;  %v1814_v8 = vld [vmem:[%s3865_s1 + $0x270] sm:$0xff]  ;;  %v370_v12 = vmul.f32 %v2953_v50, %v354_v5  ;;  %s3238_s12 = scalar_select %p332_p7, 1, 0 }
  0x1c   : > { %v1828_v62 = vld [vmem:[%s3865_s1 + $0x2e0] sm:$0xff]  ;;  %v384_v3 = vadd.f32 %v2958_v51, %v368_v61  ;;  %v2412_v6 = vpack.c.bf16 %v1813_v60, %v1812_v59  ;;  %v1797_v7 = vld [vmem:[%s3865_s1 + $0x1e8] sm:$0xff]  ;;  %v1815_v9 = vld [vmem:[%s3865_s1 + $0x278] sm:$0xff]  ;;  %v385_v19 = vadd.f32 %v2958_v51, %v369_v11  ;;  %s1782_s9 = sshll.u32 %s3891_s13, 4  ;;  %p255_p10 = scmp.lt.s32.totalorder %s3019_s16, 15 }
  0x1d   : > { %v383_v0 = vadd.f32 %v2958_v51, %v367_v56  ;;  %v1796_v2 = vld [vmem:[%s3865_s1 + $0x1e0] sm:$0xff]  ;;  %v2444_v13 = vpack.c.bf16 %v1829_v63, %v1828_v62  ;;  %v356_v16 = vld [vmem:[%s2936_s11 + $0x28] sm:$0xff]  ;;  %v1830_v17 = vld [vmem:[%s3865_s1 + $0x2f0] sm:$0xff]  ;;  %v386_v20 = vadd.f32 %v2958_v51, %v370_v12  ;;  %v2416_v24 = vpack.c.bf16 %v1815_v9, %v1814_v8  ;;  %s323_s13 = scalar_lea.vmem %s2920_s26, %s1782_s9  ;;  %p265_p11 = scmp.lt.s32.totalorder %s2748_s18, 1 }
  0x1e   : > { %2407 = vmatpush3.bf16.msra.mxu0 %v2406_v49  ;;  %2439 = vmatpush3.bf16.msra.mxu1 %v2436_v44  ;;  %v3002_v14 = vmax.f32 %v384_v3, 0.0  ;;  %v355_v15 = vld [vmem:[%s2936_s11 + $0x20] sm:$0xff]  ;;  %v1831_v18 = vld [vmem:[%s3865_s1 + $0x2f8] sm:$0xff]  ;;  %v372_v22 = vmul.f32 %v2953_v50, %v356_v16  ;;  %v2414_v23 = vpack.c.bf16 %v1797_v7, %v1796_v2  ;;  %v1798_v25 = vld [vmem:[%s3865_s1 + $0x1f0] sm:$0xff]  ;;  %v3028_v27 = vmax.f32 %v385_v19, 0.0  ;;  %s3893_s16 = smov (!%p255_p10, %s3019_s16), 15 }
  0x1f   : > { %2409 = vmatprep.subr.bf16.mxu0 %v2408_v53  ;;  %v2998_v10 = vmax.f32 %v383_v0, 0.0  ;;  %2441 = vmatprep.subr.bf16.mxu1 %v2440_v58  ;;  %v371_v21 = vmul.f32 %v2953_v50, %v355_v15  ;;  %v1799_v26 = vld [vmem:[%s3865_s1 + $0x1f8] sm:$0xff]  ;;  %v3030_v28 = vmax.f32 %v386_v20, 0.0  ;;  %v357_v31 = vld [vmem:[%s2936_s11 + $0x30] sm:$0xff]  ;;  %v2448_v33 = vpack.c.bf16 %v1831_v18, %v1830_v17  ;;  %v508_v34 = vld [vmem:[%s3865_s1 + $0x80] sm:$0xff]  ;;  %s1772_s27 = sshll.u32 %s3893_s16, 1 }
  0x20   : > { %417 = vst [vmem:[#allocation2 + $0x30] sm:$0xff] %v3002_v14  ;;  %v388_v30 = vadd.f32 %v2958_v51, %v372_v22  ;;  %v358_v32 = vld [vmem:[%s2936_s11 + $0x38] sm:$0xff]  ;;  %v1848_v35 = vld [vmem:[%s3865_s1 + $0x380] sm:$0xff]  ;;  %v1849_v36 = vld [vmem:[%s3865_s1 + $0x388] sm:$0xff]  ;;  %v373_v37 = vmul.f32 %v2953_v50, %v357_v31  ;;  %v2418_v44 = vpack.c.bf16 %v1799_v26, %v1798_v25  ;;  %s339_s28 = scalar_select %p338_p9, 1, 0 }
  0x21   : > { %416 = vst [vmem:[#allocation2 + $0x28] sm:$0xff] %v2998_v10  ;;  %653 = vmatprep.mubr.f32.mxu0 %v2998_v10  ;;  %v387_v29 = vadd.f32 %v2958_v51, %v371_v21  ;;  %v374_v38 = vmul.f32 %v2953_v50, %v358_v32  ;;  %v509_v39 = vld [vmem:[%s3865_s1 + $0x88] sm:$0xff]  ;;  %418 = vst [vmem:[#allocation2 + $0x48] sm:$0xff] %v3028_v27  ;;  %v359_v42 = vld [vmem:[%s2936_s11 + $0x40] sm:$0xff]  ;;  %v2516_v48 = vpack.c.bf16 %v1849_v36, %v1848_v35  ;;  %s3895_s18 = smov (!%p265_p11, %s2748_s18), 1 }
  0x22   : > { %2411 = vmatpush3.bf16.msra.mxu0 %v2410_v1  ;;  %2443 = vmatpush3.bf16.msra.mxu1 %v2440_v58  ;;  %419 = vst [vmem:[#allocation2 + $0x50] sm:$0xff] %v3030_v28  ;;  %v3055_v41 = vmax.f32 %v388_v30, 0.0  ;;  %v360_v43 = vld [vmem:[%s2936_s11 + $0x48] sm:$0xff]  ;;  %v389_v45 = vadd.f32 %v2958_v51, %v373_v37  ;;  %v375_v47 = vmul.f32 %v2953_v50, %v359_v42  ;;  %v492_v49 = vld [vmem:[%s3865_s1] sm:$0xff]  ;;  %v510_v57 = vld [vmem:[%s3865_s1 + $0x90] sm:$0xff]  ;;  %s1775_s16 = sshll.u32 %s3895_s18, 1 }
  0x23   : > { %2413 = vmatprep.subr.bf16.mxu0 %v2412_v6  ;;  %2445 = vmatprep.subr.bf16.mxu1 %v2444_v13  ;;  %v3053_v40 = vmax.f32 %v387_v29, 0.0  ;;  %v390_v46 = vadd.f32 %v2958_v51, %v374_v38  ;;  %v1832_v52 = vld [vmem:[%s3865_s1 + $0x300] sm:$0xff]  ;;  %v1833_v53 = vld [vmem:[%s3865_s1 + $0x308] sm:$0xff]  ;;  %v376_v54 = vmul.f32 %v2953_v50, %v360_v43  ;;  %v2452_v55 = vpack.c.bf16 %v509_v39, %v508_v34  ;;  %v511_v58 = vld [vmem:[%s3865_s1 + $0x98] sm:$0xff] }
  0x24   : > { %421 = vst [vmem:[#allocation2 + $0x70] sm:$0xff] %v3055_v41  ;;  %v493_v56 = vld [vmem:[%s3865_s1 + $0x8] sm:$0xff]  ;;  %v3089_v59 = vmax.f32 %v389_v45, 0.0  ;;  %v391_v61 = vadd.f32 %v2958_v51, %v375_v47  ;;  %v3099_v63 = vld [vmem:[%s3865_s1 + $0x390] sm:$0xff]  ;;  %v3104_v0 = vld [vmem:[%s3865_s1 + $0x398] sm:$0xff]  ;;  %v2518_v3 = vpack.c.bf16 %v1833_v53, %v1832_v52  ;;  %v2456_v17 = vpack.c.bf16 %v511_v58, %v510_v57 }
  0x25   : > { %420 = vst [vmem:[#allocation2 + $0x68] sm:$0xff] %v3053_v40  ;;  %v3091_v60 = vmax.f32 %v390_v46, 0.0  ;;  %v392_v1 = vadd.f32 %v2958_v51, %v376_v54  ;;  %v3113_v4 = vld [vmem:[%s3865_s1 + $0x10] sm:$0xff]  ;;  %v362_v7 = vld [vmem:[%s2936_s11 + $0x58] sm:$0xff]  ;;  %v2454_v9 = vpack.c.bf16 %v493_v56, %v492_v49  ;;  %v3129_v12 = vld [vmem:[%s3865_s1 + $0xa0] sm:$0xff]  ;;  %v2520_v22 = vpack.c.bf16 %v3104_v0, %v3099_v63 }
  0x26   : > { %2415 = vmatpush3.bf16.msra.mxu0 %v2414_v23  ;;  %2447 = vmatpush3.bf16.msra.mxu1 %v2444_v13  ;;  %422 = vst [vmem:[#allocation2 + $0x88] sm:$0xff] %v3089_v59  ;;  %v3117_v5 = vmax.f32 %v391_v61, 0.0  ;;  %v361_v6 = vld [vmem:[%s2936_s11 + $0x50] sm:$0xff]  ;;  %v495_v11 = vld [vmem:[%s3865_s1 + $0x18] sm:$0xff]  ;;  %v378_v16 = vmul.f32 %v2953_v50, %v362_v7  ;;  %v513_v18 = vld [vmem:[%s3865_s1 + $0xa8] sm:$0xff] }
  0x27   : > { %2417 = vmatprep.subr.bf16.mxu0 %v2416_v24  ;;  %2449 = vmatprep.subr.bf16.mxu1 %v2448_v33  ;;  %423 = vst [vmem:[#allocation2 + $0x90] sm:$0xff] %v3091_v60  ;;  %v3121_v8 = vld [vmem:[#allocation2 + $0x31] sm:$0xff]  ;;  %v3131_v13 = vmax.f32 %v392_v1, 0.0  ;;  %v377_v15 = vmul.f32 %v2953_v50, %v361_v6  ;;  %v363_v25 = vld [vmem:[%s2936_s11 + $0x60] sm:$0xff]  ;;  %v364_v26 = vld [vmem:[%s2936_s11 + $0x68] sm:$0xff]  ;;  %v2458_v35 = vpack.c.bf16 %v495_v11, %v3113_v4 }
  0x28   : > { %v3094_v62 = vld [vmem:[#allocation2 + $0x29] sm:$0xff]  ;;  %v1835_v20 = vld [vmem:[%s3865_s1 + $0x318] sm:$0xff]  ;;  %424 = vst [vmem:[#allocation2 + $0xa8] sm:$0xff] %v3117_v5  ;;  %v394_v24 = vadd.f32 %v2958_v51, %v378_v16  ;;  %v1852_v30 = vld [vmem:[%s3865_s1 + $0x3a0] sm:$0xff]  ;;  %v379_v32 = vmul.f32 %v2953_v50, %v363_v25  ;;  %v2460_v36 = vpack.c.bf16 %v513_v18, %v3129_v12 }
  0x29   : > { %2252 = vmatprep.mubr.f32.mxu1 %v3094_v62  ;;  %v3108_v2 = vld [vmem:[#allocation2 + $0x27] sm:$0xff]  ;;  %v1834_v19 = vld [vmem:[%s3865_s1 + $0x310] sm:$0xff]  ;;  %425 = vst [vmem:[#allocation2 + $0xb0] sm:$0xff] %v3131_v13  ;;  %v393_v23 = vadd.f32 %v2958_v51, %v377_v15  ;;  %v515_v46 = vld [vmem:[%s3865_s1 + $0xb8] sm:$0xff] }
  0x2a   : > { %2419 = vmatpush3.bf16.msra.mxu0 %v2418_v44  ;;  %2451 = vmatpush3.bf16.msra.mxu1 %v2448_v33  ;;  %v3152_v21 = vld [vmem:[#allocation2 + $0x49] sm:$0xff]  ;;  %v380_v33 = vmul.f32 %v2953_v50, %v364_v26  ;;  %v3174_v34 = vld [vmem:[#allocation2 + $0x51] sm:$0xff]  ;;  %v496_v37 = vld [vmem:[%s3865_s1 + $0x20] sm:$0xff]  ;;  %v3186_v42 = vmax.f32 %v394_v24, 0.0  ;;  %v2522_v44 = vpack.c.bf16 %v1835_v20, %v1834_v19  ;;  %v395_v47 = vadd.f32 %v2958_v51, %v379_v32 }
  0x2b   : > { %2517 = vmatprep.subr.bf16.mxu0 %v2516_v48  ;;  %2453 = vmatprep.subr.bf16.mxu1 %v2452_v55  ;;  %v3162_v29 = vld [vmem:[#allocation2 + $0x2f] sm:$0xff]  ;;  %v3184_v39 = vmax.f32 %v393_v23, 0.0  ;;  %v1836_v52 = vld [vmem:[%s3865_s1 + $0x320] sm:$0xff]  ;;  %v1855_v61 = vld [vmem:[%s3865_s1 + $0x3b8] sm:$0xff] }
  0x2c   : > { %v1853_v31 = vld [vmem:[%s3865_s1 + $0x3a8] sm:$0xff]  ;;  %v514_v45 = vld [vmem:[%s3865_s1 + $0xb0] sm:$0xff]  ;;  %v396_v48 = vadd.f32 %v2958_v51, %v380_v33  ;;  %427 = vst [vmem:[#allocation2 + $0xd0] sm:$0xff] %v3186_v42  ;;  %v3218_v56 = vmax.f32 %v395_v47, 0.0  ;;  %v366_v4 = vld [vmem:[%s2936_s11 + $0x78] sm:$0xff] }
  0x2d   : > { %654 = vmatmul.mubr.f32.vlgmr.msra.gmra.mrb[0].mxu0 %v3108_v2  ;;  %2253 = vmatmul.mubr.f32.vlgmr.msra.gmra.mrb[0].mxu1 %v3121_v8  ;;  %v497_v38 = vld [vmem:[%s3865_s1 + $0x28] sm:$0xff]  ;;  %v2524_v49 = vpack.c.bf16 %v1853_v31, %v1852_v30  ;;  %426 = vst [vmem:[#allocation2 + $0xc8] sm:$0xff] %v3184_v39  ;;  %v3216_v55 = vld [vmem:[%s3865_s1 + $0x30] sm:$0xff]  ;;  %v2464_v1 = vpack.c.bf16 %v515_v46, %v514_v45  ;;  %v499_v7 = vld [vmem:[%s3865_s1 + $0x38] sm:$0xff] }
  0x2e   : > { %2519 = vmatpush3.bf16.msra.mxu0 %v2518_v3  ;;  %2455 = vmatpush3.bf16.msra.mxu1 %v2454_v9  ;;  %v3190_v43 = vld [vmem:[#allocation2 + $0x69] sm:$0xff]  ;;  %v3220_v57 = vmax.f32 %v396_v48, 0.0  ;;  %v3232_v63 = vld [vmem:[#allocation2 + $0x71] sm:$0xff]  ;;  %v2462_v0 = vpack.c.bf16 %v497_v38, %v496_v37  ;;  %v516_v9 = vld [vmem:[%s3865_s1 + $0xc0] sm:$0xff]  ;;  %428 = vst [vmem:[#allocation2 + $0xe8] sm:$0xff] %v3218_v56  ;;  %v382_v15 = vmul.f32 %v2953_v50, %v366_v4 }
  0x2f   : > { %658 = vmatprep.mubr.f32.mxu0 %v3002_v14  ;;  %2255 = vmatprep.mubr.f32.mxu1 %v3152_v21  ;;  %v1837_v53 = vld [vmem:[%s3865_s1 + $0x328] sm:$0xff]  ;;  %v1854_v58 = vld [vmem:[%s3865_s1 + $0x3b0] sm:$0xff]  ;;  %v1839_v19 = vld [vmem:[%s3865_s1 + $0x338] sm:$0xff]  ;;  %v2466_v31 = vpack.c.bf16 %v499_v7, %v3216_v55 }
  0x30   : > { %2457 = vmatprep.subr.bf16.mxu1 %v2456_v17  ;;  %2521 = vmatprep.subr.bf16.mxu0 %v2520_v22  ;;  %v3211_v54 = vld [vmem:[#allocation2 + $0x47] sm:$0xff]  ;;  %v365_v3 = vld [vmem:[%s2936_s11 + $0x70] sm:$0xff]  ;;  %v2526_v11 = vpack.c.bf16 %v1837_v53, %v1836_v52  ;;  %429 = vst [vmem:[#allocation2 + $0xf0] sm:$0xff] %v3220_v57  ;;  %v2528_v17 = vpack.c.bf16 %v1855_v61, %v1854_v58  ;;  %v1859_v4 = vld [vmem:[%s3865_s1 + $0x3d8] sm:$0xff]  ;;  %s1776_s11 = sshll.u32 %s3887_s19, 2 }
  0x31   : > { %659 = vmatmul.mubr.f32.gmra.mrb[2].mxu0 %v3162_v29  ;;  %2256 = vmatmul.mubr.f32.gmra.mrb[2].mxu1 %v3174_v34  ;;  %v3240_v6 = vld [vmem:[#allocation2 + $0x89] sm:$0xff]  ;;  %v381_v12 = vmul.f32 %v2953_v50, %v365_v3  ;;  %v3269_v22 = vld [vmem:[%s3865_s1 + $0x40] sm:$0xff]  ;;  %v398_v24 = vadd.f32 %v2958_v51, %v382_v15  ;;  %v3278_v30 = vld [vmem:[#allocation2 + $0x91] sm:$0xff]  ;;  %s269_s30 = sadd.s32 %s1776_s11, %s1775_s16 }
  0x32   : > { %663 = vmatprep.mubr.f32.mxu0 %v3028_v27  ;;  %2459 = vmatpush3.bf16.msra.mxu1 %v2458_v35  ;;  %v517_v16 = vld [vmem:[%s3865_s1 + $0xc8] sm:$0xff]  ;;  %v1838_v18 = vld [vmem:[%s3865_s1 + $0x330] sm:$0xff]  ;;  %v299_v25 = vld [vmem:[%s3229_s8] sm:$0xff]  ;;  %v334_v35 = vstv %s3238_s12  ;;  %s270_s12 = scalar_lea.vmem %s3869_s5, %s269_s30 }
  0x33   : > { %2258 = vmatprep.mubr.f32.mxu1 %v3190_v43  ;;  %2461 = vmatprep.subr.bf16.mxu1 %v2460_v36  ;;  %v3264_v20 = vld [vmem:[#allocation2 + $0x4f] sm:$0xff]  ;;  %v397_v23 = vadd.f32 %v2958_v51, %v381_v12  ;;  %v1856_v26 = vld [vmem:[%s3865_s1 + $0x3c0] sm:$0xff]  ;;  %v307_v33 = vmul.f32 %v2953_v50, %v299_v25  ;;  %v2468_v38 = vpack.c.bf16 %v517_v16, %v516_v9  ;;  %v3296_v47 = vmax.f32 %v398_v24, 0.0 }
  0x34   : > { %2523 = vmatpush3.bf16.msra.mxu0 %v2522_v44  ;;  %v501_v32 = vld [vmem:[%s3865_s1 + $0x48] sm:$0xff]  ;;  %v518_v44 = vld [vmem:[%s3865_s1 + $0xd0] sm:$0xff]  ;;  %v2530_v45 = vpack.c.bf16 %v1839_v19, %v1838_v18  ;;  %v1840_v55 = vld [vmem:[%s3865_s1 + $0x340] sm:$0xff]  ;;  %vm3319_vm0 = vcmp.eq.s32.totalorder %v334_v35, 1 }
  0x35   : > { %664 = vmatmul.mubr.f32.gmra.mrb[4].mxu0 %v3211_v54  ;;  %2525 = vmatprep.subr.bf16.mxu0 %v2524_v49  ;;  %v1857_v36 = vld [vmem:[%s3865_s1 + $0x3c8] sm:$0xff]  ;;  %v3294_v46 = vmax.f32 %v397_v23, 0.0  ;;  %v519_v49 = vld [vmem:[%s3865_s1 + $0xd8] sm:$0xff]  ;;  %v3304_v52 = vadd.f32 %v2958_v51, %v307_v33  ;;  %431 = vst [vmem:[#allocation2 + $0x110] sm:$0xff] %v3296_v47  ;;  %v1858_v3 = vld [vmem:[%s3865_s1 + $0x3d0] sm:$0xff]  ;;  %v2470_v9 = vpack.c.bf16 %v501_v32, %v3269_v22 }
  0x36   : > { %2259 = vmatmul.mubr.f32.gmra.mrb[4].mxu1 %v3232_v63  ;;  %668 = vmatprep.mubr.f32.mxu0 %v3030_v28  ;;  %v3289_v37 = vld [vmem:[#allocation2 + $0xa9] sm:$0xff]  ;;  %v2532_v53 = vpack.c.bf16 %v1857_v36, %v1856_v26  ;;  %v3331_v7 = vld [vmem:[#allocation2 + $0xb1] sm:$0xff]  ;;  %v520_v19 = vld [vmem:[%s3865_s1 + $0xe0] sm:$0xff]  ;;  %v2536_v26 = vpack.c.bf16 %v1859_v4, %v1858_v3 }
  0x37   : > { %2463 = vmatpush3.bf16.msra.mxu1 %v2462_v0  ;;  %2261 = vmatprep.mubr.f32.mxu1 %v3240_v6  ;;  %v300_v48 = vld [vmem:[%s3229_s8 + $0x8] sm:$0xff]  ;;  %430 = vst [vmem:[#allocation2 + $0x108] sm:$0xff] %v3294_v46  ;;  %v317_v12 = vmax.f32 %v3304_v52, 0.0  ;;  %v503_v18 = vld [vmem:[%s3865_s1 + $0x58] sm:$0xff]  ;;  %v1860_v35 = vld [vmem:[%s3865_s1 + $0x3e0] sm:$0xff]  ;;  %s1773_s8 = sshll.u32 %s3887_s19, 5 }
  0x38   : > { %2465 = vmatprep.subr.bf16.mxu1 %v2464_v1  ;;  %2527 = vmatpush3.bf16.msra.mxu0 %v2526_v11  ;;  %v1841_v58 = vld [vmem:[%s3865_s1 + $0x348] sm:$0xff]  ;;  %v308_v61 = vmul.f32 %v2953_v50, %v300_v48  ;;  %v502_v11 = vld [vmem:[%s3865_s1 + $0x50] sm:$0xff]  ;;  %v1843_v32 = vld [vmem:[%s3865_s1 + $0x358] sm:$0xff]  ;;  %s259_s6 = sadd.s32 %s1773_s8, %s1772_s27 }
  0x39   : > { %669 = vmatmul.mubr.f32.gmra.mrb[6].mxu0 %v3264_v20  ;;  %2529 = vmatprep.subr.bf16.mxu0 %v2528_v17  ;;  %v3315_v0 = vld [vmem:[#allocation2 + $0x67] sm:$0xff]  ;;  %v2472_v17 = vpack.c.bf16 %v519_v49, %v518_v44  ;;  %v2534_v22 = vpack.c.bf16 %v1841_v58, %v1840_v55  ;;  %v336_v24 = vsel %vm3319_vm0, 0.0, %v317_v12  ;;  %v3372_v33 = vld [vmem:[#allocation2 + $0x6f] sm:$0xff]  ;;  %v2474_v44 = vpack.c.bf16 %v503_v18, %v502_v11  ;;  %v523_v3 = vld [vmem:[%s3865_s1 + $0xf8] sm:$0xff]  ;;  %s1774_s7 = sshll.u32 %s259_s6, 3 }
  0x3a   : > { %2262 = vmatmul.mubr.f32.gmra.mrb[6].mxu1 %v3278_v30  ;;  %673 = vmatprep.mubr.f32.mxu0 %v3053_v40  ;;  %v3339_v15 = vadd.f32 %v2958_v51, %v308_v61  ;;  %v3341_v16 = vld [vmem:[#allocation2 + $0xc9] sm:$0xff]  ;;  %344 = vst [vmem:[#allocation2 + $0x8] sm:$0xff] %v336_v24  ;;  %vm2718_vm1 = vmneg %vm3319_vm0  ;;  %v531_v1 = vld [vmem:[%s3865_s1 + $0x138] sm:$0xff]  ;;  %s3812_s10 = scalar_lea.vmem %s3868_s4, %s1774_s7 }
  0x3b   : > { %2467 = vmatpush3.bf16.msra.mxu1 %v2466_v31  ;;  %2264 = vmatprep.mubr.f32.mxu1 %v3289_v37  ;;  %v521_v23 = vld [vmem:[%s3865_s1 + $0xe8] sm:$0xff]  ;;  %v1842_v31 = vld [vmem:[%s3865_s1 + $0x350] sm:$0xff] }
  0x3c   : > { %2469 = vmatprep.subr.bf16.mxu1 %v2468_v38  ;;  %2531 = vmatpush3.bf16.msra.mxu0 %v2530_v45  ;;  %v318_v25 = vmax.f32 %v3339_v15, 0.0  ;;  %v1861_v36 = vld [vmem:[%s3865_s1 + $0x3e8] sm:$0xff]  ;;  %v3381_v38 = vld [vmem:[#allocation2 + $0xd1] sm:$0xff]  ;;  %v504_v45 = vld [vmem:[%s3865_s1 + $0x60] sm:$0xff]  ;;  %v2538_v61 = vpack.c.bf16 %v1843_v32, %v1842_v31 }
  0x3d   : > { %674 = vmatmul.mubr.f32.gmra.mrb[8].mxu0 %v3315_v0  ;;  %2533 = vmatprep.subr.bf16.mxu0 %v2532_v53  ;;  %v3390_v49 = vld [vmem:[#allocation2 + $0xe9] sm:$0xff]  ;;  %v2476_v53 = vpack.c.bf16 %v521_v23, %v520_v19  ;;  %v2540_v4 = vpack.c.bf16 %v1861_v36, %v1860_v35  ;;  %v1863_v19 = vld [vmem:[%s3865_s1 + $0x3f8] sm:$0xff]  ;;  %v524_v35 = vld [vmem:[%s3865_s1 + $0x100] sm:$0xff] }
  0x3e   : > { %2265 = vmatmul.mubr.f32.gmra.mrb[8].mxu1 %v3331_v7  ;;  %678 = vmatprep.mubr.f32.mxu0 %v3055_v41  ;;  %v337_v48 = vsel %vm3319_vm0, 0.0, %v318_v25  ;;  %v505_v55 = vld [vmem:[%s3865_s1 + $0x68] sm:$0xff]  ;;  %v522_v58 = vld [vmem:[%s3865_s1 + $0xf0] sm:$0xff]  ;;  %v507_v32 = vld [vmem:[%s3865_s1 + $0x78] sm:$0xff] }
  0x3f   : > { %2471 = vmatpush3.bf16.msra.mxu1 %v2470_v9  ;;  %2267 = vmatprep.mubr.f32.mxu1 %v3341_v16  ;;  %345 = vst [vmem:[#allocation2 + $0x10] sm:$0xff] %v337_v48  ;;  %v1844_v9 = vld [vmem:[%s3865_s1 + $0x360] sm:$0xff]  ;;  %v1845_v11 = vld [vmem:[%s3865_s1 + $0x368] sm:$0xff]  ;;  %v1862_v18 = vld [vmem:[%s3865_s1 + $0x3f0] sm:$0xff]  ;;  %v2478_v23 = vpack.c.bf16 %v505_v55, %v504_v45  ;;  %v2480_v31 = vpack.c.bf16 %v523_v3, %v522_v58 }
  0x40   : > { %2473 = vmatprep.subr.bf16.mxu1 %v2472_v17  ;;  %2535 = vmatpush3.bf16.msra.mxu0 %v2534_v22  ;;  %v3416_v17 = vld [vmem:[#allocation2 + $0x87] sm:$0xff]  ;;  %v3425_v22 = vld [vmem:[#allocation2 + $0xf1] sm:$0xff]  ;;  %v2542_v36 = vpack.c.bf16 %v1845_v11, %v1844_v9  ;;  %v2544_v45 = vpack.c.bf16 %v1863_v19, %v1862_v18 }
  0x41   : > { %679 = vmatmul.mubr.f32.gmra.mrb[10].mxu0 %v3372_v33  ;;  %2537 = vmatprep.subr.bf16.mxu0 %v2536_v26  ;;  %v506_v24 = vld [vmem:[%s3865_s1 + $0x70] sm:$0xff]  ;;  %v1864_v58 = vld [vmem:[%s3865_s1 + $0x400] sm:$0xff]  ;;  %v527_v19 = vld [vmem:[%s3865_s1 + $0x118] sm:$0xff] }
  0x42   : > { %2268 = vmatmul.mubr.f32.gmra.mrb[10].mxu1 %v3381_v38  ;;  %683 = vmatprep.mubr.f32.mxu0 %v3089_v59  ;;  %v3430_v26 = vld [vmem:[#allocation2 + $0x109] sm:$0xff]  ;;  %v3461_v3 = vld [vmem:[#allocation2 + $0x111] sm:$0xff] }
  0x43   : > { %2475 = vmatpush3.bf16.msra.mxu1 %v2474_v44  ;;  %2270 = vmatprep.mubr.f32.mxu1 %v3390_v49  ;;  %v525_v44 = vld [vmem:[%s3865_s1 + $0x108] sm:$0xff]  ;;  %v1846_v48 = vld [vmem:[%s3865_s1 + $0x370] sm:$0xff] }
  0x44   : > { %2477 = vmatprep.subr.bf16.mxu1 %v2476_v53  ;;  %2539 = vmatpush3.bf16.msra.mxu0 %v2538_v61  ;;  %v1847_v53 = vld [vmem:[%s3865_s1 + $0x378] sm:$0xff]  ;;  %v3452_v55 = vld [vmem:[#allocation2 + $0x8f] sm:$0xff]  ;;  %v2484_v9 = vpack.c.bf16 %v525_v44, %v524_v35  ;;  %v324_v35 = vld [vmem:[%s323_s13] sm:$0xff] }
  0x45   : > { %684 = vmatmul.mubr.f32.gmra.mrb[12].mxu0 %v3416_v17  ;;  %2541 = vmatprep.subr.bf16.mxu0 %v2540_v4  ;;  %v1865_v61 = vld [vmem:[%s3865_s1 + $0x408] sm:$0xff]  ;;  %v2482_v4 = vpack.c.bf16 %v507_v32, %v506_v24  ;;  %v2546_v11 = vpack.c.bf16 %v1847_v53, %v1846_v48  ;;  %v526_v18 = vld [vmem:[%s3865_s1 + $0x110] sm:$0xff]  ;;  %v326_v52 = vmul.f32 %v2953_v50, %v324_v35 }
  0x46   : > { %2271 = vmatmul.mubr.f32.gmra.mrb[12].mxu1 %v3425_v22  ;;  %688 = vmatprep.mubr.f32.mxu0 %v3091_v60  ;;  %v3477_v24 = vld [vmem:[#allocation2 + $0xa7] sm:$0xff]  ;;  %v2488_v32 = vpack.c.bf16 %v527_v19, %v526_v18  ;;  %v3496_v48 = vld [vmem:[#allocation2 + $0xaf] sm:$0xff] }
  0x47   : > { %2479 = vmatpush3.bf16.msra.mxu1 %v2478_v23  ;;  %2273 = vmatprep.mubr.f32.mxu1 %v3430_v26  ;;  %v3471_v23 = vpack.c.bf16 %v1865_v61, %v1864_v58  ;;  %v529_v44 = vld [vmem:[%s3865_s1 + $0x128] sm:$0xff]  ;;  %v3505_v61 = vadd.f32 %v2958_v51, %v326_v52  ;;  %v535_v52 = vld [vmem:[%s3865_s1 + $0x158] sm:$0xff] }
  0x48   : > { %2481 = vmatprep.subr.bf16.mxu1 %v2480_v31  ;;  %2543 = vmatpush3.bf16.msra.mxu0 %v2542_v36  ;;  %v432_v31 = vld [vmem:[#allocation2 + $0x7] sm:$0xff]  ;;  %v433_v58 = vld [vmem:[#allocation2 + $0xf] sm:$0xff] }
  0x49   : > { %689 = vmatmul.mubr.f32.gmra.mrb[14].mxu0 %v3452_v55  ;;  %2545 = vmatprep.subr.bf16.mxu0 %v2544_v45  ;;  %v528_v36 = vld [vmem:[%s3865_s1 + $0x120] sm:$0xff]  ;;  %v325_v45 = vld [vmem:[%s323_s13 + $0x8] sm:$0xff]  ;;  %v330_v15 = vmax.f32 %v3505_v61, 0.0 }
  0x4a   : > { %2274 = vmatmul.mubr.f32.gmra.mrb[14].mxu1 %v3461_v3  ;;  %693 = vmatprep.mubr.f32.mxu0 %v3117_v5  ;;  %v327_v53 = vmul.f32 %v2953_v50, %v325_v45  ;;  %v530_v50 = vld [vmem:[%s3865_s1 + $0x130] sm:$0xff]  ;;  %v537_v45 = vld [vmem:[%s3865_s1 + $0x168] sm:$0xff] }
  0x4b   : > { %2483 = vmatpush3.bf16.msra.mxu1 %v2482_v4  ;;  %2719 = vmatprep.mubr.msk.f32.mxu1 %vm2718_vm1, %v317_v12  ;;  %v340_v12 = vstv %s339_s28  ;;  %v2492_v4 = vpack.c.bf16 %v529_v44, %v528_v36  ;;  %v2496_v19 = vpack.c.bf16 %v531_v1, %v530_v50  ;;  %v3544_v35 = vld [vmem:[#allocation2 + $0xcf] sm:$0xff]  ;;  %v3580_v50 = vld [vmem:[#allocation2 + $0x107] sm:$0xff] }
  0x4c   : > { %2485 = vmatprep.subr.bf16.mxu1 %v2484_v9  ;;  %2547 = vmatpush3.bf16.msra.mxu0 %v2546_v11  ;;  %vm3507_vm2 = vcmp.eq.s32.totalorder %v340_v12, 1  ;;  %v3512_v18 = vadd.f32 %v2958_v51, %v327_v53  ;;  %v534_v44 = vld [vmem:[%s3865_s1 + $0x150] sm:$0xff]  ;;  %v536_v12 = vld [vmem:[%s3865_s1 + $0x160] sm:$0xff] }
  0x4d   : > { %694 = vmatmul.mubr.f32.gmra.mrb[16].mxu0 %v3477_v24  ;;  %2549 = vmatprep.subr.bf16.mxu0 %v3471_v23  ;;  %v2508_v53 = vpack.c.bf16 %v537_v45, %v536_v12  ;;  %v1877_v12 = vld [vmem:[%s3865_s1 + $0x468] sm:$0xff]  ;;  %v1879_v45 = vld [vmem:[%s3865_s1 + $0x478] sm:$0xff]  ;;  %vm2722_vm3 = vmneg %vm3507_vm2 }
  0x4e   : > { %944 = vmatmul.mubr.f32.vlgmr.msra.gmra.mrb[16].mxu1 %v432_v31  ;;  %698 = vmatprep.mubr.f32.mxu0 %v3131_v13  ;;  %v331_v51 = vmax.f32 %v3512_v18, 0.0 }
  0x4f   : > { %2721 = vmatprep.mubr.msk.f32.mxu1 %vm2718_vm1, %v318_v25  ;;  %2487 = vmatpush3.bf16.msra.mxu1 %v2484_v9  ;;  %v3523_v25 = vld [vmem:[#allocation2 + $0xc7] sm:$0xff]  ;;  %v342_v9 = vsel %vm3507_vm2, 0.0, %v330_v15 }
  0x50   : > { %2489 = vmatprep.subr.bf16.mxu1 %v2488_v32  ;;  %347 = vst [vmem:[#allocation2 + $0x128] sm:$0xff] %v342_v9  ;;  %v343_v31 = vsel %vm3507_vm2, 0.0, %v331_v51  ;;  %v3586_v9 = vld [vmem:[#allocation2 + $0x10f] sm:$0xff] }
  0x51   : > { %699 = vmatmul.mubr.f32.gmra.mrb[18].mxu0 %v3496_v48  ;;  %348 = vst [vmem:[#allocation2 + $0x130] sm:$0xff] %v343_v31  ;;  %v1867_v31 = vld [vmem:[%s3865_s1 + $0x418] sm:$0xff] }
  0x52   : > { %949 = vmatmul.mubr.f32.gmra.mrb[18].mxu1 %v433_v58  ;;  %703 = vmatprep.mubr.f32.mxu0 %v3184_v39  ;;  %v538_v58 = vld [vmem:[%s3865_s1 + $0x170] sm:$0xff] }
  0x53   : > { %953 = vmatprep.mubr.f32.mxu1 %v2998_v10  ;;  %2491 = vmatpush3.bf16.msra.mxu1 %v2488_v32  ;;  %v532_v10 = vld [vmem:[%s3865_s1 + $0x140] sm:$0xff]  ;;  %v533_v32 = vld [vmem:[%s3865_s1 + $0x148] sm:$0xff] }
  0x54   : > { %2493 = vmatprep.subr.bf16.mxu1 %v2492_v4  ;;  %v2500_v36 = vpack.c.bf16 %v533_v32, %v532_v10  ;;  %v1868_v32 = vld [vmem:[%s3865_s1 + $0x420] sm:$0xff] }
  0x55   : > { %704 = vmatmul.mubr.f32.gmra.mrb[20].mxu0 %v3523_v25 }
  0x56   : > { %954 = vmatmul.mubr.f32.gmra.mrb[20].mxu1 %v3108_v2  ;;  %708 = vmatprep.mubr.f32.mxu0 %v3186_v42  ;;  %v3556_v2 = vld [vmem:[#allocation2 + $0xe7] sm:$0xff] }
  0x57   : > { %958 = vmatprep.mubr.f32.mxu1 %v3002_v14  ;;  %2495 = vmatpush3.bf16.msra.mxu1 %v2492_v4  ;;  %v2504_v14 = vpack.c.bf16 %v535_v52, %v534_v44  ;;  %v539_v4 = vld [vmem:[%s3865_s1 + $0x178] sm:$0xff]  ;;  %v1873_v52 = vld [vmem:[%s3865_s1 + $0x448] sm:$0xff] }
  0x58   : > { %2497 = vmatprep.subr.bf16.mxu1 %v2496_v19  ;;  %v2512_v1 = vpack.c.bf16 %v539_v4, %v538_v58  ;;  %v1871_v44 = vld [vmem:[%s3865_s1 + $0x438] sm:$0xff] }
  0x59   : > { %709 = vmatmul.mubr.f32.gmra.mrb[22].mxu0 %v3544_v35 }
  0x5a   : > { %959 = vmatmul.mubr.f32.gmra.mrb[22].mxu1 %v3162_v29  ;;  %713 = vmatprep.mubr.f32.mxu0 %v3218_v56  ;;  %v3568_v29 = vld [vmem:[#allocation2 + $0xef] sm:$0xff] }
  0x5b   : > { %963 = vmatprep.mubr.f32.mxu1 %v3028_v27  ;;  %2499 = vmatpush3.bf16.msra.mxu1 %v2496_v19  ;;  %v1866_v19 = vld [vmem:[%s3865_s1 + $0x410] sm:$0xff] }
  0x5c   : > { %2501 = vmatprep.subr.bf16.mxu1 %v2500_v36  ;;  %v3599_v10 = vpack.c.bf16 %v1867_v31, %v1866_v19 }
  0x5d   : > { %714 = vmatmul.mubr.f32.gmra.mrb[24].mxu0 %v3556_v2 }
  0x5e   : > { %964 = vmatmul.mubr.f32.gmra.mrb[24].mxu1 %v3211_v54  ;;  %718 = vmatprep.mubr.f32.mxu0 %v3220_v57 }
  0x5f   : > { %968 = vmatprep.mubr.f32.mxu1 %v3030_v28  ;;  %2503 = vmatpush3.bf16.msra.mxu1 %v2500_v36  ;;  %v1869_v36 = vld [vmem:[%s3865_s1 + $0x428] sm:$0xff] }
  0x60   : > { %2505 = vmatprep.subr.bf16.mxu1 %v2504_v14 }
  0x61   : > { %719 = vmatmul.mubr.f32.gmra.mrb[26].mxu0 %v3568_v29 }
  0x62   : > { %969 = vmatmul.mubr.f32.gmra.mrb[26].mxu1 %v3264_v20  ;;  %723 = vmatprep.mubr.f32.mxu0 %v3294_v46 }
  0x63   : > { %973 = vmatprep.mubr.f32.mxu1 %v3053_v40  ;;  %2507 = vmatpush3.bf16.msra.mxu1 %v2504_v14  ;;  %v1875_v14 = vld [vmem:[%s3865_s1 + $0x458] sm:$0xff] }
  0x64   : > { %2509 = vmatprep.subr.bf16.mxu1 %v2508_v53 }
  0x65   : > { %724 = vmatmul.mubr.f32.gmra.mrb[28].mxu0 %v3580_v50 }
  0x66   : > { %974 = vmatmul.mubr.f32.gmra.mrb[28].mxu1 %v3315_v0  ;;  %728 = vmatprep.mubr.f32.mxu0 %v3296_v47 }
  0x67   : > { %978 = vmatprep.mubr.f32.mxu1 %v3055_v41  ;;  %2511 = vmatpush3.bf16.msra.mxu1 %v2508_v53 }
  0x68   : > { %2513 = vmatprep.subr.bf16.mxu1 %v2512_v1 }
  0x69   : > { %729 = vmatmul.mubr.f32.gmra.mrb[30].mxu0 %v3586_v9 }
  0x6a   : > { %979 = vmatmul.mubr.f32.gmra.mrb[30].mxu1 %v3372_v33  ;;  %1282 = vmatprep.mubr.f32.mxu0 %v3028_v27  ;;  %v3614_v27 = vpack.c.bf16 %v1869_v36, %v1868_v32 }
  0x6b   : > { %983 = vmatprep.mubr.f32.mxu1 %v3089_v59  ;;  %2515 = vmatpush3.bf16.msra.mxu1 %v2512_v1 }
  0x6c   : > { %2580 = vmatprep.subr.bf16.mxu1 %v3471_v23 }
  0x6d   : > { %1283 = vmatmul.mubr.f32.vlgmr.msra.gmra.mrb[32].mxu0 %v3211_v54  ;;  %v1870_v54 = vld [vmem:[%s3865_s1 + $0x430] sm:$0xff] }
  0x6e   : > { %984 = vmatmul.mubr.f32.gmra.mrb[32].mxu1 %v3416_v17  ;;  %2551 = vmatpush3.bf16.msra.mxu0 %v3471_v23 }
  0x6f   : > { %988 = vmatprep.mubr.f32.mxu1 %v3091_v60  ;;  %1287 = vmatprep.mubr.f32.mxu0 %v3030_v28  ;;  %v3628_v28 = vpack.c.bf16 %v1871_v44, %v1870_v54 }
  0x70   : > { %2553 = vmatprep.subr.bf16.mxu0 %v3599_v10 }
  0x71   : > { %1288 = vmatmul.mubr.f32.gmra.mrb[34].mxu0 %v3264_v20  ;;  %v1872_v20 = vld [vmem:[%s3865_s1 + $0x440] sm:$0xff] }
  0x72   : > { %989 = vmatmul.mubr.f32.gmra.mrb[34].mxu1 %v3452_v55  ;;  %1292 = vmatprep.mubr.f32.mxu0 %v3053_v40  ;;  %v3642_v40 = vpack.c.bf16 %v1873_v52, %v1872_v20 }
  0x73   : > { %993 = vmatprep.mubr.f32.mxu1 %v3117_v5  ;;  %2555 = vmatpush3.bf16.msra.mxu0 %v3599_v10 }
  0x74   : > { %2557 = vmatprep.subr.bf16.mxu0 %v3614_v27 }
  0x75   : > { %1293 = vmatmul.mubr.f32.gmra.mrb[36].mxu0 %v3315_v0  ;;  %v1874_v0 = vld [vmem:[%s3865_s1 + $0x450] sm:$0xff] }
  0x76   : > { %994 = vmatmul.mubr.f32.gmra.mrb[36].mxu1 %v3477_v24  ;;  %1297 = vmatprep.mubr.f32.mxu0 %v3055_v41  ;;  %v3656_v41 = vpack.c.bf16 %v1875_v14, %v1874_v0 }
  0x77   : > { %998 = vmatprep.mubr.f32.mxu1 %v3131_v13  ;;  %2559 = vmatpush3.bf16.msra.mxu0 %v3614_v27 }
  0x78   : > { %2561 = vmatprep.subr.bf16.mxu0 %v3628_v28 }
  0x79   : > { %1298 = vmatmul.mubr.f32.gmra.mrb[38].mxu0 %v3372_v33  ;;  %v1876_v33 = vld [vmem:[%s3865_s1 + $0x460] sm:$0xff] }
  0x7a   : > { %999 = vmatmul.mubr.f32.gmra.mrb[38].mxu1 %v3496_v48  ;;  %1302 = vmatprep.mubr.f32.mxu0 %v3089_v59  ;;  %v3670_v59 = vpack.c.bf16 %v1877_v12, %v1876_v33 }
  0x7b   : > { %1003 = vmatprep.mubr.f32.mxu1 %v3184_v39  ;;  %2563 = vmatpush3.bf16.msra.mxu0 %v3628_v28 }
  0x7c   : > { %2565 = vmatprep.subr.bf16.mxu0 %v3642_v40 }
  0x7d   : > { %1303 = vmatmul.mubr.f32.gmra.mrb[40].mxu0 %v3416_v17  ;;  %v1878_v17 = vld [vmem:[%s3865_s1 + $0x470] sm:$0xff] }
  0x7e   : > { %1004 = vmatmul.mubr.f32.gmra.mrb[40].mxu1 %v3523_v25  ;;  %1307 = vmatprep.mubr.f32.mxu0 %v3091_v60  ;;  %v2576_v60 = vpack.c.bf16 %v1879_v45, %v1878_v17 }
  0x7f   : > { %1008 = vmatprep.mubr.f32.mxu1 %v3186_v42  ;;  %2567 = vmatpush3.bf16.msra.mxu0 %v3642_v40 }
  0x80   : > { %2569 = vmatprep.subr.bf16.mxu0 %v3656_v41 }
  0x81   : > { %1308 = vmatmul.mubr.f32.gmra.mrb[42].mxu0 %v3452_v55  ;;  %v472_v55 = vld [vmem:[#allocation2 + $0x9] sm:$0xff] }
  0x82   : > { %1009 = vmatmul.mubr.f32.gmra.mrb[42].mxu1 %v3544_v35  ;;  %1312 = vmatprep.mubr.f32.mxu0 %v3117_v5  ;;  %v473_v5 = vld [vmem:[#allocation2 + $0x11] sm:$0xff] }
  0x83   : > { %1013 = vmatprep.mubr.f32.mxu1 %v3218_v56  ;;  %2571 = vmatpush3.bf16.msra.mxu0 %v3656_v41 }
  0x84   : > { %2573 = vmatprep.subr.bf16.mxu0 %v3670_v59 }
  0x85   : > { %1313 = vmatmul.mubr.f32.gmra.mrb[44].mxu0 %v3477_v24 }
  0x86   : > { %1014 = vmatmul.mubr.f32.gmra.mrb[44].mxu1 %v3556_v2  ;;  %1317 = vmatprep.mubr.f32.mxu0 %v3131_v13  ;;  %v490_v13 = vld [vmem:[#allocation2 + $0x129] sm:$0xff] }
  0x87   : > { %1018 = vmatprep.mubr.f32.mxu1 %v3220_v57  ;;  %2575 = vmatpush3.bf16.msra.mxu0 %v3670_v59 }
  0x88   : > { %2577 = vmatprep.subr.bf16.mxu0 %v2576_v60 }
  0x89   : > { %1318 = vmatmul.mubr.f32.gmra.mrb[46].mxu0 %v3496_v48 }
  0x8a   : > { %1019 = vmatmul.mubr.f32.gmra.mrb[46].mxu1 %v3568_v29  ;;  %1322 = vmatprep.mubr.f32.mxu0 %v3184_v39 }
  0x8b   : > { %2308 = vmatprep.mubr.f32.mxu1 %v472_v55  ;;  %2579 = vmatpush3.bf16.msra.mxu0 %v2576_v60 }
  0x8d   : > { %1323 = vmatmul.mubr.f32.gmra.mrb[48].mxu0 %v3523_v25 }
  0x8e   : > { %2309 = vmatmul.mubr.f32.vlgmr.msra.gmra.mrb[0].mxu1 %v473_v5  ;;  %1327 = vmatprep.mubr.f32.mxu0 %v3186_v42 }
  0x8f   : > { %2588 = vmatpush3.bf16.msra.mxu1 %v3471_v23  ;;  %2311 = vmatprep.mubr.f32.mxu1 %v3094_v62  ;;  %v450_v62 = vld [vmem:[#allocation2 + $0x127] sm:$0xff] }
  0x90   : > { %2581 = vmatprep.subr.bf16.mxu1 %v3599_v10 }
  0x91   : > { %1328 = vmatmul.mubr.f32.gmra.mrb[50].mxu0 %v3544_v35 }
  0x92   : > { %2312 = vmatmul.mubr.f32.gmra.mrb[2].mxu1 %v3121_v8  ;;  %1332 = vmatprep.mubr.f32.mxu0 %v3218_v56  ;;  %v451_v8 = vld [vmem:[#allocation2 + $0x12f] sm:$0xff] }
  0x93   : > { %2589 = vmatpush3.bf16.msra.mxu1 %v3599_v10  ;;  %2314 = vmatprep.mubr.f32.mxu1 %v3152_v21 }
  0x94   : > { %2582 = vmatprep.subr.bf16.mxu1 %v3614_v27 }
  0x95   : > { %1333 = vmatmul.mubr.f32.gmra.mrb[52].mxu0 %v3556_v2 }
  0x96   : > { %2315 = vmatmul.mubr.f32.gmra.mrb[4].mxu1 %v3174_v34  ;;  %1337 = vmatprep.mubr.f32.mxu0 %v3220_v57 }
  0x97   : > { %2590 = vmatpush3.bf16.msra.mxu1 %v3614_v27  ;;  %2317 = vmatprep.mubr.f32.mxu1 %v3190_v43 }
  0x98   : > { %2583 = vmatprep.subr.bf16.mxu1 %v3628_v28 }
  0x99   : > { %1338 = vmatmul.mubr.f32.gmra.mrb[54].mxu0 %v3568_v29 }
  0x9a   : > { %2318 = vmatmul.mubr.f32.gmra.mrb[6].mxu1 %v3232_v63  ;;  %1342 = vmatprep.mubr.f32.mxu0 %v3294_v46 }
  0x9b   : > { %2591 = vmatpush3.bf16.msra.mxu1 %v3628_v28  ;;  %2320 = vmatprep.mubr.f32.mxu1 %v3240_v6 }
  0x9c   : > { %2584 = vmatprep.subr.bf16.mxu1 %v3642_v40 }
  0x9d   : > { %1343 = vmatmul.mubr.f32.gmra.mrb[56].mxu0 %v3580_v50 }
  0x9e   : > { %2321 = vmatmul.mubr.f32.gmra.mrb[8].mxu1 %v3278_v30  ;;  %1347 = vmatprep.mubr.f32.mxu0 %v3296_v47 }
  0x9f   : > { %2592 = vmatpush3.bf16.msra.mxu1 %v3642_v40  ;;  %2323 = vmatprep.mubr.f32.mxu1 %v3289_v37 }
  0xa0   : > { %2585 = vmatprep.subr.bf16.mxu1 %v3656_v41 }
  0xa1   : > { %1348 = vmatmul.mubr.f32.gmra.mrb[58].mxu0 %v3586_v9 }
  0xa2   : > { %2324 = vmatmul.mubr.f32.gmra.mrb[10].mxu1 %v3331_v7  ;;  %2723 = vmatprep.mubr.msk.f32.mxu0 %vm2722_vm3, %v330_v15 }
  0xa3   : > { %2593 = vmatpush3.bf16.msra.mxu1 %v3656_v41  ;;  %2326 = vmatprep.mubr.f32.mxu1 %v3341_v16 }
  0xa4   : > { %2586 = vmatprep.subr.bf16.mxu1 %v3670_v59 }
  0xa5   : > { %1353 = vmatmul.mubr.f32.gmra.mrb[60].mxu0 %v450_v62 }
  0xa6   : > { %2327 = vmatmul.mubr.f32.gmra.mrb[12].mxu1 %v3381_v38  ;;  %2725 = vmatprep.mubr.msk.f32.mxu0 %vm2722_vm3, %v331_v51 }
  0xa7   : > { %2594 = vmatpush3.bf16.msra.mxu1 %v3670_v59  ;;  %2329 = vmatprep.mubr.f32.mxu1 %v3390_v49 }
  0xa8   : > { %2587 = vmatprep.subr.bf16.mxu1 %v2576_v60 }
  0xa9   : > { %1358 = vmatmul.mubr.f32.gmra.mrb[62].mxu0 %v451_v8 }
  0xaa   : > { %2330 = vmatmul.mubr.f32.gmra.mrb[14].mxu1 %v3425_v22  ;;  %2364 = vmatprep.mubr.f32.mxu0 %v3152_v21  ;;  %v491_v21 = vld [vmem:[#allocation2 + $0x131] sm:$0xff] }
  0xab   : > { %2595 = vmatpush3.bf16.msra.mxu1 %v2576_v60  ;;  %2376 = vmatprep.mubr.f32.mxu1 %v3341_v16 }
  0xad   : > { %2365 = vmatmul.mubr.f32.vlgmr.msra.gmra.mrb[64].mxu0 %v3174_v34 }
  0xae   : > { %2377 = vmatmul.mubr.f32.vlgmr.msra.gmra.mrb[8].mxu1 %v3381_v38  ;;  %2367 = vmatprep.mubr.f32.mxu0 %v3190_v43 }
  0xaf   : > { %2379 = vmatprep.mubr.f32.mxu1 %v3390_v49 }
  0xb1   : > { %2368 = vmatmul.mubr.f32.gmra.mrb[66].mxu0 %v3232_v63 }
  0xb2   : > { %2380 = vmatmul.mubr.f32.gmra.mrb[10].mxu1 %v3425_v22  ;;  %2370 = vmatprep.mubr.f32.mxu0 %v3240_v6 }
  0xb3   : > { %2382 = vmatprep.mubr.f32.mxu1 %v3430_v26 }
  0xb5   : > { %2371 = vmatmul.mubr.f32.gmra.mrb[68].mxu0 %v3278_v30 }
  0xb6   : > { %2383 = vmatmul.mubr.f32.gmra.mrb[12].mxu1 %v3461_v3  ;;  %2373 = vmatprep.mubr.f32.mxu0 %v3289_v37 }
  0xb7   : > { %2385 = vmatprep.mubr.f32.mxu1 %v490_v13 }
  0xb9   : > { %2374 = vmatmul.mubr.f32.gmra.mrb[70].mxu0 %v3331_v7 }
  0xba   : > { %2386 = vmatmul.mubr.f32.gmra.mrb[14].mxu1 %v491_v21 }
 0x100   : > { %v1916_v34 = vpop.f32.mrb[0].mxu0 }
 0x101   : > { %v1917_v39 = vpop.f32.mrb[1].mxu0 }
 0x102   : > { %v1918_v42 = vadd.f32 %v1917_v39, %v1916_v34 }
 0x104   : > { %v1919_v43 = vpop.f32.mrb[2].mxu0 }
 0x105   : > { %v1920_v56 = vpop.f32.mrb[3].mxu0 }
 0x106   : > { %v1921_v57 = vadd.f32 %v1920_v56, %v1919_v43 }
 0x108   : > { %v1922_v63 = vpop.f32.mrb[4].mxu0 }
 0x109   : > { %v1923_v6 = vpop.f32.mrb[5].mxu0 }
 0x10a   : > { %v1924_v46 = vadd.f32 %v1923_v6, %v1922_v63 }
 0x10c   : > { %v1925_v47 = vpop.f32.mrb[6].mxu0 }
 0x10d   : > { %v1926_v30 = vpop.f32.mrb[7].mxu0 }
 0x10e   : > { %v1927_v16 = vadd.f32 %v1926_v30, %v1925_v47 }
 0x110   : > { %v1928_v38 = vpop.f32.mrb[8].mxu0 }
 0x111   : > { %v1929_v49 = vpop.f32.mrb[9].mxu0 }
 0x112   : > { %v1930_v37 = vadd.f32 %v1929_v49, %v1928_v38 }
 0x114   : > { %v1931_v22 = vpop.f32.mrb[10].mxu0 }
 0x115   : > { %v1932_v26 = vpop.f32.mrb[11].mxu0 }
 0x116   : > { %v1933_v3 = vadd.f32 %v1932_v26, %v1931_v22 }
 0x118   : > { %v1934_v7 = vpop.f32.mrb[12].mxu0 }
 0x119   : > { %v1935_v23 = vpop.f32.mrb[13].mxu0 }
 0x11a   : > { %v1936_v24 = vadd.f32 %v1935_v23, %v1934_v7 }
 0x11c   : > { %v1937_v48 = vpop.f32.mrb[14].mxu0 }
 0x11d   : > { %v1938_v61 = vpop.f32.mrb[15].mxu0 }
 0x11e   : > { %v1939_v11 = vadd.f32 %v1938_v61, %v1937_v48 }
 0x120   : > { %v1940_v18 = vpop.f32.mrb[16].mxu0 }
 0x121   : > { %v2028_v15 = vpop.f32.mrb[16].mxu1  ;;  %v1941_v25 = vpop.f32.mrb[17].mxu0 }
 0x122   : > { %v1942_v51 = vadd.f32 %v1941_v25, %v1940_v18  ;;  %v2029_v35 = vpop.f32.mrb[17].mxu1 }
 0x123   : > { %v2030_v2 = vadd.f32 %v2029_v35, %v2028_v15 }
 0x124   : > { %v1943_v29 = vpop.f32.mrb[18].mxu0 }
 0x125   : > { %v2031_v53 = vpop.f32.mrb[18].mxu1  ;;  %v1944_v58 = vpop.f32.mrb[19].mxu0  ;;  %v3750_v4 = vadd.f32 %v2030_v2, %v1918_v42 }
 0x126   : > { %v1945_v50 = vadd.f32 %v1944_v58, %v1943_v29  ;;  %v2032_v1 = vpop.f32.mrb[19].mxu1 }
 0x127   : > { %v2033_v9 = vadd.f32 %v2032_v1, %v2031_v53 }
 0x128   : > { %v1946_v19 = vpop.f32.mrb[20].mxu0 }
 0x129   : > { %v2034_v31 = vpop.f32.mrb[20].mxu1  ;;  %v1947_v10 = vpop.f32.mrb[21].mxu0  ;;  %v3752_v32 = vadd.f32 %v2033_v9, %v1921_v57 }
 0x12a   : > { %v1948_v36 = vadd.f32 %v1947_v10, %v1946_v19  ;;  %v2035_v27 = vpop.f32.mrb[21].mxu1 }
 0x12b   : > { %v2036_v54 = vadd.f32 %v2035_v27, %v2034_v31 }
 0x12c   : > { %v1949_v44 = vpop.f32.mrb[22].mxu0 }
 0x12d   : > { %v2037_v28 = vpop.f32.mrb[22].mxu1  ;;  %v1950_v20 = vpop.f32.mrb[23].mxu0  ;;  %v3754_v52 = vadd.f32 %v2036_v54, %v1924_v46 }
 0x12e   : > { %v1951_v40 = vadd.f32 %v1950_v20, %v1949_v44  ;;  %v2038_v0 = vpop.f32.mrb[23].mxu1 }
 0x12f   : > { %v2039_v14 = vadd.f32 %v2038_v0, %v2037_v28 }
 0x130   : > { %v1952_v41 = vpop.f32.mrb[24].mxu0 }
 0x131   : > { %v2040_v33 = vpop.f32.mrb[24].mxu1  ;;  %v1953_v12 = vpop.f32.mrb[25].mxu0  ;;  %v3756_v59 = vadd.f32 %v2039_v14, %v1927_v16 }
 0x132   : > { %v1954_v17 = vadd.f32 %v1953_v12, %v1952_v41  ;;  %v2041_v45 = vpop.f32.mrb[25].mxu1 }
 0x133   : > { %v2042_v60 = vadd.f32 %v2041_v45, %v2040_v33 }
 0x134   : > { %v1955_v55 = vpop.f32.mrb[26].mxu0 }
 0x135   : > { %v2043_v5 = vpop.f32.mrb[26].mxu1  ;;  %v1956_v62 = vpop.f32.mrb[27].mxu0  ;;  %v3758_v8 = vadd.f32 %v2042_v60, %v1930_v37 }
 0x136   : > { %v1957_v13 = vadd.f32 %v1956_v62, %v1955_v55  ;;  %v2044_v21 = vpop.f32.mrb[27].mxu1 }
 0x137   : > { %v2045_v34 = vadd.f32 %v2044_v21, %v2043_v5 }
 0x138   : > { %v1958_v39 = vpop.f32.mrb[28].mxu0 }
 0x139   : > { %v2046_v42 = vpop.f32.mrb[28].mxu1  ;;  %v1959_v43 = vpop.f32.mrb[29].mxu0  ;;  %v3760_v56 = vadd.f32 %v2045_v34, %v1933_v3 }
 0x13a   : > { %v1960_v57 = vadd.f32 %v1959_v43, %v1958_v39  ;;  %v2047_v63 = vpop.f32.mrb[29].mxu1 }
 0x13b   : > { %v2048_v6 = vadd.f32 %v2047_v63, %v2046_v42 }
 0x13c   : > { %v1961_v46 = vpop.f32.mrb[30].mxu0 }
 0x13d   : > { %v2049_v47 = vpop.f32.mrb[30].mxu1  ;;  %v1962_v30 = vpop.f32.mrb[31].mxu0  ;;  %v3762_v16 = vadd.f32 %v2048_v6, %v1936_v24 }
 0x13e   : > { %v1963_v38 = vadd.f32 %v1962_v30, %v1961_v46  ;;  %v2050_v49 = vpop.f32.mrb[31].mxu1 }
 0x13f   : > { %v2051_v37 = vadd.f32 %v2050_v49, %v2049_v47 }
 0x140   : > { %v2140_v22 = vpop.f32.mrb[32].mxu0 }
 0x141   : > { %v2052_v26 = vpop.f32.mrb[32].mxu1  ;;  %v2141_v7 = vpop.f32.mrb[33].mxu0  ;;  %v3764_v23 = vadd.f32 %v2051_v37, %v1939_v11 }
 0x142   : > { %v2053_v48 = vpop.f32.mrb[33].mxu1  ;;  %v3766_v61 = vadd.f32 %v2141_v7, %v2140_v22 }
 0x143   : > { %v2054_v3 = vadd.f32 %v2053_v48, %v2052_v26 }
 0x144   : > { %v2143_v18 = vpop.f32.mrb[34].mxu0 }
 0x145   : > { %v2631_v15 = vadd.f32 %v2054_v3, %v1942_v51  ;;  %v2055_v25 = vpop.f32.mrb[34].mxu1  ;;  %v2144_v35 = vpop.f32.mrb[35].mxu0 }
 0x146   : > { %v2056_v2 = vpop.f32.mrb[35].mxu1  ;;  %v2145_v29 = vadd.f32 %v2144_v35, %v2143_v18 }
 0x147   : > { %v2057_v24 = vadd.f32 %v2056_v2, %v2055_v25 }
 0x148   : > { %v2146_v53 = vpop.f32.mrb[36].mxu0 }
 0x149   : > { %v2628_v58 = vadd.f32 %v2057_v24, %v1945_v50  ;;  %v2058_v1 = vpop.f32.mrb[36].mxu1  ;;  %v2147_v9 = vpop.f32.mrb[37].mxu0 }
 0x14a   : > { %v2059_v19 = vpop.f32.mrb[37].mxu1  ;;  %v2148_v31 = vadd.f32 %v2147_v9, %v2146_v53 }
 0x14b   : > { %v2060_v10 = vadd.f32 %v2059_v19, %v2058_v1 }
 0x14c   : > { %v2149_v11 = vpop.f32.mrb[38].mxu0 }
 0x14d   : > { %v3768_v27 = vadd.f32 %v2060_v10, %v1948_v36  ;;  %v2061_v54 = vpop.f32.mrb[38].mxu1  ;;  %v2150_v44 = vpop.f32.mrb[39].mxu0 }
 0x14e   : > { %v2062_v28 = vpop.f32.mrb[39].mxu1  ;;  %v2151_v20 = vadd.f32 %v2150_v44, %v2149_v11 }
 0x14f   : > { %v2063_v51 = vadd.f32 %v2062_v28, %v2061_v54 }
 0x150   : > { %v2152_v0 = vpop.f32.mrb[40].mxu0 }
 0x151   : > { %v3770_v14 = vadd.f32 %v2063_v51, %v1951_v40  ;;  %v2064_v41 = vpop.f32.mrb[40].mxu1  ;;  %v2153_v33 = vpop.f32.mrb[41].mxu0 }
 0x152   : > { %v2065_v12 = vpop.f32.mrb[41].mxu1  ;;  %v2154_v50 = vadd.f32 %v2153_v33, %v2152_v0 }
 0x153   : > { %v2066_v45 = vadd.f32 %v2065_v12, %v2064_v41 }
 0x154   : > { %v2155_v60 = vpop.f32.mrb[42].mxu0 }
 0x155   : > { %v3772_v55 = vadd.f32 %v2066_v45, %v1954_v17  ;;  %v2067_v5 = vpop.f32.mrb[42].mxu1  ;;  %v2156_v62 = vpop.f32.mrb[43].mxu0 }
 0x156   : > { %v2068_v36 = vpop.f32.mrb[43].mxu1  ;;  %v2157_v21 = vadd.f32 %v2156_v62, %v2155_v60 }
 0x157   : > { %v2069_v34 = vadd.f32 %v2068_v36, %v2067_v5 }
 0x158   : > { %v2158_v39 = vpop.f32.mrb[44].mxu0 }
 0x159   : > { %v3774_v42 = vadd.f32 %v2069_v34, %v1957_v13  ;;  %v2070_v43 = vpop.f32.mrb[44].mxu1  ;;  %v2159_v63 = vpop.f32.mrb[45].mxu0 }
 0x15a   : > { %v2071_v40 = vpop.f32.mrb[45].mxu1  ;;  %v2160_v6 = vadd.f32 %v2159_v63, %v2158_v39 }
 0x15b   : > { %v2072_v46 = vadd.f32 %v2071_v40, %v2070_v43 }
 0x15c   : > { %v2161_v47 = vpop.f32.mrb[46].mxu0 }
 0x15d   : > { %v3776_v30 = vadd.f32 %v2072_v46, %v1960_v57  ;;  %v2073_v49 = vpop.f32.mrb[46].mxu1  ;;  %v2162_v37 = vpop.f32.mrb[47].mxu0 }
 0x15e   : > { %v2074_v17 = vpop.f32.mrb[47].mxu1  ;;  %v2163_v22 = vadd.f32 %v2162_v37, %v2161_v47 }
 0x15f   : > { %v2075_v26 = vadd.f32 %v2074_v17, %v2073_v49 }
 0x160   : > { %v2164_v7 = vpop.f32.mrb[48].mxu0 }
 0x161   : > { %v3778_v48 = vadd.f32 %v2075_v26, %v1963_v38  ;;  %v2310_v3 = vpop.f32.mrb[0].mxu1  ;;  %v2165_v18 = vpop.f32.mrb[49].mxu0 }
 0x162   : > { %v2597_v13 = vadd.f32 %v3752_v32, %v2310_v3  ;;  %v1090_v25 = vpop.f32.mrb[1].mxu1  ;;  %v2166_v35 = vadd.f32 %v2165_v18, %v2164_v7 }
 0x163   : > { %v2601_v2 = vadd.f32 %v3750_v4, %v1090_v25 }
 0x164   : > { %v2167_v24 = vpop.f32.mrb[50].mxu0  ;;  %v2598_v53 = vadd.f32 %v2597_v13, %v2145_v29  ;;  %v3782_v57 = vadd.f32 %v2631_v15, %v2166_v35 }
 0x165   : > { %v2313_v1 = vpop.f32.mrb[2].mxu1  ;;  %v2168_v9 = vpop.f32.mrb[51].mxu0  ;;  %v2602_v19 = vadd.f32 %v2601_v2, %v3766_v61 }
 0x166   : > { %v2605_v10 = vadd.f32 %v3756_v59, %v2313_v1  ;;  %v1100_v38 = vpop.f32.mrb[3].mxu1  ;;  %v2169_v11 = vadd.f32 %v2168_v9, %v2167_v24 }
 0x167   : > { %v2609_v54 = vadd.f32 %v3754_v52, %v1100_v38 }
 0x168   : > { %v2170_v44 = vpop.f32.mrb[52].mxu0  ;;  %v2629_v32 = vadd.f32 %v2628_v58, %v2169_v11  ;;  %v2606_v28 = vadd.f32 %v2605_v10, %v2151_v20 }
 0x169   : > { %v2316_v51 = vpop.f32.mrb[4].mxu1  ;;  %v2171_v4 = vpop.f32.mrb[53].mxu0  ;;  %v2610_v0 = vadd.f32 %v2609_v54, %v2148_v31 }
 0x16a   : > { %v2613_v15 = vadd.f32 %v3760_v56, %v2316_v51  ;;  %v1110_v29 = vpop.f32.mrb[5].mxu1  ;;  %v2172_v41 = vadd.f32 %v2171_v4, %v2170_v44 }
 0x16b   : > { %v2617_v33 = vadd.f32 %v3758_v8, %v1110_v29 }
 0x16c   : > { %v2173_v61 = vpop.f32.mrb[54].mxu0  ;;  %v2638_v59 = vadd.f32 %v3768_v27, %v2172_v41  ;;  %v3790_v12 = vadd.f32 %v2613_v15, %v2157_v21 }
 0x16d   : > { %v2319_v52 = vpop.f32.mrb[6].mxu1  ;;  %v2174_v45 = vpop.f32.mrb[55].mxu0  ;;  %v3792_v58 = vadd.f32 %v2617_v33, %v2154_v50 }
 0x16e   : > { %v2621_v20 = vadd.f32 %v3764_v23, %v2319_v52  ;;  %v1120_v60 = vpop.f32.mrb[7].mxu1  ;;  %v2175_v31 = vadd.f32 %v2174_v45, %v2173_v61 }
 0x16f   : > { %v2625_v56 = vadd.f32 %v3762_v16, %v1120_v60 }
 0x170   : > { %v2176_v5 = vpop.f32.mrb[56].mxu0  ;;  %v2635_v8 = vadd.f32 %v3770_v14, %v2175_v31  ;;  %v3798_v62 = vadd.f32 %v2621_v20, %v2163_v22 }
 0x171   : > { %v2177_v27 = vpop.f32.mrb[57].mxu0  ;;  %v3800_v36 = vadd.f32 %v2625_v56, %v2160_v6 }
 0x172   : > { %v2178_v21 = vadd.f32 %v2177_v27, %v2176_v5 }
 0x174   : > { %v2179_v50 = vpop.f32.mrb[58].mxu0  ;;  %v2644_v34 = vadd.f32 %v3772_v55, %v2178_v21 }
 0x175   : > { %v2180_v23 = vpop.f32.mrb[59].mxu0 }
 0x176   : > { %v2181_v39 = vadd.f32 %v2180_v23, %v2179_v50 }
 0x178   : > { %v2182_v43 = vpop.f32.mrb[60].mxu0  ;;  %v2641_v16 = vadd.f32 %v3774_v42, %v2181_v39 }
 0x179   : > { %v2183_v63 = vpop.f32.mrb[61].mxu0 }
 0x17a   : > { %v2184_v14 = vadd.f32 %v2183_v63, %v2182_v43 }
 0x17c   : > { %v2185_v40 = vpop.f32.mrb[62].mxu0  ;;  %v3807_v46 = vadd.f32 %v3776_v30, %v2184_v14 }
 0x17d   : > { %v2186_v6 = vpop.f32.mrb[63].mxu0 }
 0x17e   : > { %v2187_v47 = vadd.f32 %v2186_v6, %v2185_v40 }
 0x180   : > { %v2366_v55 = vpop.f32.mrb[64].mxu0  ;;  %v2647_v42 = vadd.f32 %v3778_v48, %v2187_v47 }
 0x181   : > { %v2599_v49 = vadd.f32 %v2598_v53, %v2366_v55  ;;  %v2378_v37 = vpop.f32.mrb[8].mxu1  ;;  %v1429_v17 = vpop.f32.mrb[65].mxu0 }
 0x182   : > { %v3815_v30 = vadd.f32 %v2629_v32, %v2378_v37  ;;  %v2603_v22 = vadd.f32 %v2602_v19, %v1429_v17  ;;  %v1469_v26 = vpop.f32.mrb[9].mxu1 }
 0x183   : > { %1525 = vst [vmem:[%s3812_s10 + $0x8] sm:$0xff] %v2599_v49  ;;  %v1562_v7 = vmul.f32 %v2599_v49, %v2599_v49  ;;  %v2633_v3 = vadd.f32 %v3782_v57, %v1469_v26 }
 0x184   : > { %1533 = vst [vmem:[%s3812_s10 + $0x48] sm:$0xff] %v3815_v30  ;;  %1524 = vst [vmem:[%s3812_s10] sm:$0xff] %v2603_v22  ;;  %v1540_v18 = vadd.f32 %v2603_v22, %v2599_v49  ;;  %v1561_v13 = vmul.f32 %v2603_v22, %v2603_v22  ;;  %v2369_v48 = vpop.f32.mrb[66].mxu0 }
 0x185   : > { %1532 = vst [vmem:[%s3812_s10 + $0x40] sm:$0xff] %v2633_v3  ;;  %v2607_v25 = vadd.f32 %v2606_v28, %v2369_v48  ;;  %v2381_v35 = vpop.f32.mrb[10].mxu1  ;;  %v1439_v2 = vpop.f32.mrb[67].mxu0  ;;  %v1569_v39 = vmul.f32 %v2633_v3, %v2633_v3 }
 0x186   : > { %v1577_v24 = vadd.f32 %v1562_v7, %v1561_v13  ;;  %v2636_v53 = vadd.f32 %v2635_v8, %v2381_v35  ;;  %v2611_v1 = vadd.f32 %v2610_v0, %v1439_v2  ;;  %v1479_v9 = vpop.f32.mrb[11].mxu1 }
 0x187   : > { %1527 = vst [vmem:[%s3812_s10 + $0x18] sm:$0xff] %v2607_v25  ;;  %v2639_v19 = vadd.f32 %v2638_v59, %v1479_v9  ;;  %v1564_v11 = vmul.f32 %v2607_v25, %v2607_v25 }
 0x188   : > { %1535 = vst [vmem:[%s3812_s10 + $0x58] sm:$0xff] %v2636_v53  ;;  %1526 = vst [vmem:[%s3812_s10 + $0x10] sm:$0xff] %v2611_v1  ;;  %v1541_v57 = vadd.f32 %v2611_v1, %v1540_v18  ;;  %v1563_v10 = vmul.f32 %v2611_v1, %v2611_v1  ;;  %v2372_v38 = vpop.f32.mrb[68].mxu0  ;;  %v1572_v47 = vmul.f32 %v2636_v53, %v2636_v53 }
 0x189   : > { %1534 = vst [vmem:[%s3812_s10 + $0x50] sm:$0xff] %v2639_v19  ;;  %v2615_v54 = vadd.f32 %v3790_v12, %v2372_v38  ;;  %v2384_v44 = vpop.f32.mrb[12].mxu1  ;;  %v1449_v32 = vpop.f32.mrb[69].mxu0  ;;  %v1571_v40 = vmul.f32 %v2639_v19, %v2639_v19 }
 0x18a   : > { %v1578_v28 = vadd.f32 %v1577_v24, %v1563_v10  ;;  %v2642_v51 = vadd.f32 %v2641_v16, %v2384_v44  ;;  %v2619_v4 = vadd.f32 %v3792_v58, %v1449_v32  ;;  %v1542_v0 = vadd.f32 %v2607_v25, %v1541_v57  ;;  %v1489_v15 = vpop.f32.mrb[13].mxu1 }
 0x18b   : > { %1529 = vst [vmem:[%s3812_s10 + $0x28] sm:$0xff] %v2615_v54  ;;  %v2645_v29 = vadd.f32 %v2644_v34, %v1489_v15  ;;  %v1566_v12 = vmul.f32 %v2615_v54, %v2615_v54  ;;  %v1604_v10 = vlaneseq }
 0x18c   : > { %1537 = vst [vmem:[%s3812_s10 + $0x68] sm:$0xff] %v2642_v51  ;;  %1528 = vst [vmem:[%s3812_s10 + $0x20] sm:$0xff] %v2619_v4  ;;  %v1543_v41 = vadd.f32 %v2619_v4, %v1542_v0  ;;  %v1565_v33 = vmul.f32 %v2619_v4, %v2619_v4  ;;  %v1579_v61 = vadd.f32 %v1578_v28, %v1564_v11  ;;  %v2375_v59 = vpop.f32.mrb[70].mxu0 }
 0x18d   : > { %1536 = vst [vmem:[%s3812_s10 + $0x60] sm:$0xff] %v2645_v29  ;;  %v2623_v52 = vadd.f32 %v3798_v62, %v2375_v59  ;;  %v2387_v45 = vpop.f32.mrb[14].mxu1  ;;  %v1459_v58 = vpop.f32.mrb[71].mxu0  ;;  %v1573_v49 = vmul.f32 %v2645_v29, %v2645_v29  ;;  %v1574_v22 = vmul.f32 %v2642_v51, %v2642_v51  ;;  %v1605_v28 = vshrl.u32 %v1604_v10, 7 }
 0x18e   : > { %v1580_v20 = vadd.f32 %v1579_v61, %v1565_v33  ;;  %v2648_v60 = vadd.f32 %v2647_v42, %v2387_v45  ;;  %v2627_v31 = vadd.f32 %v3800_v36, %v1459_v58  ;;  %v1544_v56 = vadd.f32 %v2615_v54, %v1543_v41  ;;  %v1499_v5 = vpop.f32.mrb[15].mxu1 }
 0x18f   : > { %1531 = vst [vmem:[%s3812_s10 + $0x38] sm:$0xff] %v2623_v52  ;;  %v2651_v8 = vadd.f32 %v3807_v46, %v1499_v5  ;;  %v1568_v34 = vmul.f32 %v2623_v52, %v2623_v52  ;;  %v1570_v36 = vmul.f32 %v3815_v30, %v3815_v30  ;;  %vm1618_vm4 = vcmp.lt.s32.totalorder %v1604_v10, 256 }
 0x190   : > { %1539 = vst [vmem:[%s3812_s10 + $0x78] sm:$0xff] %v2648_v60  ;;  %1530 = vst [vmem:[%s3812_s10 + $0x30] sm:$0xff] %v2627_v31  ;;  %v1545_v27 = vadd.f32 %v2627_v31, %v1544_v56  ;;  %v1567_v21 = vmul.f32 %v2627_v31, %v2627_v31  ;;  %v1581_v50 = vadd.f32 %v1580_v20, %v1566_v12 }
 0x191   : > { %1538 = vst [vmem:[%s3812_s10 + $0x70] sm:$0xff] %v2651_v8  ;;  %v1575_v18 = vmul.f32 %v2651_v8, %v2651_v8  ;;  %v1576_v48 = vmul.f32 %v2648_v60, %v2648_v60 }
 0x192   : > { %v1546_v23 = vadd.f32 %v2623_v52, %v1545_v27  ;;  %v1582_v62 = vadd.f32 %v1581_v50, %v1567_v21 }
 0x194   : > { %v1547_v43 = vadd.f32 %v2633_v3, %v1546_v23  ;;  %v1583_v16 = vadd.f32 %v1582_v62, %v1568_v34 }
 0x196   : > { %v1548_v63 = vadd.f32 %v3815_v30, %v1547_v43  ;;  %v1584_v14 = vadd.f32 %v1583_v16, %v1569_v39 }
 0x198   : > { %v1585_v46 = vadd.f32 %v1584_v14, %v1570_v36  ;;  %v1549_v6 = vadd.f32 %v2639_v19, %v1548_v63  ;;  %v2767_v19 = vmov 1966171168  }
 0x199   : > { %v1602_v57 = vunpack.c.l.s4 %v2767_v19 }
 0x19a   : > { %v1550_v55 = vadd.f32 %v2636_v53, %v1549_v6  ;;  %v1586_v42 = vadd.f32 %v1585_v46, %v1571_v40 }
 0x19b   : > { %v1603_v32 = vunpack.c.0.s8 %v1602_v57 }
 0x19c   : > { %v1551_v37 = vadd.f32 %v2645_v29, %v1550_v55  ;;  %v1587_v17 = vadd.f32 %v1586_v42, %v1572_v47 }
 0x19d   : > { %v1606_v15 = vsub.s32 %v1603_v32, %v1605_v28 }
 0x19e   : > { %v1552_v26 = vadd.f32 %v2642_v51, %v1551_v37  ;;  %v1588_v7 = vadd.f32 %v1587_v17, %v1573_v49 }
 0x1a0   : > { %v1553_v3 = vadd.f32 %v2651_v8, %v1552_v26  ;;  %v1589_v13 = vadd.f32 %v1588_v7, %v1574_v22 }
 0x1a2   : > { %v1554_v30 = vadd.f32 %v2648_v60, %v1553_v3  ;;  %v1590_v25 = vadd.f32 %v1589_v13, %v1575_v18 }
 0x1a4   : > { %v1555_v35 = vrot.slane %v1554_v30, 4  ;;  %v1591_v2 = vadd.f32 %v1590_v25, %v1576_v48 }
 0x1a6   : > { %v1556_v24 = vadd.f32 %v1555_v35, %v1554_v30  ;;  %v1592_v1 = vrot.slane %v1591_v2, 4 }
 0x1a8   : > { %v1557_v53 = vrot.slane %v1556_v24, 2  ;;  %v1593_v9 = vadd.f32 %v1592_v1, %v1591_v2 }
 0x1aa   : > { %v1558_v38 = vadd.f32 %v1557_v53, %v1556_v24  ;;  %v1594_v11 = vrot.slane %v1593_v9, 2 }
 0x1ac   : > { %v1559_v54 = vrot.slane %v1558_v38, 1  ;;  %v1595_v44 = vadd.f32 %v1594_v11, %v1593_v9 }
 0x1ae   : > { %v1596_v51 = vrot.slane %v1595_v44, 1  ;;  %v1560_v4 = vadd.f32 %v1559_v54, %v1558_v38 }
 0x1b0   : > { %v1597_v0 = vadd.f32 %v1596_v51, %v1595_v44 }
 0x1b2   : > { %v1600_v29 = vcombine.low %v1560_v4, %v1597_v0 }
 0x1b4   : > { %v1607_v41 = vrot.slane %v1600_v29, %v1606_v15 }
 0x1b6   : > { %v1614_v33 = vrot.slane %v1607_v41, %v1606_v15 }
 0x1b8   : > { %1620 = vst.msk [vmem:[%s270_s12] sm:$0x3] %vm1618_vm4, %v1614_v33 }
 0x1b9 PF: > { %s16_s22 = sadd.s32 1, %s2764_s22   ;;  %s3876_s18 = smov %s2756_s20 }
 0x1ba   : > { %p13_p12 = scmp.ge.s32.totalorder %s16_s22, 6   ;;  %s3877_s19 = smov %s2760_s21 }
 0x1bb   : > { %s3878_s20 = smov %s3881_s23  ;;  %s3879_s21 = smov %s3885_s24 }
 0x1bc   :  { %15 = sbr.rel (!%p13_p12) target bundleno = 3 (0x3), region = 85 }

</bundles_post_ra>
